<compile_context>
chip_gen: v7x
topology: tpu7x:2x2x1
jax: 0.10.0
libtpu: 0.0.40
codegen_flags: <defaults>
</compile_context>

<pallas_src>
import math

import jax
import jax.numpy as jnp
from jax.experimental import pallas as pl
from jax.experimental.pallas import tpu as pltpu


def _round_up(x: int, m: int) -> int:
    return ((x + m - 1) // m) * m


def _default_tile_bytes() -> int:
    """Per-generation output-tile budget (double-buffered by the pipeline)."""
    try:
        kind = jax.devices()[0].device_kind.lower()
    except Exception:  # pragma: no cover - defensive
        kind = ""
    if "v5 lite" in kind or "v5e" in kind or "v5lite" in kind:
        return 4 << 20   # v5e: 16 MiB default scoped VMEM -> keep 2x4 MiB buffers
    if "v6" in kind or "trillium" in kind or "v7" in kind:
        return 8 << 20   # v6e/v7x: <= 8 MiB tiles, 2x8 MiB fits 32 MiB scoped VMEM
    return 4 << 20       # unknown part: conservative


def _time_embedding_kernel(ts_ref, w_ref, out_ref):
    """One grid step.

    ts_ref  : (TR, Kp) f32  packed time stamps (G rows/packed-row) + ones col + 0-pad
    w_ref   : (Kp, L)  f32  rows 0..G-1: group-masked lane-replicated w,
                            row G: lane-replicated phi, rest zero
    out_ref : (TR, L)       L = G*E (multiple of 128)
    """
    # Entire argument ts*w + phi as one MXU matmul (off-group terms are exact 0),
    # leaving the VPU free for the sin() polynomial.
    arg = jnp.dot(ts_ref[...], w_ref[...], preferred_element_type=jnp.float32)
    out_ref[...] = jnp.sin(arg).astype(out_ref.dtype)


def time_embedding(time_stamps, w, phi, *, is_time_delta: bool = False,
                   out_dtype=jnp.float32, tile_bytes: int | None = None,
                   min_grid_steps: int = 4):
    """time_stamps: (B, S); w, phi: (1, E)  ->  (B, S, E)."""
    B, S = time_stamps.shape
    E = w.shape[1]
    f32 = jnp.float32
    out_dtype = jnp.dtype(out_dtype)
    if tile_bytes is None:
        tile_bytes = _default_tile_bytes()

    ts = time_stamps.astype(f32)
    # Time delta on the tiny (B, S) input in the wrapper (keeps tiling halo-free).
    if is_time_delta:
        ts = jnp.concatenate([ts[:, :1] * 0, ts[:, 1:] - ts[:, :-1]], axis=-1)

    # Lane-dense packing factor: smallest G with (G*E) % 128 == 0.
    groups = 128 // math.gcd(E, 128)
    lanes = groups * E
    k = groups + 1                     # ts columns + ones column (folds phi in)
    k_pad = _round_up(k, 8)

    R = B * S
    r_pack = -(-R // groups)

    # Tile sizing: MXU-aligned rows, <= tile_bytes per output tile, and >=
    # min_grid_steps grid steps for large inputs (megacore sharding + overlap).
    bytes_per_row = lanes * out_dtype.itemsize
    row_align = 256 if 256 * bytes_per_row <= tile_bytes else 8
    target = max(1, tile_bytes // bytes_per_row)
    target = min(target, max(1, -(-r_pack // min_grid_steps)))
    tile_rows = max(row_align, (target // row_align) * row_align)
    tile_rows = min(tile_rows, _round_up(r_pack, row_align))
    r_pad = _round_up(r_pack, tile_rows)

    # Packed timestamps: (r_pad, G) + ones column (phi) + zero pad to k_pad.
    ts_flat = jnp.pad(ts.reshape(-1), (0, r_pad * groups - R))
    ts_mat = jnp.concatenate(
        [ts_flat.reshape(r_pad, groups),
         jnp.ones((r_pad, 1), f32),
         jnp.zeros((r_pad, k_pad - k), f32)], axis=-1)

    # w_mat[g, g*E + e] = w[e] (exact zero off-group); w_mat[G] = tiled phi.
    lane_idx = jnp.arange(lanes)
    group_of_lane = lane_idx // E
    w_lanes = jnp.tile(w.astype(f32).reshape(E), groups)                       # (L,)
    w_rows = jnp.where(group_of_lane[None, :] == jnp.arange(groups)[:, None],
                       w_lanes[None, :], 0.0)                                  # (G, L)
    phi_row = jnp.tile(phi.astype(f32).reshape(1, E), (1, groups))             # (1, L)
    w_mat = jnp.concatenate(
        [w_rows, phi_row, jnp.zeros((k_pad - k, lanes), f32)], axis=0)         # (Kp, L)

    grid = (r_pad // tile_rows,)
    cost = pl.CostEstimate(
        flops=2 * r_pad * lanes * k_pad,
        transcendentals=r_pad * lanes,
        bytes_accessed=(r_pad * k_pad + k_pad * lanes) * 4
                       + r_pad * lanes * out_dtype.itemsize)

    out_packed = pl.pallas_call(
        _time_embedding_kernel,
        out_shape=jax.ShapeDtypeStruct((r_pad, lanes), out_dtype),
        grid=grid,
        in_specs=[
            pl.BlockSpec((tile_rows, k_pad), lambda i: (i, 0)),
            pl.BlockSpec((k_pad, lanes), lambda i: (0, 0)),
        ],
        out_specs=pl.BlockSpec((tile_rows, lanes), lambda i: (i, 0)),
        compiler_params=pltpu.CompilerParams(
            dimension_semantics=("parallel",),
            vmem_limit_bytes=32 * 1024 * 1024),
        cost_estimate=cost,
    )(ts_mat, w_mat)

    # Packed (R/G, G*E) -> (R, E) is a contiguous row-major reshape (free).
    out = out_packed.reshape(r_pad * groups, E)[:R]
    return out.reshape(B, S, E)


def xavier_uniform(key, shape, dtype=jnp.float32):
    # PyTorch xavier_uniform_ on a (1, E) parameter: fan_out=1, fan_in=E.
    fan_out, fan_in = shape
    bound = (6.0 / (fan_in + fan_out)) ** 0.5
    return jax.random.uniform(key, shape, dtype, minval=-bound, maxval=bound)


def reference(time_stamps, w, phi, *, is_time_delta: bool = False):
    ts = time_stamps.astype(jnp.float32)
    if is_time_delta:
        ts = jnp.concatenate([ts[:, :1] * 0, ts[:, 1:] - ts[:, :-1]], axis=-1)
    return jnp.sin(ts[:, :, None] * w[None] + phi[None])


if __name__ == "__main__":
    key = jax.random.PRNGKey(0)
    k_ts, k_w, k_phi, k_ts2 = jax.random.split(key, 4)

    B, S, E = 2, 8, 32
    time_stamps = jax.random.uniform(k_ts, (B, S), jnp.float32, 0.0, 10.0)
    w = xavier_uniform(k_w, (1, E))
    phi = xavier_uniform(k_phi, (1, E))

    ok = True
    for is_delta in (False, True):
        out = jax.block_until_ready(
            time_embedding(time_stamps, w, phi, is_time_delta=is_delta))
        ref = reference(time_stamps, w, phi, is_time_delta=is_delta)
        ok &= out.shape == (B, S, E)
        ok &= bool(jnp.allclose(out, ref, atol=2e-5, rtol=2e-5))

    # Second shape (not a multiple of the pack/tile size) to exercise padding.
    B2, S2 = 3, 50
    ts2 = jax.random.uniform(k_ts2, (B2, S2), jnp.float32, 0.0, 10.0)
    out2 = jax.block_until_ready(time_embedding(ts2, w, phi, is_time_delta=True))
    ref2 = reference(ts2, w, phi, is_time_delta=True)
    ok &= out2.shape == (B2, S2, E)
    ok &= bool(jnp.allclose(out2, ref2, atol=2e-5, rtol=2e-5))

    if ok:
        print("KERNEL_OK")
    else:
        raise SystemExit("mismatch vs reference")
</pallas_src>

<mosaic_0001>
module attributes {stable_mosaic.version = 11 : i64} {
  func.func @_time_embedding_kernel(%arg0: i32, %arg1: memref<256x8xf32, #tpu.memory_space<vmem>>, %arg2: memref<8x128xf32, #tpu.memory_space<vmem>>, %arg3: memref<256x128xf32, #tpu.memory_space<vmem>>) attributes {dimension_semantics = [#tpu.dimension_semantics<parallel>], iteration_bounds = array<i64: 1>, scalar_prefetch = 0 : i64, scratch_operands = 0 : i64, tpu.core_type = #tpu.core_type<tc>, window_params = [{transform_indices = @transform_0, window_bounds = array<i64: 256, 8>}, {pipeline_mode = #tpu.pipeline_mode<synchronous>, transform_indices = @transform_1, window_bounds = array<i64: 8, 128>}, {transform_indices = @transform_2, window_bounds = array<i64: 256, 128>}]} {
    %c0 = arith.constant 0 : index
    %c0_0 = arith.constant 0 : index
    %0 = vector.load %arg1[%c0, %c0_0] : memref<256x8xf32, #tpu.memory_space<vmem>>, vector<256x8xf32>
    %c0_1 = arith.constant 0 : index
    %c0_2 = arith.constant 0 : index
    %1 = vector.load %arg2[%c0_1, %c0_2] : memref<8x128xf32, #tpu.memory_space<vmem>>, vector<8x128xf32>
    %cst = arith.constant dense<0.000000e+00> : vector<256x128xf32>
    %2 = tpu.matmul %0, %1, %cst {dimension_numbers = #tpu.dot_dimension_numbers<[1], [0], [0], [1], [0, 0, 1, 1], [], []>} : vector<256x8xf32>, vector<8x128xf32>, vector<256x128xf32> -> vector<256x128xf32>
    %3 = math.sin %2 : vector<256x128xf32>
    %c0_3 = arith.constant 0 : index
    %c0_4 = arith.constant 0 : index
    %4 = vector.load %arg3[%c0_3, %c0_4] : memref<256x128xf32, #tpu.memory_space<vmem>>, vector<256x128xf32>
    tpu.vector_store %arg3[%c0_3, %c0_4], %3 {strides = array<i32>} : memref<256x128xf32, #tpu.memory_space<vmem>>, vector<256x128xf32>,
    return
  }
  func.func @transform_0(%arg0: i32) -> (i32, i32) {
    %c0_i32 = arith.constant 0 : i32
    %c0_i32_0 = arith.constant 0 : i32
    return %arg0, %c0_i32 : i32, i32
  }
  func.func @transform_1(%arg0: i32) -> (i32, i32) {
    %c0_i32 = arith.constant 0 : i32
    %c0_i32_0 = arith.constant 0 : i32
    %c0_i32_1 = arith.constant 0 : i32
    return %c0_i32, %c0_i32_0 : i32, i32
  }
  func.func @transform_2(%arg0: i32) -> (i32, i32) {
    %c0_i32 = arith.constant 0 : i32
    %c0_i32_0 = arith.constant 0 : i32
    return %arg0, %c0_i32 : i32, i32
  }
}

</mosaic_0001>

<bundles_post_ra>
// kernel: tpu_custom_call.1
= control target key start
LH: loop header
LB: loop body
LE: loop exit
PB: predicated region body
PF: predicated region fallthrough
CT: control target
= control target key end

     0   :  { %vm45_vm0 = vcmask 64512   ;;  %s7055_s0 = inlined_call_operand.vmem [shape: f32[256,8], index: 0, kind: input, shape index: {}]   ;;  %s7056_s1 = inlined_call_operand.vmem [shape: f32[8,128], index: 1, kind: input, shape index: {}]   ;;  %s7057_s2 = inlined_call_operand.hbm [shape: f32[256,128], index: 2, kind: output, shape index: {}]  }
   0x1   :  { %v44_v0 = vld [vmem:[%s7056_s1] sm:$0xff]  ;;  %v13_v3 = vld [vmem:[%s7055_s0 + $0x8] sm:$0xff]  ;;  %v14_v5 = vld [vmem:[%s7055_s0 + $0x10] sm:$0xff] }
   0x2   :  { %v12_v1 = vld [vmem:[%s7055_s0] sm:$0xff]  ;;  %3936 = vmatprep.subr.mxu0 %v44_v0  ;;  %3986 = vmatprep.subr.mxu1 %v44_v0  ;;  %v29_v4 = vld [vmem:[%s7055_s0 + $0x88] sm:$0xff]  ;;  %v30_v6 = vld [vmem:[%s7055_s0 + $0x90] sm:$0xff] }
   0x3   :  { %v28_v2 = vld [vmem:[%s7055_s0 + $0x80] sm:$0xff]  ;;  %3937 = vmatpush3.msra.mxu0 %v44_v0  ;;  %3987 = vmatpush3.msra.mxu1 %v44_v0  ;;  %v15_v7 = vld [vmem:[%s7055_s0 + $0x18] sm:$0xff]  ;;  %v17_v11 = vld [vmem:[%s7055_s0 + $0x28] sm:$0xff] }
   0x4   :  { %3938 = vmatprep.mubr.msk.f32.mxu0 %vm45_vm0, %v12_v1  ;;  %3962 = vmatprep.mubr.msk.f32.mxu1 %vm45_vm0, %v28_v2  ;;  %v31_v8 = vld [vmem:[%s7055_s0 + $0x98] sm:$0xff]  ;;  %v16_v9 = vld [vmem:[%s7055_s0 + $0x20] sm:$0xff]  ;;  %v33_v12 = vld [vmem:[%s7055_s0 + $0xa8] sm:$0xff] }
   0x5   :  { %3939 = vmatmul.mubr.msk.f32.vlgmr.msra.gmra.mrb[0].mxu0 %vm45_vm0, %v13_v3  ;;  %3963 = vmatmul.mubr.msk.f32.vlgmr.msra.gmra.mrb[0].mxu1 %vm45_vm0, %v29_v4  ;;  %v32_v10 = vld [vmem:[%s7055_s0 + $0xa0] sm:$0xff]  ;;  %v18_v13 = vld [vmem:[%s7055_s0 + $0x30] sm:$0xff] }
   0x6   :  { %3941 = vmatprep.mubr.msk.f32.mxu0 %vm45_vm0, %v14_v5  ;;  %3965 = vmatprep.mubr.msk.f32.mxu1 %vm45_vm0, %v30_v6  ;;  %v34_v14 = vld [vmem:[%s7055_s0 + $0xb0] sm:$0xff] }
   0x9   :  { %3942 = vmatmul.mubr.msk.f32.gmra.mrb[2].mxu0 %vm45_vm0, %v15_v7  ;;  %3966 = vmatmul.mubr.msk.f32.gmra.mrb[2].mxu1 %vm45_vm0, %v31_v8 }
   0xa   :  { %3944 = vmatprep.mubr.msk.f32.mxu0 %vm45_vm0, %v16_v9  ;;  %3968 = vmatprep.mubr.msk.f32.mxu1 %vm45_vm0, %v32_v10 }
   0xb   :  { %7 = vsyncpa [#allocation3], 0  ;;  %v19_v15 = vld [vmem:[%s7055_s0 + $0x38] sm:$0xff]  ;;  %v20_v17 = vld [vmem:[%s7055_s0 + $0x40] sm:$0xff]  ;;  %v4277_v5 = vmov 683565275  }
   0xc   :  { %v35_v16 = vld [vmem:[%s7055_s0 + $0xb8] sm:$0xff]  ;;  %v36_v18 = vld [vmem:[%s7055_s0 + $0xc0] sm:$0xff]  ;;  %v21_v19 = vld [vmem:[%s7055_s0 + $0x48] sm:$0xff]  ;;  %v4278_v9 = vmov 2475754826  }
   0xd   :  { %3945 = vmatmul.mubr.msk.f32.gmra.mrb[4].mxu0 %vm45_vm0, %v17_v11  ;;  %3969 = vmatmul.mubr.msk.f32.gmra.mrb[4].mxu1 %vm45_vm0, %v33_v12  ;;  %v37_v20 = vld [vmem:[%s7055_s0 + $0xc8] sm:$0xff]  ;;  %v22_v21 = vld [vmem:[%s7055_s0 + $0x50] sm:$0xff]  ;;  %v23_v23 = vld [vmem:[%s7055_s0 + $0x58] sm:$0xff]  ;;  %v4279_v11 = vmov 2131351028  }
   0xe   :  { %3947 = vmatprep.mubr.msk.f32.mxu0 %vm45_vm0, %v18_v13  ;;  %3971 = vmatprep.mubr.msk.f32.mxu1 %vm45_vm0, %v34_v14  ;;  %v38_v22 = vld [vmem:[%s7055_s0 + $0xd0] sm:$0xff]  ;;  %v39_v24 = vld [vmem:[%s7055_s0 + $0xd8] sm:$0xff]  ;;  %v24_v25 = vld [vmem:[%s7055_s0 + $0x60] sm:$0xff]  ;;  %v4280_v13 = vmov 2102212464  }
   0xf   :  { %v40_v26 = vld [vmem:[%s7055_s0 + $0xe0] sm:$0xff]  ;;  %v25_v27 = vld [vmem:[%s7055_s0 + $0x68] sm:$0xff]  ;;  %v26_v29 = vld [vmem:[%s7055_s0 + $0x70] sm:$0xff] }
  0x10   :  { %v41_v28 = vld [vmem:[%s7055_s0 + $0xe8] sm:$0xff]  ;;  %v42_v30 = vld [vmem:[%s7055_s0 + $0xf0] sm:$0xff]  ;;  %v27_v31 = vld [vmem:[%s7055_s0 + $0x78] sm:$0xff] }
  0x11   :  { %3948 = vmatmul.mubr.msk.f32.gmra.mrb[6].mxu0 %vm45_vm0, %v19_v15  ;;  %3972 = vmatmul.mubr.msk.f32.gmra.mrb[6].mxu1 %vm45_vm0, %v35_v16  ;;  %v43_v32 = vld [vmem:[%s7055_s0 + $0xf8] sm:$0xff]  ;;  %v4281_v15 = vmov 920167782   ;;  %s4283_s0 = smov [#allocation2]  }
  0x12   :  { %3950 = vmatprep.mubr.msk.f32.mxu0 %vm45_vm0, %v20_v17  ;;  %3974 = vmatprep.mubr.msk.f32.mxu1 %vm45_vm0, %v36_v18  ;;  %s3732_s17 = sshll.u32 %s4283_s0, 4  ;;  %s3733_s17 = int_to_ptr.vmem [resolvable:$true] %s3732_s17 }
  0x13   :  { %s4253_s18 = scalar_lea.vmem %s3733_s17, 4096  ;;  %p4258_p1 = scmp.lt.s32.totalorder %s3733_s17, %s3733_s17 }
  0x14   :  { %p4254_p0 = scmp.ne.s32.totalorder %s3733_s17, %s4253_s18  ;;  %p4259_p2 = scmp.lt.s32.totalorder %s4253_s18, %s4253_s18 }
  0x15   :  { %3951 = vmatmul.mubr.msk.f32.gmra.mrb[8].mxu0 %vm45_vm0, %v21_v19  ;;  %3975 = vmatmul.mubr.msk.f32.gmra.mrb[8].mxu1 %vm45_vm0, %v37_v20 }
  0x16   :  { %3953 = vmatprep.mubr.msk.f32.mxu0 %vm45_vm0, %v22_v21  ;;  %3977 = vmatprep.mubr.msk.f32.mxu1 %vm45_vm0, %v38_v22  ;;  %v4282_v22 = vmov 1326507024   ;;  %p4260_p3 = por %p4259_p2, %p4258_p1 }
  0x18   :  { %p4261_p4 = pnand %p4260_p3, %p4254_p0 }
  0x19   :  { %3954 = vmatmul.mubr.msk.f32.gmra.mrb[10].mxu0 %vm45_vm0, %v23_v23  ;;  %3978 = vmatmul.mubr.msk.f32.gmra.mrb[10].mxu1 %vm45_vm0, %v39_v24 }
  0x1a   :  { %3956 = vmatprep.mubr.msk.f32.mxu0 %vm45_vm0, %v24_v25  ;;  %3980 = vmatprep.mubr.msk.f32.mxu1 %vm45_vm0, %v40_v26 }
  0x1d   :  { %3957 = vmatmul.mubr.msk.f32.gmra.mrb[12].mxu0 %vm45_vm0, %v25_v27  ;;  %3981 = vmatmul.mubr.msk.f32.gmra.mrb[12].mxu1 %vm45_vm0, %v41_v28 }
  0x1e   :  { %3959 = vmatprep.mubr.msk.f32.mxu0 %vm45_vm0, %v26_v29  ;;  %3983 = vmatprep.mubr.msk.f32.mxu1 %vm45_vm0, %v42_v30 }
  0x21   :  { %3960 = vmatmul.mubr.msk.f32.gmra.mrb[14].mxu0 %vm45_vm0, %v27_v31  ;;  %3984 = vmatmul.mubr.msk.f32.gmra.mrb[14].mxu1 %vm45_vm0, %v43_v32 }
  0xd8   :  { %v4432_v33 = vpop.f32.mrb[0].mxu0  ;;  %v4434_v34 = vpop.f32.mrb[0].mxu1 }
  0xd9   :  { %v471_v35 = vand.u32 2147483647, %v4432_v33  ;;  %v474_v36 = vand.u32 2139095040, %v4432_v33  ;;  %v4438_v37 = vpop.f32.mrb[1].mxu0  ;;  %v4440_v38 = vpop.f32.mrb[1].mxu1  ;;  %v2138_v40 = vand.u32 2139095040, %v4434_v34 }
  0xda   :  { %v2135_v39 = vand.u32 2147483647, %v4434_v34  ;;  %v370_v45 = vand.u32 2139095040, %v4438_v37  ;;  %v367_v56 = vand.u32 2147483647, %v4438_v37  ;;  %v2034_v3 = vand.u32 2139095040, %v4440_v38 }
  0xdb   :  { %v475_v41 = vshrl.u32 %v474_v36, 23  ;;  %v478_v42 = vand.u32 8388607, %v471_v35  ;;  %v2139_v43 = vshrl.u32 %v2138_v40, 23  ;;  %vm473_vm14 = vcmp.lt.s32.totalorder %v4432_v33, 0 }
  0xdc   :  { %v2142_v44 = vand.u32 8388607, %v2135_v39  ;;  %v4449_v47 = vpop.f32.mrb[2].mxu0  ;;  %v4451_v48 = vpop.f32.mrb[2].mxu1  ;;  %v371_v50 = vshrl.u32 %v370_v45, 23 }
  0xdd   :  { %v3779_v46 = vadd.s32 4294967169, %v475_v41  ;;  %v3843_v49 = vadd.s32 4294967169, %v2139_v43  ;;  %v4453_v51 = vpop.f32.mrb[3].mxu0  ;;  %v479_v52 = vor.u32 8388608, %v478_v42  ;;  %v4456_v58 = vpop.f32.mrb[3].mxu1 }
  0xde   :  { %v2143_v54 = vor.u32 8388608, %v2142_v44  ;;  %v3775_v57 = vadd.s32 4294967169, %v371_v50  ;;  %v4464_v1 = vand.u32 8388607, %v367_v56  ;;  %vm4556_vm15 = vcmp.le.f32.partialorder %v471_v35, 0.7853982 }
  0xdf   :  { %v481_v53 = vadd.s32 1, %v3779_v46  ;;  %v2145_v55 = vadd.s32 1, %v3843_v49  ;;  %v4458_v62 = vshll.u32 %v479_v52, 8 }
  0xe0   :  { %v4460_v0 = vshll.u32 %v2143_v54, 8  ;;  %v4466_v2 = vadd.s32 1, %v3775_v57 }
  0xe1   :  { %vm482_vm1 = vcmp.gt.s32.totalorder %v481_v53, 0  ;;  %vm2146_vm2 = vcmp.gt.s32.totalorder %v2145_v55, 0 }
  0xe2   :  { %v483_v59 = vsel %vm482_vm1, %v481_v53, 0  ;;  %v2147_v63 = vsel %vm2146_vm2, %v2145_v55, 0  ;;  %vm378_vm7 = vcmp.gt.s32.totalorder %v4466_v2, 0 }
  0xe3   :  { %v484_v60 = vshrl.u32 %v483_v59, 5  ;;  %v485_v61 = vand.u32 31, %v483_v59  ;;  %v4470_v7 = vshrl.u32 %v2147_v63, 5  ;;  %v2149_v8 = vand.u32 31, %v2147_v63 }
  0xe5   :  { %v486_v4 = vsub.s32 32, %v485_v61  ;;  %v488_v6 = vshll.u32 %v4277_v5, %v485_v61  ;;  %v491_v10 = vshll.u32 %v4278_v9, %v485_v61  ;;  %v494_v12 = vshll.u32 %v4279_v11, %v485_v61 }
  0xe6   :  { %v497_v14 = vshll.u32 %v4280_v13, %v485_v61  ;;  %v500_v16 = vshll.u32 %v4281_v15, %v485_v61  ;;  %vm503_vm3 = vcmp.lt.s32.totalorder %v484_v60, 1  ;;  %vm504_vm4 = vcmp.lt.s32.totalorder %v484_v60, 2 }
  0xe7   :  { %v489_v17 = vshrl.u32 %v4278_v9, %v486_v4  ;;  %v492_v18 = vshrl.u32 %v4279_v11, %v486_v4  ;;  %v495_v19 = vshrl.u32 %v4280_v13, %v486_v4  ;;  %v487_v20 = vshrl.u32 %v4277_v5, %v486_v4 }
  0xe8   :  { %v498_v21 = vshrl.u32 %v4281_v15, %v486_v4  ;;  %v501_v23 = vshrl.u32 %v4282_v22, %v486_v4  ;;  %v2150_v27 = vsub.s32 32, %v2149_v8  ;;  %vm505_vm5 = vcmp.lt.s32.totalorder %v484_v60, 3 }
  0xe9   :  { %v490_v24 = vor.u32 %v489_v17, %v488_v6  ;;  %v493_v25 = vor.u32 %v492_v18, %v491_v10  ;;  %v496_v26 = vor.u32 %v495_v19, %v494_v12  ;;  %vm506_vm6 = vcmp.lt.s32.totalorder %v484_v60, 4 }
  0xea   :  { %v499_v28 = vor.u32 %v498_v21, %v497_v14  ;;  %v502_v29 = vor.u32 %v501_v23, %v500_v16  ;;  %v2152_v43 = vshll.u32 %v4277_v5, %v2149_v8  ;;  %v2153_v46 = vshrl.u32 %v4278_v9, %v2150_v27 }
  0xeb   :  { %v507_v30 = vsel %vm503_vm3, %v487_v20, %v490_v24  ;;  %v508_v31 = vsel %vm506_vm6, %v496_v26, 2102212464  ;;  %v511_v32 = vsel %vm503_vm3, %v490_v24, %v493_v25  ;;  %v515_v36 = vsel %vm503_vm3, %v493_v25, %v496_v26 }
  0xec   :  { %v509_v40 = vsel %vm505_vm5, %v493_v25, %v508_v31  ;;  %v512_v41 = vsel %vm506_vm6, %v499_v28, 920167782  ;;  %v516_v42 = vsel %vm506_vm6, %v502_v29, 1326507024  ;;  %v2155_v49 = vshll.u32 %v4278_v9, %v2149_v8 }
  0xed   :  { %v513_v44 = vsel %vm505_vm5, %v496_v26, %v512_v41  ;;  %v517_v45 = vsel %vm505_vm5, %v499_v28, %v516_v42  ;;  %v510_v50 = vsel %vm504_vm4, %v507_v30, %v509_v40  ;;  %v2156_v54 = vshrl.u32 %v4279_v11, %v2150_v27 }
  0xee   :  { %v514_v52 = vsel %vm504_vm4, %v511_v32, %v513_v44  ;;  %v518_v53 = vsel %vm504_vm4, %v515_v36, %v517_v45  ;;  %v2154_v63 = vor.u32 %v2153_v46, %v2152_v43  ;;  %v2158_v6 = vshll.u32 %v4279_v11, %v2149_v8 }
  0xef   :  { %v4494_v55 = vmul.u32.u64.low %v4458_v62, %v518_v53  ;;  %v4495_v57 = vmul.u32.u64.high %v4458_v62, %v518_v53, %v4494_v55  ;;  %v4498_v59 = vmul.u32.u64.low %v4458_v62, %v514_v52  ;;  %v4499_v61 = vmul.u32.u64.high %v4458_v62, %v514_v52, %v4498_v59 }
  0xf0   :  { %v2157_v4 = vor.u32 %v2156_v54, %v2155_v49  ;;  %v2159_v10 = vshrl.u32 %v4280_v13, %v2150_v27  ;;  %v2151_v12 = vshrl.u32 %v4277_v5, %v2150_v27  ;;  %v2161_v60 = vshll.u32 %v4280_v13, %v2149_v8  ;;  %v4536_v54 = vpop.f32.mrb[4].mxu0 }
  0xf1   :  { %v2162_v14 = vshrl.u32 %v4281_v15, %v2150_v27  ;;  %v2165_v16 = vshrl.u32 %v4282_v22, %v2150_v27  ;;  %v526_v17 = vmul.u32 %v4458_v62, %v510_v50  ;;  %v2164_v19 = vshll.u32 %v4281_v15, %v2149_v8 }
  0xf2   :  { %v2160_v18 = vor.u32 %v2159_v10, %v2158_v6  ;;  %vm2167_vm8 = vcmp.lt.s32.totalorder %v4470_v7, 1  ;;  %vm528_vm9 = vc.u32 %v4495_v57, %v4498_v59  ;;  %v529_v20 = vadd.s32 1, %v4499_v61 }
  0xf3   :  { %v2163_v21 = vor.u32 %v2162_v14, %v2161_v60  ;;  %vm2168_vm10 = vcmp.lt.s32.totalorder %v4470_v7, 2  ;;  %v2166_v23 = vor.u32 %v2165_v16, %v2164_v19  ;;  %vm2169_vm11 = vcmp.lt.s32.totalorder %v4470_v7, 3 }
  0xf4   :  { %vm2170_vm12 = vcmp.lt.s32.totalorder %v4470_v7, 4  ;;  %v2175_v24 = vsel %vm2167_vm8, %v2154_v63, %v2157_v4  ;;  %v530_v62 = vsel %vm528_vm9, %v529_v20, %v4499_v61  ;;  %v2179_v8 = vsel %vm2167_vm8, %v2157_v4, %v2160_v18 }
  0xf5   :  { %v2172_v25 = vsel %vm2170_vm12, %v2160_v18, 2102212464  ;;  %v2176_v26 = vsel %vm2170_vm12, %v2163_v21, 920167782  ;;  %v531_v27 = vadd.s32 %v530_v62, %v526_v17  ;;  %v2171_v28 = vsel %vm2167_vm8, %v2151_v12, %v2154_v63 }
  0xf6   :  { %v2177_v29 = vsel %vm2169_vm11, %v2160_v18, %v2176_v26  ;;  %v2180_v30 = vsel %vm2170_vm12, %v2166_v23, 1326507024  ;;  %v2173_v31 = vsel %vm2169_vm11, %v2157_v4, %v2172_v25  ;;  %v379_v40 = vsel %vm378_vm7, %v4466_v2, 0 }
  0xf7   :  { %v2178_v32 = vsel %vm2168_vm10, %v2175_v24, %v2177_v29  ;;  %v2181_v36 = vsel %vm2169_vm11, %v2163_v21, %v2180_v30  ;;  %v532_v41 = vadd.s32 536870912, %v531_v27  ;;  %v2031_v49 = vand.u32 2147483647, %v4440_v38 }
  0xf8   :  { %v2182_v42 = vsel %vm2168_vm10, %v2179_v8, %v2181_v36  ;;  %v4524_v43 = vmul.u32.u64.low %v4460_v0, %v2178_v32  ;;  %v4525_v44 = vmul.u32.u64.high %v4460_v0, %v2178_v32, %v4524_v43  ;;  %v2174_v52 = vsel %vm2168_vm10, %v2171_v28, %v2173_v31 }
  0xf9   :  { %v4529_v45 = vmul.u32.u64.low %v4460_v0, %v2182_v42  ;;  %v4530_v46 = vmul.u32.u64.high %v4460_v0, %v2182_v42, %v4529_v45  ;;  %v533_v50 = vshrl.u32 %v532_v41, 30  ;;  %v375_v2 = vor.u32 8388608, %v4464_v1 }
  0xfa   :  { %v381_v53 = vand.u32 31, %v379_v40  ;;  %v2193_v61 = vadd.s32 1, %v4525_v44  ;;  %v2035_v4 = vshrl.u32 %v2034_v3, 23  ;;  %v2190_v6 = vmul.u32 %v4460_v0, %v2174_v52 }
  0xfb   :  { %v534_v55 = vshll.u32 %v533_v50, 30  ;;  %vm2192_vm13 = vc.u32 %v4530_v46, %v4524_v43  ;;  %v4546_v7 = vand.u32 8388607, %v2031_v49  ;;  %v4552_v12 = vshll.u32 %v375_v2, 8 }
  0xfc   :  { %v382_v63 = vsub.s32 32, %v381_v53  ;;  %v2194_v10 = vsel %vm2192_vm13, %v2193_v61, %v4525_v44  ;;  %v527_v0 = vadd.s32 %v4498_v59, %v4495_v57  ;;  %v4561_v14 = vshrl.u32 %v379_v40, 5 }
  0xfd   :  { %v4549_v1 = vsub.s32 %v531_v27, %v534_v55  ;;  %v2195_v60 = vadd.s32 %v2194_v10, %v2190_v6  ;;  %v3839_v20 = vadd.s32 4294967169, %v2035_v4  ;;  %v557_v21 = vsub.s32 4, %v533_v50 }
  0xfe   :  { %v385_v16 = vshrl.u32 %v4278_v9, %v382_v63  ;;  %v388_v18 = vshrl.u32 %v4279_v11, %v382_v63  ;;  %v391_v19 = vshrl.u32 %v4280_v13, %v382_v63  ;;  %v384_v35 = vshll.u32 %v4277_v5, %v381_v53 }
  0xff   :  { %v537_v17 = vsub.s32 0, %v4549_v1  ;;  %v2196_v23 = vadd.s32 536870912, %v2195_v60  ;;  %v2039_v24 = vor.u32 8388608, %v4546_v7  ;;  %v387_v59 = vshll.u32 %v4278_v9, %v381_v53 }
 0x100   :  { %v390_v62 = vshll.u32 %v4279_v11, %v381_v53  ;;  %v394_v25 = vshrl.u32 %v4281_v15, %v382_v63  ;;  %v386_v8 = vor.u32 %v385_v16, %v384_v35  ;;  %v393_v27 = vshll.u32 %v4280_v13, %v381_v53 }
 0x101   :  { %v3780_v57 = vmin.u32 %v537_v17, %v4549_v1  ;;  %v2197_v26 = vshrl.u32 %v2196_v23, 30  ;;  %v397_v28 = vshrl.u32 %v4282_v22, %v382_v63  ;;  %v389_v30 = vor.u32 %v388_v18, %v387_v59 }
 0x102   :  { %v392_v31 = vor.u32 %v391_v19, %v390_v62  ;;  %v396_v32 = vshll.u32 %v4281_v15, %v381_v53  ;;  %v558_v36 = vsel %vm473_vm14, %v557_v21, %v533_v50  ;;  %v395_v41 = vor.u32 %v394_v25, %v393_v27 }
 0x103   :  { %v539_v29 = vclz %v3780_v57  ;;  %v2198_v40 = vshll.u32 %v2197_v26, 30  ;;  %vm399_vm0 = vcmp.lt.s32.totalorder %v4561_v14, 1  ;;  %vm400_vm1 = vcmp.lt.s32.totalorder %v4561_v14, 2 }
 0x104   :  { %v398_v44 = vor.u32 %v397_v28, %v396_v32  ;;  %vm402_vm2 = vcmp.lt.s32.totalorder %v4561_v14, 4  ;;  %vm2137_vm3 = vcmp.lt.s32.totalorder %v4434_v34, 0  ;;  %v383_v52 = vshrl.u32 %v4277_v5, %v382_v63 }
 0x105   :  { %v3781_v42 = vadd.s32 4294967294, %v539_v29  ;;  %v4582_v45 = vsub.s32 %v2195_v60, %v2198_v40  ;;  %vm401_vm4 = vcmp.lt.s32.totalorder %v4561_v14, 3  ;;  %v408_v50 = vsel %vm402_vm2, %v395_v41, 920167782 }
 0x106   :  { %v560_v2 = vsel %vm4556_vm15, 0, %v558_v36  ;;  %v407_v53 = vsel %vm399_vm0, %v386_v8, %v389_v30  ;;  %v409_v55 = vsel %vm401_vm4, %v392_v31, %v408_v50  ;;  %v2221_v6 = vsub.s32 4, %v2197_v26 }
 0x107   :  { %vm3782_vm5 = vcmp.lt.s32.totalorder %v3781_v42, 0  ;;  %v2201_v4 = vsub.s32 0, %v4582_v45  ;;  %v411_v63 = vsel %vm399_vm0, %v389_v30, %v392_v31  ;;  %vm4599_vm6 = vcmp.le.f32.partialorder %v2135_v39, 0.7853982 }
 0x108   :  { %v542_v61 = vsel %vm3782_vm5, 0, %v3781_v42  ;;  %v404_v17 = vsel %vm402_vm2, %v392_v31, 2102212464  ;;  %v412_v18 = vsel %vm402_vm2, %v398_v44, 1326507024  ;;  %v410_v23 = vsel %vm400_vm1, %v407_v53, %v409_v55  ;;  %v4632_v44 = vpop.f32.mrb[4].mxu1 }
 0x109   :  { %v543_v10 = vsub.s32 32, %v542_v61  ;;  %v547_v60 = vsub.s32 4294967266, %v542_v61  ;;  %v544_v19 = vshll.u32 %v4549_v1, %v542_v61  ;;  %v3844_v21 = vmin.u32 %v2201_v4, %v4582_v45 }
 0x10a   :  { %v413_v35 = vsel %vm401_vm4, %v395_v41, %v412_v18  ;;  %v2041_v62 = vadd.s32 1, %v3839_v20  ;;  %v564_v25 = vadd.s32 3, %v560_v2  ;;  %v403_v28 = vsel %vm399_vm0, %v383_v52, %v386_v8 }
 0x10b   :  { %v545_v39 = vshrl.u32 %v527_v0, %v543_v10  ;;  %v548_v57 = vadd.s32 127, %v547_v60  ;;  %v414_v59 = vsel %vm400_vm1, %v411_v63, %v413_v35  ;;  %v2203_v27 = vclz %v3844_v21 }
 0x10c   :  { %v405_v1 = vsel %vm401_vm4, %v389_v30, %v404_v17  ;;  %v4620_v32 = vmul.u32.u64.low %v4552_v12, %v414_v59  ;;  %v4621_v36 = vmul.u32.u64.high %v4552_v12, %v414_v59, %v4620_v32  ;;  %vm2042_vm7 = vcmp.gt.s32.totalorder %v2041_v62, 0 }
 0x10d   :  { %v546_v29 = vor.u32 %v545_v39, %v544_v19  ;;  %v549_v31 = vshll.u32 %v548_v57, 23  ;;  %v3845_v0 = vadd.s32 4294967294, %v2203_v27  ;;  %v2191_v8 = vadd.s32 %v4524_v43, %v4530_v46 }
 0x10e   :  { %v4624_v40 = vmul.u32.u64.low %v4552_v12, %v410_v23  ;;  %v4625_v41 = vmul.u32.u64.high %v4552_v12, %v410_v23, %v4624_v40  ;;  %v2222_v30 = vsel %vm2137_vm3, %v2221_v6, %v2197_v26  ;;  %v2043_v42 = vsel %vm2042_vm7, %v2041_v62, 0 }
 0x10f   :  { %v550_v20 = vor.u32 4788187, %v549_v31  ;;  %v4634_v52 = vand.u32 3, %v564_v25  ;;  %vm3846_vm8 = vcmp.lt.s32.totalorder %v3845_v0, 0  ;;  %v406_v50 = vsel %vm400_vm1, %v403_v28, %v405_v1 }
 0x110   :  { %v2045_v2 = vand.u32 31, %v2043_v42  ;;  %v553_v55 = vcvt.s32.f32 %v546_v29  ;;  %v2206_v61 = vsel %vm3846_vm8, 0, %v3845_v0  ;;  %vm424_vm9 = vc.u32 %v4621_v36, %v4624_v40 }
 0x111   :  { %v551_v53 = vand.u32 2147483647, %v550_v20  ;;  %v2207_v43 = vsub.s32 32, %v2206_v61  ;;  %v2211_v46 = vsub.s32 4294967266, %v2206_v61  ;;  %v2224_v26 = vsel %vm4599_vm6, 0, %v2222_v30 }
 0x112   :  { %v425_v4 = vadd.s32 1, %v4625_v41  ;;  %v422_v63 = vmul.u32 %v4552_v12, %v406_v50  ;;  %v4644_v10 = vshrl.u32 %v2043_v42, 5  ;;  %v2046_v14 = vsub.s32 32, %v2045_v2 }
 0x113   :  { %v554_v6 = vmul.f32 %v553_v55, %v551_v53  ;;  %v2208_v60 = vshll.u32 %v4582_v45, %v2206_v61  ;;  %v2209_v17 = vshrl.u32 %v2191_v8, %v2207_v43  ;;  %v2212_v18 = vadd.s32 127, %v2211_v46 }
 0x114   :  { %v426_v19 = vsel %vm424_vm9, %v425_v4, %v4625_v41  ;;  %v2048_v35 = vshll.u32 %v4277_v5, %v2045_v2  ;;  %v2049_v39 = vshrl.u32 %v4278_v9, %v2046_v14  ;;  %v2051_v62 = vshll.u32 %v4278_v9, %v2045_v2 }
 0x115   :  { %v555_v21 = vxor.u32 2147483648, %v554_v6  ;;  %v427_v23 = vadd.s32 %v426_v19, %v422_v63  ;;  %v2210_v57 = vor.u32 %v2209_v17, %v2208_v60  ;;  %v2213_v59 = vshll.u32 %v2212_v18, 23 }
 0x116   :  { %v2052_v12 = vshrl.u32 %v4279_v11, %v2046_v14  ;;  %v2054_v27 = vshll.u32 %v4279_v11, %v2045_v2  ;;  %v2055_v28 = vshrl.u32 %v4280_v13, %v2046_v14  ;;  %v2050_v31 = vor.u32 %v2049_v39, %v2048_v35 }
 0x117   :  { %v556_v25 = vsel %vm473_vm14, %v555_v21, %v554_v6  ;;  %v428_v45 = vadd.s32 536870912, %v427_v23  ;;  %v2214_v29 = vor.u32 4788187, %v2213_v59  ;;  %v2057_v32 = vshll.u32 %v4280_v13, %v2045_v2 }
 0x118   :  { %v559_v1 = vsel %vm4556_vm15, %v4432_v33, %v556_v25  ;;  %v2217_v0 = vcvt.s32.f32 %v2210_v57  ;;  %v2058_v20 = vshrl.u32 %v4281_v15, %v2046_v14  ;;  %v2053_v30 = vor.u32 %v2052_v12, %v2051_v62 }
 0x119   :  { %4125 = vcosq.f32 %v559_v1  ;;  %v4660_v41 = vshrl.u32 %v428_v45, 30  ;;  %v2215_v8 = vand.u32 2147483647, %v2214_v29  ;;  %v2061_v42 = vshrl.u32 %v4282_v22, %v2046_v14 }
 0x11a   :  { %4127 = vsinq.f32 %v559_v1  ;;  %v2059_v53 = vor.u32 %v2058_v20, %v2057_v32  ;;  %v2056_v55 = vor.u32 %v2055_v28, %v2054_v27  ;;  %v2060_v61 = vshll.u32 %v4281_v15, %v2045_v2 }
 0x11b   :  { %v430_v50 = vshll.u32 %v4660_v41, 30  ;;  %v2218_v3 = vmul.f32 %v2217_v0, %v2215_v8  ;;  %v2228_v43 = vadd.s32 3, %v2224_v26  ;;  %vm2063_vm10 = vcmp.lt.s32.totalorder %v4644_v10, 1 }
 0x11c   :  { %v4671_v4 = vshll.u32 %v2039_v24, 8  ;;  %vm567_vm11 = vcmp.eq.s32.totalorder %v4634_v52, 0  ;;  %v2062_v63 = vor.u32 %v2061_v42, %v2060_v61  ;;  %vm2066_vm12 = vcmp.lt.s32.totalorder %v4644_v10, 4 }
 0x11d   :  { %v4666_v46 = vsub.s32 %v427_v23, %v430_v50  ;;  %v2219_v6 = vxor.u32 2147483648, %v2218_v3  ;;  %v2071_v60 = vsel %vm2063_vm10, %v2050_v31, %v2053_v30  ;;  %vm566_vm13 = vcmp.lt.s32.totalorder %v4634_v52, 2 }
 0x11e   :  { %v2047_v26 = vshrl.u32 %v4277_v5, %v2046_v14  ;;  %vm2065_vm14 = vcmp.lt.s32.totalorder %v4644_v10, 3  ;;  %v2072_v7 = vsel %vm2066_vm12, %v2059_v53, 920167782  ;;  %vm563_vm15 = vweird.f32 %v4432_v33 }
 0x11f   :  { %v433_v2 = vsub.s32 0, %v4666_v46  ;;  %v2220_v24 = vsel %vm2137_vm3, %v2219_v6, %v2218_v3  ;;  %vm369_vm0 = vcmp.lt.s32.totalorder %v4438_v37, 0  ;;  %vm2064_vm1 = vcmp.lt.s32.totalorder %v4644_v10, 2  ;;  %v4736_v3 = vpop.f32.mrb[5].mxu0 }
 0x120   :  { %v2068_v17 = vsel %vm2066_vm12, %v2056_v55, 2102212464  ;;  %v2073_v14 = vsel %vm2065_vm14, %v2056_v55, %v2072_v7  ;;  %v2223_v18 = vsel %vm4599_vm6, %v4434_v34, %v2220_v24  ;;  %v2075_v23 = vsel %vm2063_vm10, %v2053_v30, %v2056_v55 }
 0x121   :  { %v3776_v19 = vmin.u32 %v433_v2, %v4666_v46  ;;  %v2074_v21 = vsel %vm2064_vm1, %v2071_v60, %v2073_v14  ;;  %4129 = vcosq.f32 %v2223_v18  ;;  %v2076_v35 = vsel %vm2066_vm12, %v2062_v63, 1326507024 }
 0x122   :  { %v4703_v39 = vmul.u32.u64.low %v4671_v4, %v2074_v21  ;;  %v4704_v57 = vmul.u32.u64.high %v4671_v4, %v2074_v21, %v4703_v39  ;;  %vm570_vm2 = vcmp.eq.s32.totalorder %v4634_v52, 2  ;;  %4131 = vsinq.f32 %v2223_v18 }
 0x123   :  { %v4126_v59 = vpop.eup %4125  ;;  %v4708_v16 = vand.u32 3, %v2228_v43  ;;  %vm4712_vm3 = vcmp.le.f32.partialorder %v367_v56, 0.7853982  ;;  %v435_v12 = vclz %v3776_v19  ;;  %v2067_v27 = vsel %vm2063_vm10, %v2047_v26, %v2050_v31 }
 0x124   :  { %v4128_v25 = vpop.eup %4127  ;;  %v571_v45 = vxor.u32 2147483648, %v4126_v59  ;;  %v2069_v28 = vsel %vm2065_vm14, %v2053_v30, %v2068_v17  ;;  %v2077_v1 = vsel %vm2065_vm14, %v2059_v53, %v2076_v35  ;;  %v453_v0 = vsub.s32 4, %v4660_v41 }
 0x125   :  { %v568_v29 = vxor.u32 2147483648, %v4128_v25  ;;  %v3777_v32 = vadd.s32 4294967294, %v435_v12  ;;  %v2078_v56 = vsel %vm2064_vm1, %v2075_v23, %v2077_v1  ;;  %v423_v8 = vadd.s32 %v4624_v40, %v4621_v36 }
 0x126   :  { %v572_v20 = vsel %vm570_vm2, %v571_v45, %v4128_v25  ;;  %v4728_v42 = vmul.u32.u64.low %v4671_v4, %v2078_v56  ;;  %v4729_v31 = vmul.u32.u64.high %v4671_v4, %v2078_v56, %v4728_v42  ;;  %v2070_v50 = vsel %vm2064_vm1, %v2067_v27, %v2069_v28 }
 0x127   :  { %v569_v30 = vsel %vm567_vm11, %v4126_v59, %v568_v29  ;;  %vm3778_vm4 = vcmp.lt.s32.totalorder %v3777_v32, 0  ;;  %v2089_v53 = vadd.s32 1, %v4704_v57  ;;  %vm2230_vm5 = vcmp.lt.s32.totalorder %v4708_v16, 2 }
 0x128   :  { %v573_v55 = vsel %vm566_vm13, %v569_v30, %v572_v20  ;;  %v438_v36 = vsel %vm3778_vm4, 0, %v3777_v32  ;;  %v679_v40 = vand.u32 2147483647, %v4449_v47  ;;  %v682_v61 = vand.u32 2139095040, %v4449_v47 }
 0x129   :  { %v574_v43 = vsel %vm563_vm15, nan, %v573_v55  ;;  %vm2227_vm6 = vweird.f32 %v4434_v34  ;;  %v439_v10 = vsub.s32 32, %v438_v36  ;;  %v443_v6 = vsub.s32 4294967266, %v438_v36 }
 0x12a   :  { %v454_v63 = vsel %vm369_vm0, %v453_v0, %v4660_v41  ;;  %3696 = vst [vmem:[#allocation2 + $0x8] sm:$0xff] %v574_v43  ;;  %vm2231_vm7 = vcmp.eq.s32.totalorder %v4708_v16, 0  ;;  %v2086_v52 = vmul.u32 %v4671_v4, %v2070_v50  ;;  %vm2088_vm8 = vc.u32 %v4729_v31, %v4703_v39 }
 0x12b   :  { %v683_v60 = vshrl.u32 %v682_v61, 23  ;;  %v440_v33 = vshll.u32 %v4666_v46, %v438_v36  ;;  %v441_v2 = vshrl.u32 %v423_v8, %v439_v10  ;;  %v444_v26 = vadd.s32 127, %v443_v6  ;;  %v4130_v24 = vpop.eup %4129 }
 0x12c   :  { %v2090_v7 = vsel %vm2088_vm8, %v2089_v53, %v4704_v57  ;;  %v456_v17 = vsel %vm4712_vm3, 0, %v454_v63  ;;  %v686_v18 = vand.u32 8388607, %v679_v40  ;;  %v4132_v4 = vpop.eup %4131  ;;  %vm2234_vm9 = vcmp.eq.s32.totalorder %v4708_v16, 2 }
 0x12d   :  { %v2091_v41 = vadd.s32 %v2090_v7, %v2086_v52  ;;  %v3787_v14 = vadd.s32 4294967169, %v683_v60  ;;  %v2235_v19 = vxor.u32 2147483648, %v4130_v24  ;;  %v442_v21 = vor.u32 %v441_v2, %v440_v33 }
 0x12e   :  { %v445_v23 = vshll.u32 %v444_v26, 23  ;;  %v2232_v46 = vxor.u32 2147483648, %v4132_v4  ;;  %v2343_v57 = vand.u32 2147483647, %v4451_v48  ;;  %v460_v45 = vadd.s32 3, %v456_v17 }
 0x12f   :  { %v2092_v35 = vadd.s32 536870912, %v2091_v41  ;;  %v689_v59 = vadd.s32 1, %v3787_v14  ;;  %v2236_v12 = vsel %vm2234_vm9, %v2235_v19, %v4132_v4  ;;  %v2346_v27 = vand.u32 2139095040, %v4451_v48 }
 0x130   :  { %v446_v25 = vor.u32 4788187, %v445_v23  ;;  %v2233_v28 = vsel %vm2231_vm7, %v4130_v24, %v2232_v46  ;;  %v687_v29 = vor.u32 8388608, %v686_v18  ;;  %v449_v56 = vcvt.s32.f32 %v442_v21 }
 0x131   :  { %v2093_v1 = vshrl.u32 %v2092_v35, 30  ;;  %vm690_vm10 = vcmp.gt.s32.totalorder %v689_v59, 0  ;;  %v2237_v32 = vsel %vm2230_vm5, %v2233_v28, %v2236_v12  ;;  %v2347_v30 = vshrl.u32 %v2346_v27, 23 }
 0x132   :  { %v447_v0 = vand.u32 2147483647, %v446_v25  ;;  %v691_v20 = vsel %vm690_vm10, %v689_v59, 0  ;;  %v2238_v8 = vsel %vm2227_vm6, nan, %v2237_v32  ;;  %v4770_v50 = vand.u32 8388607, %v2343_v57 }
 0x133   :  { %v2094_v42 = vshll.u32 %v2093_v1, 30  ;;  %3712 = vst [vmem:[#allocation2 + $0x88] sm:$0xff] %v2238_v8  ;;  %v693_v55 = vand.u32 31, %v691_v20  ;;  %v4772_v36 = vand.u32 3, %v460_v45  ;;  %vm2033_vm11 = vcmp.lt.s32.totalorder %v4440_v38, 0  ;;  %v4829_v8 = vpop.f32.mrb[5].mxu1 }
 0x134   :  { %v450_v53 = vmul.f32 %v449_v56, %v447_v0  ;;  %v2087_v16 = vadd.s32 %v4703_v39, %v4729_v31  ;;  %v2117_v43 = vsub.s32 4, %v2093_v1  ;;  %v4779_v10 = vshrl.u32 %v691_v20, 5 }
 0x135   :  { %v4777_v61 = vsub.s32 %v2091_v41, %v2094_v42  ;;  %v694_v6 = vsub.s32 32, %v693_v55  ;;  %v4782_v52 = vshll.u32 %v687_v29, 8  ;;  %v3851_v60 = vadd.s32 4294967169, %v2347_v30 }
 0x136   :  { %v451_v34 = vxor.u32 2147483648, %v450_v53  ;;  %v2351_v33 = vor.u32 8388608, %v4770_v50  ;;  %v696_v26 = vshll.u32 %v4277_v5, %v693_v55  ;;  %v699_v17 = vshll.u32 %v4278_v9, %v693_v55 }
 0x137   :  { %v2097_v63 = vsub.s32 0, %v4777_v61  ;;  %v697_v39 = vshrl.u32 %v4278_v9, %v694_v6  ;;  %v700_v31 = vshrl.u32 %v4279_v11, %v694_v6  ;;  %v703_v41 = vshrl.u32 %v4280_v13, %v694_v6 }
 0x138   :  { %v452_v2 = vsel %vm369_vm0, %v451_v34, %v450_v53  ;;  %v4798_v14 = vsel %vm2033_vm11, %v2117_v43, %v2093_v1  ;;  %v702_v18 = vshll.u32 %v4279_v11, %v693_v55  ;;  %vm711_vm12 = vcmp.lt.s32.totalorder %v4779_v10, 1 }
 0x139   :  { %v455_v7 = vsel %vm4712_vm3, %v4438_v37, %v452_v2  ;;  %v3840_v24 = vmin.u32 %v2097_v63, %v4777_v61  ;;  %v698_v19 = vor.u32 %v697_v39, %v696_v26  ;;  %v701_v62 = vor.u32 %v700_v31, %v699_v17 }
 0x13a   :  { %4133 = vcosq.f32 %v455_v7  ;;  %v695_v21 = vshrl.u32 %v4277_v5, %v694_v6  ;;  %v704_v23 = vor.u32 %v703_v41, %v702_v18  ;;  %v705_v46 = vshll.u32 %v4280_v13, %v693_v55 }
 0x13b   :  { %4135 = vsinq.f32 %v455_v7  ;;  %v2099_v4 = vclz %v3840_v24  ;;  %v706_v35 = vshrl.u32 %v4281_v15, %v694_v6  ;;  %vm4807_vm13 = vcmp.le.f32.partialorder %v2031_v49, 0.7853982 }
 0x13c   :  { %v708_v25 = vshll.u32 %v4281_v15, %v693_v55  ;;  %v709_v45 = vshrl.u32 %v4282_v22, %v694_v6  ;;  %vm714_vm14 = vcmp.lt.s32.totalorder %v4779_v10, 4  ;;  %vm466_vm15 = vcmp.eq.s32.totalorder %v4772_v36, 2 }
 0x13d   :  { %v3841_v12 = vadd.s32 4294967294, %v2099_v4  ;;  %v707_v27 = vor.u32 %v706_v35, %v705_v46  ;;  %vm712_vm0 = vcmp.lt.s32.totalorder %v4779_v10, 2  ;;  %vm713_vm1 = vcmp.lt.s32.totalorder %v4779_v10, 3 }
 0x13e   :  { %v716_v49 = vsel %vm714_vm14, %v704_v23, 2102212464  ;;  %vm463_vm2 = vcmp.eq.s32.totalorder %v4772_v36, 0  ;;  %v710_v28 = vor.u32 %v709_v45, %v708_v25  ;;  %v715_v1 = vsel %vm711_vm12, %v695_v21, %v698_v19 }
 0x13f   :  { %vm3842_vm3 = vcmp.lt.s32.totalorder %v3841_v12, 0  ;;  %v719_v29 = vsel %vm711_vm12, %v698_v19, %v701_v62  ;;  %vm462_vm4 = vcmp.lt.s32.totalorder %v4772_v36, 2  ;;  %v717_v0 = vsel %vm713_vm1, %v701_v62, %v716_v49 }
 0x140   :  { %v2102_v32 = vsel %vm3842_vm3, 0, %v3841_v12  ;;  %v720_v56 = vsel %vm714_vm14, %v707_v27, 920167782  ;;  %v2353_v20 = vadd.s32 1, %v3851_v60  ;;  %vm459_vm5 = vweird.f32 %v4438_v37 }
 0x141   :  { %v2103_v42 = vsub.s32 32, %v2102_v32  ;;  %v2107_v30 = vsub.s32 4294967266, %v2102_v32  ;;  %v721_v53 = vsel %vm713_vm1, %v704_v23, %v720_v56  ;;  %v723_v55 = vsel %vm711_vm12, %v701_v62, %v704_v23 }
 0x142   :  { %v2104_v34 = vshll.u32 %v4777_v61, %v2102_v32  ;;  %v722_v43 = vsel %vm712_vm0, %v719_v29, %v721_v53  ;;  %v724_v6 = vsel %vm714_vm14, %v710_v28, 1326507024  ;;  %vm2354_vm6 = vcmp.gt.s32.totalorder %v2353_v20, 0 }
 0x143   :  { %v2105_v63 = vshrl.u32 %v2087_v16, %v2103_v42  ;;  %v2108_v60 = vadd.s32 127, %v2107_v30  ;;  %v725_v2 = vsel %vm713_vm1, %v707_v27, %v724_v6  ;;  %v2355_v26 = vsel %vm2354_vm6, %v2353_v20, 0 }
 0x144   :  { %v4134_v39 = vpop.eup %4133  ;;  %v718_v31 = vsel %vm712_vm0, %v715_v1, %v717_v0  ;;  %v726_v61 = vsel %vm712_vm0, %v723_v55, %v725_v2  ;;  %v4848_v7 = vmul.u32.u64.low %v4782_v52, %v722_v43  ;;  %v4849_v24 = vmul.u32.u64.high %v4782_v52, %v722_v43, %v4848_v7 }
 0x145   :  { %v4136_v17 = vpop.eup %4135  ;;  %v467_v41 = vxor.u32 2147483648, %v4134_v39  ;;  %v2106_v16 = vor.u32 %v2105_v63, %v2104_v34  ;;  %v2109_v18 = vshll.u32 %v2108_v60, 23  ;;  %v2357_v4 = vand.u32 31, %v2355_v26 }
 0x146   :  { %v464_v19 = vxor.u32 2147483648, %v4136_v17  ;;  %v2120_v62 = vsel %vm4807_vm13, 0, %v4798_v14  ;;  %v4856_v21 = vmul.u32.u64.low %v4782_v52, %v726_v61  ;;  %v4857_v23 = vmul.u32.u64.high %v4782_v52, %v726_v61, %v4856_v21 }
 0x147   :  { %v468_v10 = vsel %vm466_vm15, %v467_v41, %v4136_v17  ;;  %v2110_v46 = vor.u32 4788187, %v2109_v18  ;;  %v734_v35 = vmul.u32 %v4782_v52, %v718_v31  ;;  %v2358_v12 = vsub.s32 32, %v2357_v4 }
 0x148   :  { %v465_v25 = vsel %vm463_vm2, %v4134_v39, %v464_v19  ;;  %v2113_v45 = vcvt.s32.f32 %v2106_v16  ;;  %v737_v27 = vadd.s32 1, %v4849_v24  ;;  %v2356_v49 = vshrl.u32 %v2355_v26, 5 }
 0x149   :  { %v469_v14 = vsel %vm462_vm4, %v465_v25, %v468_v10  ;;  %v2111_v28 = vand.u32 2147483647, %v2110_v46  ;;  %v2360_v1 = vshll.u32 %v4277_v5, %v2357_v4  ;;  %v2361_v29 = vshrl.u32 %v4278_v9, %v2358_v12 }
 0x14a   :  { %v470_v32 = vsel %vm459_vm5, nan, %v469_v14  ;;  %vm736_vm7 = vc.u32 %v4857_v23, %v4848_v7  ;;  %v2363_v52 = vshll.u32 %v4278_v9, %v2357_v4  ;;  %v2364_v0 = vshrl.u32 %v4279_v11, %v2358_v12 }
 0x14b   :  { %3695 = vst [vmem:[#allocation2] sm:$0xff] %v470_v32  ;;  %v2114_v56 = vmul.f32 %v2113_v45, %v2111_v28  ;;  %v738_v36 = vsel %vm736_vm7, %v737_v27, %v4849_v24  ;;  %v2362_v20 = vor.u32 %v2361_v29, %v2360_v1  ;;  %v2366_v42 = vshll.u32 %v4279_v11, %v2357_v4 }
 0x14c   :  { %v739_v30 = vadd.s32 %v738_v36, %v734_v35  ;;  %v2365_v53 = vor.u32 %v2364_v0, %v2363_v52  ;;  %v2367_v55 = vshrl.u32 %v4280_v13, %v2358_v12  ;;  %v2369_v37 = vshll.u32 %v4280_v13, %v2357_v4 }
 0x14d   :  { %v2115_v34 = vxor.u32 2147483648, %v2114_v56  ;;  %v2370_v43 = vshrl.u32 %v4281_v15, %v2358_v12  ;;  %v2372_v6 = vshll.u32 %v4281_v15, %v2357_v4  ;;  %v2373_v63 = vshrl.u32 %v4282_v22, %v2358_v12 }
 0x14e   :  { %v2124_v60 = vadd.s32 3, %v2120_v62  ;;  %v740_v2 = vadd.s32 536870912, %v739_v30  ;;  %v2368_v26 = vor.u32 %v2367_v55, %v2366_v42  ;;  %vm2375_vm8 = vcmp.lt.s32.totalorder %v2356_v49, 1 }
 0x14f   :  { %v2116_v39 = vsel %vm2033_vm11, %v2115_v34, %v2114_v56  ;;  %v2359_v31 = vshrl.u32 %v4277_v5, %v2358_v12  ;;  %v2371_v61 = vor.u32 %v2370_v43, %v2369_v37  ;;  %v2374_v24 = vor.u32 %v2373_v63, %v2372_v6 }
 0x150   :  { %v2119_v17 = vsel %vm4807_vm13, %v4440_v38, %v2116_v39  ;;  %v741_v41 = vshrl.u32 %v740_v2, 30  ;;  %vm2376_vm9 = vcmp.lt.s32.totalorder %v2356_v49, 2  ;;  %vm2378_vm10 = vcmp.lt.s32.totalorder %v2356_v49, 4 }
 0x151   :  { %4137 = vcosq.f32 %v2119_v17  ;;  %v2380_v16 = vsel %vm2378_vm10, %v2368_v26, 2102212464  ;;  %v2383_v18 = vsel %vm2375_vm8, %v2362_v20, %v2365_v53  ;;  %v2384_v4 = vsel %vm2378_vm10, %v2371_v61, 920167782 }
 0x152   :  { %4139 = vsinq.f32 %v2119_v17  ;;  %v742_v19 = vshll.u32 %v741_v41, 30  ;;  %vm2377_vm12 = vcmp.lt.s32.totalorder %v2356_v49, 3  ;;  %v2379_v62 = vsel %vm2375_vm8, %v2359_v31, %v2362_v20 }
 0x153   :  { %v2385_v21 = vsel %vm2377_vm12, %v2368_v26, %v2384_v4  ;;  %v2387_v10 = vsel %vm2375_vm8, %v2365_v53, %v2368_v26  ;;  %v2388_v46 = vsel %vm2378_vm10, %v2374_v24, 1326507024  ;;  %v2391_v59 = vshll.u32 %v2351_v33, 8 }
 0x154   :  { %v4893_v35 = vsub.s32 %v739_v30, %v742_v19  ;;  %v2381_v12 = vsel %vm2377_vm12, %v2365_v53, %v2380_v16  ;;  %v2386_v25 = vsel %vm2376_vm9, %v2383_v18, %v2385_v21  ;;  %v2389_v45 = vsel %vm2377_vm12, %v2371_v61, %v2388_v46 }
 0x155   :  { %v765_v27 = vsub.s32 4, %v741_v41  ;;  %v2390_v14 = vsel %vm2376_vm9, %v2387_v10, %v2389_v45  ;;  %v4897_v28 = vmul.u32.u64.low %v2391_v59, %v2386_v25  ;;  %v4898_v1 = vmul.u32.u64.high %v2391_v59, %v2386_v25, %v4897_v28 }
 0x156   :  { %v2125_v29 = vand.u32 3, %v2124_v60  ;;  %v745_v32 = vsub.s32 0, %v4893_v35  ;;  %v4902_v52 = vmul.u32.u64.low %v2391_v59, %v2390_v14  ;;  %v4903_v0 = vmul.u32.u64.high %v2391_v59, %v2390_v14, %v4902_v52 }
 0x157   :  { %vm681_vm11 = vcmp.lt.s32.totalorder %v4449_v47, 0  ;;  %v2382_v33 = vsel %vm2376_vm9, %v2379_v62, %v2381_v12  ;;  %v578_v56 = vand.u32 2139095040, %v4453_v51  ;;  %vm2123_vm13 = vweird.f32 %v4440_v38 }
 0x158   :  { %v3788_v50 = vmin.u32 %v745_v32, %v4893_v35  ;;  %v766_v36 = vsel %vm681_vm11, %v765_v27, %v741_v41  ;;  %v2401_v20 = vadd.s32 1, %v4898_v1  ;;  %v575_v42 = vand.u32 2147483647, %v4453_v51 }
 0x159   :  { %vm2126_vm14 = vcmp.lt.s32.totalorder %v2125_v29, 2  ;;  %vm2127_vm15 = vcmp.eq.s32.totalorder %v2125_v29, 0  ;;  %vm4916_vm0 = vcmp.le.f32.partialorder %v679_v40, 0.7853982  ;;  %vm2130_vm1 = vcmp.eq.s32.totalorder %v2125_v29, 2  ;;  %v4925_v40 = vpop.f32.mrb[6].mxu0 }
 0x15a   :  { %v747_v49 = vclz %v3788_v50  ;;  %v2398_v55 = vmul.u32 %v2391_v59, %v2382_v33  ;;  %vm2400_vm2 = vc.u32 %v4903_v0, %v4897_v28  ;;  %v579_v37 = vshrl.u32 %v578_v56, 23 }
 0x15b   :  { %v4138_v53 = vpop.eup %4137  ;;  %v768_v63 = vsel %vm4916_vm0, 0, %v766_v36  ;;  %v2402_v60 = vsel %vm2400_vm2, %v2401_v20, %v4898_v1  ;;  %v582_v31 = vand.u32 8388607, %v575_v42  ;;  %v735_v24 = vadd.s32 %v4848_v7, %v4857_v23 }
 0x15c   :  { %v4140_v34 = vpop.eup %4139  ;;  %v2131_v43 = vxor.u32 2147483648, %v4138_v53  ;;  %v3789_v6 = vadd.s32 4294967294, %v747_v49  ;;  %v2403_v26 = vadd.s32 %v2402_v60, %v2398_v55  ;;  %v3783_v39 = vadd.s32 4294967169, %v579_v37 }
 0x15d   :  { %v2128_v2 = vxor.u32 2147483648, %v4140_v34  ;;  %v2242_v17 = vand.u32 2139095040, %v4456_v58  ;;  %v772_v10 = vadd.s32 3, %v768_v63  ;;  %v583_v12 = vor.u32 8388608, %v582_v31 }
 0x15e   :  { %v2132_v61 = vsel %vm2130_vm1, %v2131_v43, %v4140_v34  ;;  %vm3790_vm3 = vcmp.lt.s32.totalorder %v3789_v6, 0  ;;  %v2404_v18 = vadd.s32 536870912, %v2403_v26  ;;  %v585_v4 = vadd.s32 1, %v3783_v39 }
 0x15f   :  { %v2129_v41 = vsel %vm2127_vm15, %v4138_v53, %v2128_v2  ;;  %v750_v16 = vsel %vm3790_vm3, 0, %v3789_v6  ;;  %v2243_v1 = vshrl.u32 %v2242_v17, 23  ;;  %v4937_v52 = vand.u32 3, %v772_v10 }
 0x160   :  { %v2133_v19 = vsel %vm2126_vm14, %v2129_v41, %v2132_v61  ;;  %v751_v62 = vsub.s32 32, %v750_v16  ;;  %v755_v21 = vsub.s32 4294967266, %v750_v16  ;;  %v2405_v59 = vshrl.u32 %v2404_v18, 30 }
 0x161   :  { %v2134_v46 = vsel %vm2123_vm13, nan, %v2133_v19  ;;  %vm586_vm4 = vcmp.gt.s32.totalorder %v585_v4, 0  ;;  %v752_v7 = vshll.u32 %v4893_v35, %v750_v16  ;;  %vm2345_vm5 = vcmp.lt.s32.totalorder %v4451_v48, 0 }
 0x162   :  { %3711 = vst [vmem:[#allocation2 + $0x80] sm:$0xff] %v2134_v46  ;;  %v753_v23 = vshrl.u32 %v735_v24, %v751_v62  ;;  %v756_v25 = vadd.s32 127, %v755_v21  ;;  %v587_v45 = vsel %vm586_vm4, %v585_v4, 0  ;;  %v2406_v27 = vshll.u32 %v2405_v59, 30 }
 0x163   :  { %v589_v14 = vand.u32 31, %v587_v45  ;;  %v2399_v56 = vadd.s32 %v4897_v28, %v4903_v0  ;;  %v2429_v35 = vsub.s32 4, %v2405_v59  ;;  %v4944_v36 = vshll.u32 %v583_v12, 8 }
 0x164   :  { %v754_v29 = vor.u32 %v753_v23, %v752_v7  ;;  %v757_v32 = vshll.u32 %v756_v25, 23  ;;  %v4940_v38 = vsub.s32 %v2403_v26, %v2406_v27  ;;  %v588_v49 = vshrl.u32 %v587_v45, 5 }
 0x165   :  { %v590_v50 = vsub.s32 32, %v589_v14  ;;  %v3847_v55 = vadd.s32 4294967169, %v2243_v1  ;;  %v592_v60 = vshll.u32 %v4277_v5, %v589_v14  ;;  %v595_v28 = vshll.u32 %v4278_v9, %v589_v14 }
 0x166   :  { %v758_v33 = vor.u32 4788187, %v757_v32  ;;  %v2409_v20 = vsub.s32 0, %v4940_v38  ;;  %v761_v34 = vcvt.s32.f32 %v754_v29  ;;  %v598_v0 = vshll.u32 %v4279_v11, %v589_v14 }
 0x167   :  { %v593_v53 = vshrl.u32 %v4278_v9, %v590_v50  ;;  %v596_v43 = vshrl.u32 %v4279_v11, %v590_v50  ;;  %v599_v6 = vshrl.u32 %v4280_v13, %v590_v50  ;;  %v4956_v26 = vsel %vm2345_vm5, %v2429_v35, %v2405_v59 }
 0x168   :  { %v759_v37 = vand.u32 2147483647, %v758_v33  ;;  %v3852_v63 = vmin.u32 %v2409_v20, %v4940_v38  ;;  %v601_v39 = vshll.u32 %v4280_v13, %v589_v14  ;;  %v602_v31 = vshrl.u32 %v4281_v15, %v590_v50  ;;  %v4977_v33 = vpop.f32.mrb[6].mxu1 }
 0x169   :  { %v594_v24 = vor.u32 %v593_v53, %v592_v60  ;;  %v597_v17 = vor.u32 %v596_v43, %v595_v28  ;;  %v600_v41 = vor.u32 %v599_v6, %v598_v0  ;;  %v604_v4 = vshll.u32 %v4281_v15, %v589_v14 }
 0x16a   :  { %v762_v2 = vmul.f32 %v761_v34, %v759_v37  ;;  %v2411_v61 = vclz %v3852_v63  ;;  %v603_v18 = vor.u32 %v602_v31, %v601_v39  ;;  %v605_v19 = vshrl.u32 %v4282_v22, %v590_v50 }
 0x16b   :  { %v591_v21 = vshrl.u32 %v4277_v5, %v590_v50  ;;  %vm607_vm6 = vcmp.lt.s32.totalorder %v588_v49, 1  ;;  %vm608_vm7 = vcmp.lt.s32.totalorder %v588_v49, 2  ;;  %vm609_vm8 = vcmp.lt.s32.totalorder %v588_v49, 3 }
 0x16c   :  { %v763_v16 = vxor.u32 2147483648, %v762_v2  ;;  %v3853_v62 = vadd.s32 4294967294, %v2411_v61  ;;  %v606_v46 = vor.u32 %v605_v19, %v604_v4  ;;  %vm610_vm9 = vcmp.lt.s32.totalorder %v588_v49, 4 }
 0x16d   :  { %v611_v12 = vsel %vm607_vm6, %v591_v21, %v594_v24  ;;  %v612_v7 = vsel %vm610_vm9, %v600_v41, 2102212464  ;;  %v615_v25 = vsel %vm607_vm6, %v594_v24, %v597_v17  ;;  %v616_v45 = vsel %vm610_vm9, %v603_v18, 920167782 }
 0x16e   :  { %v764_v10 = vsel %vm681_vm11, %v763_v16, %v762_v2  ;;  %vm3854_vm10 = vcmp.lt.s32.totalorder %v3853_v62, 0  ;;  %v613_v1 = vsel %vm609_vm8, %v597_v17, %v612_v7  ;;  %v617_v30 = vsel %vm609_vm8, %v600_v41, %v616_v45 }
 0x16f   :  { %v767_v59 = vsel %vm4916_vm0, %v4449_v47, %v764_v10  ;;  %v2414_v23 = vsel %vm3854_vm10, 0, %v3853_v62  ;;  %v619_v32 = vsel %vm607_vm6, %v597_v17, %v600_v41  ;;  %v620_v50 = vsel %vm610_vm9, %v606_v46, 1326507024 }
 0x170   :  { %4141 = vcosq.f32 %v767_v59  ;;  %v2415_v27 = vsub.s32 32, %v2414_v23  ;;  %v2419_v14 = vsub.s32 4294967266, %v2414_v23  ;;  %v2416_v29 = vshll.u32 %v4940_v38, %v2414_v23 }
 0x171   :  { %4143 = vsinq.f32 %v767_v59  ;;  %v618_v53 = vsel %vm608_vm7, %v615_v25, %v617_v30  ;;  %v621_v37 = vsel %vm609_vm8, %v603_v18, %v620_v50  ;;  %v614_v34 = vsel %vm608_vm7, %v611_v12, %v613_v1 }
 0x172   :  { %v2417_v35 = vshrl.u32 %v2399_v56, %v2415_v27  ;;  %v2420_v20 = vadd.s32 127, %v2419_v14  ;;  %v622_v43 = vsel %vm608_vm7, %v619_v32, %v621_v37  ;;  %vm4994_vm12 = vcmp.le.f32.partialorder %v2343_v57, 0.7853982 }
 0x173   :  { %v4984_v38 = vmul.u32.u64.low %v4944_v36, %v618_v53  ;;  %v4985_v6 = vmul.u32.u64.high %v4944_v36, %v618_v53, %v4984_v38  ;;  %v4989_v28 = vmul.u32.u64.low %v4944_v36, %v622_v43  ;;  %v4990_v0 = vmul.u32.u64.high %v4944_v36, %v622_v43, %v4989_v28 }
 0x174   :  { %v2418_v63 = vor.u32 %v2417_v35, %v2416_v29  ;;  %v2421_v60 = vshll.u32 %v2420_v20, 23  ;;  %v2249_v2 = vadd.s32 1, %v3847_v55  ;;  %vm771_vm11 = vweird.f32 %v4449_v47 }
 0x175   :  { %vm774_vm13 = vcmp.lt.s32.totalorder %v4937_v52, 2  ;;  %v2239_v39 = vand.u32 2147483647, %v4456_v58  ;;  %v2432_v31 = vsel %vm4994_vm12, 0, %v4956_v26  ;;  %v630_v61 = vmul.u32 %v4944_v36, %v614_v34 }
 0x176   :  { %v2422_v49 = vor.u32 4788187, %v2421_v60  ;;  %v633_v24 = vadd.s32 1, %v4985_v6  ;;  %vm2250_vm14 = vcmp.gt.s32.totalorder %v2249_v2, 0  ;;  %v2425_v17 = vcvt.s32.f32 %v2418_v63 }
 0x177   :  { %vm632_vm15 = vc.u32 %v4990_v0, %v4984_v38  ;;  %v2251_v55 = vsel %vm2250_vm14, %v2249_v2, 0  ;;  %vm775_vm0 = vcmp.eq.s32.totalorder %v4937_v52, 0  ;;  %vm778_vm1 = vcmp.eq.s32.totalorder %v4937_v52, 2 }
 0x178   :  { %v2423_v57 = vand.u32 2147483647, %v2422_v49  ;;  %v634_v16 = vsel %vm632_vm15, %v633_v24, %v4985_v6  ;;  %v2253_v18 = vand.u32 31, %v2251_v55  ;;  %v2246_v62 = vand.u32 8388607, %v2239_v39 }
 0x179   :  { %v635_v19 = vadd.s32 %v634_v16, %v630_v61  ;;  %v2436_v10 = vadd.s32 3, %v2432_v31  ;;  %v890_v59 = vand.u32 2139095040, %v4536_v54  ;;  %v2252_v53 = vshrl.u32 %v2251_v55, 5 }
 0x17a   :  { %v4142_v41 = vpop.eup %4141  ;;  %v2426_v36 = vmul.f32 %v2425_v17, %v2423_v57  ;;  %v2254_v46 = vsub.s32 32, %v2253_v18  ;;  %v2256_v25 = vshll.u32 %v4277_v5, %v2253_v18  ;;  %v2259_v14 = vshll.u32 %v4278_v9, %v2253_v18 }
 0x17b   :  { %v4144_v26 = vpop.eup %4143  ;;  %v779_v4 = vxor.u32 2147483648, %v4142_v41  ;;  %v636_v23 = vadd.s32 536870912, %v635_v19  ;;  %v2262_v37 = vshll.u32 %v4279_v11, %v2253_v18  ;;  %v2265_v63 = vshll.u32 %v4280_v13, %v2253_v18 }
 0x17c   :  { %v776_v21 = vxor.u32 2147483648, %v4144_v26  ;;  %v2427_v7 = vxor.u32 2147483648, %v2426_v36  ;;  %v2257_v27 = vshrl.u32 %v4278_v9, %v2254_v46  ;;  %v2260_v1 = vshrl.u32 %v4279_v11, %v2254_v46 }
 0x17d   :  { %v780_v12 = vsel %vm778_vm1, %v779_v4, %v4144_v26  ;;  %v5024_v32 = vshrl.u32 %v636_v23, 30  ;;  %v2263_v50 = vshrl.u32 %v4280_v13, %v2254_v46  ;;  %v2266_v47 = vshrl.u32 %v4281_v15, %v2254_v46 }
 0x17e   :  { %v777_v45 = vsel %vm775_vm0, %v4142_v41, %v776_v21  ;;  %v2428_v30 = vsel %vm2345_vm5, %v2427_v7, %v2426_v36  ;;  %v2258_v34 = vor.u32 %v2257_v27, %v2256_v25  ;;  %v2261_v43 = vor.u32 %v2260_v1, %v2259_v14  ;;  %v5051_v7 = vpop.f32.mrb[7].mxu0 }
 0x17f   :  { %v781_v29 = vsel %vm774_vm13, %v777_v45, %v780_v12  ;;  %v2431_v20 = vsel %vm4994_vm12, %v4451_v48, %v2428_v30  ;;  %v638_v52 = vshll.u32 %v5024_v32, 30  ;;  %v2264_v6 = vor.u32 %v2263_v50, %v2262_v37 }
 0x180   :  { %v782_v35 = vsel %vm771_vm11, nan, %v781_v29  ;;  %4145 = vcosq.f32 %v2431_v20  ;;  %v2437_v60 = vand.u32 3, %v2436_v10  ;;  %v2268_v56 = vshll.u32 %v4281_v15, %v2253_v18 }
 0x181   :  { %3698 = vst [vmem:[#allocation2 + $0x18] sm:$0xff] %v782_v35  ;;  %4147 = vsinq.f32 %v2431_v20  ;;  %v5036_v28 = vsub.s32 %v635_v19, %v638_v52  ;;  %v2269_v2 = vshrl.u32 %v4282_v22, %v2254_v46  ;;  %v2247_v49 = vor.u32 8388608, %v2246_v62 }
 0x182   :  { %v2267_v31 = vor.u32 %v2266_v47, %v2265_v63  ;;  %v887_v61 = vand.u32 2147483647, %v4536_v54  ;;  %v891_v24 = vshrl.u32 %v890_v59, 23  ;;  %vm2271_vm2 = vcmp.lt.s32.totalorder %v2252_v53, 1 }
 0x183   :  { %v641_v57 = vsub.s32 0, %v5036_v28  ;;  %v2270_v17 = vor.u32 %v2269_v2, %v2268_v56  ;;  %vm2274_vm3 = vcmp.lt.s32.totalorder %v2252_v53, 4  ;;  %vm2273_vm4 = vcmp.lt.s32.totalorder %v2252_v53, 3 }
 0x184   :  { %v2276_v55 = vsel %vm2274_vm3, %v2264_v6, 2102212464  ;;  %v2279_v41 = vsel %vm2271_vm2, %v2258_v34, %v2261_v43  ;;  %v2280_v16 = vsel %vm2274_vm3, %v2267_v31, 920167782  ;;  %vm2438_vm5 = vcmp.lt.s32.totalorder %v2437_v60, 2 }
 0x185   :  { %v3784_v18 = vmin.u32 %v641_v57, %v5036_v28  ;;  %v2255_v26 = vshrl.u32 %v4277_v5, %v2254_v46  ;;  %vm2272_vm6 = vcmp.lt.s32.totalorder %v2252_v53, 2  ;;  %v2281_v4 = vsel %vm2273_vm4, %v2264_v6, %v2280_v16 }
 0x186   :  { %vm2435_vm7 = vweird.f32 %v4451_v48  ;;  %v2282_v36 = vsel %vm2272_vm6, %v2279_v41, %v2281_v4  ;;  %v2283_v19 = vsel %vm2271_vm2, %v2261_v43, %v2264_v6  ;;  %v2284_v62 = vsel %vm2274_vm3, %v2270_v17, 1326507024 }
 0x187   :  { %v2287_v21 = vshll.u32 %v2247_v49, 8  ;;  %vm2439_vm8 = vcmp.eq.s32.totalorder %v2437_v60, 0  ;;  %v643_v10 = vclz %v3784_v18  ;;  %v2275_v59 = vsel %vm2271_vm2, %v2255_v26, %v2258_v34 }
 0x188   :  { %v2277_v12 = vsel %vm2273_vm4, %v2261_v43, %v2276_v55  ;;  %vm2442_vm9 = vcmp.eq.s32.totalorder %v2437_v60, 2  ;;  %v2285_v46 = vsel %vm2273_vm4, %v2267_v31, %v2284_v62  ;;  %v3795_v1 = vadd.s32 4294967169, %v891_v24 }
 0x189   :  { %v5054_v23 = vmul.u32.u64.low %v2287_v21, %v2282_v36  ;;  %v5055_v25 = vmul.u32.u64.high %v2287_v21, %v2282_v36, %v5054_v23  ;;  %v3785_v27 = vadd.s32 4294967294, %v643_v10  ;;  %v2286_v14 = vsel %vm2272_vm6, %v2283_v19, %v2285_v46 }
 0x18a   :  { %v4146_v45 = vpop.eup %4145  ;;  %v5061_v29 = vand.u32 8388607, %v887_v61  ;;  %v2278_v35 = vsel %vm2272_vm6, %v2275_v59, %v2277_v12  ;;  %v5064_v20 = vmul.u32.u64.low %v2287_v21, %v2286_v14  ;;  %v5065_v37 = vmul.u32.u64.high %v2287_v21, %v2286_v14, %v5064_v20 }
 0x18b   :  { %v4148_v30 = vpop.eup %4147  ;;  %v2443_v50 = vxor.u32 2147483648, %v4146_v45  ;;  %v631_v34 = vadd.s32 %v4984_v38, %v4990_v0  ;;  %vm3786_vm10 = vcmp.lt.s32.totalorder %v3785_v27, 0  ;;  %v897_v43 = vadd.s32 1, %v3795_v1 }
 0x18c   :  { %v2440_v52 = vxor.u32 2147483648, %v4148_v30  ;;  %v646_v63 = vsel %vm3786_vm10, 0, %v3785_v27  ;;  %v661_v47 = vsub.s32 4, %v5024_v32  ;;  %v2297_v56 = vadd.s32 1, %v5055_v25 }
 0x18d   :  { %v2444_v6 = vsel %vm2442_vm9, %v2443_v50, %v4148_v30  ;;  %v647_v53 = vsub.s32 32, %v646_v63  ;;  %v651_v49 = vsub.s32 4294967266, %v646_v63  ;;  %v2294_v31 = vmul.u32 %v2287_v21, %v2278_v35 }
 0x18e   :  { %v2441_v2 = vsel %vm2439_vm8, %v4146_v45, %v2440_v52  ;;  %v648_v57 = vshll.u32 %v5036_v28, %v646_v63  ;;  %vm2296_vm12 = vc.u32 %v5065_v37, %v5054_v23  ;;  %vm898_vm11 = vcmp.gt.s32.totalorder %v897_v43, 0 }
 0x18f   :  { %v2445_v24 = vsel %vm2438_vm5, %v2441_v2, %v2444_v6  ;;  %v649_v0 = vshrl.u32 %v631_v34, %v647_v53  ;;  %v652_v17 = vadd.s32 127, %v651_v49  ;;  %v2298_v55 = vsel %vm2296_vm12, %v2297_v56, %v5055_v25 }
 0x190   :  { %v2446_v38 = vsel %vm2435_vm7, nan, %v2445_v24  ;;  %vm577_vm13 = vcmp.lt.s32.totalorder %v4453_v51, 0  ;;  %v2299_v41 = vadd.s32 %v2298_v55, %v2294_v31  ;;  %v899_v16 = vsel %vm898_vm11, %v897_v43, 0 }
 0x191   :  { %3714 = vst [vmem:[#allocation2 + $0x98] sm:$0xff] %v2446_v38  ;;  %v650_v60 = vor.u32 %v649_v0, %v648_v57  ;;  %v653_v18 = vshll.u32 %v652_v17, 23  ;;  %v662_v28 = vsel %vm577_vm13, %v661_v47, %v5024_v32  ;;  %v901_v26 = vand.u32 31, %v899_v16 }
 0x192   :  { %v2300_v4 = vadd.s32 536870912, %v2299_v41  ;;  %vm5086_vm14 = vcmp.le.f32.partialorder %v575_v42, 0.7853982  ;;  %v895_v19 = vor.u32 8388608, %v5061_v29  ;;  %v2554_v12 = vand.u32 2139095040, %v4632_v44 }
 0x193   :  { %v654_v36 = vor.u32 4788187, %v653_v18  ;;  %v902_v62 = vsub.s32 32, %v901_v26  ;;  %v657_v21 = vcvt.s32.f32 %v650_v60  ;;  %v664_v10 = vsel %vm5086_vm14, 0, %v662_v28 }
 0x194   :  { %v2301_v59 = vshrl.u32 %v2300_v4, 30  ;;  %vm2241_vm15 = vcmp.lt.s32.totalorder %v4456_v58, 0  ;;  %v904_v46 = vshll.u32 %v4277_v5, %v901_v26  ;;  %v907_v27 = vshll.u32 %v4278_v9, %v901_v26 }
 0x195   :  { %v655_v32 = vand.u32 2147483647, %v654_v36  ;;  %v905_v42 = vshrl.u32 %v4278_v9, %v902_v62  ;;  %v908_v25 = vshrl.u32 %v4279_v11, %v902_v62  ;;  %v911_v14 = vshrl.u32 %v4280_v13, %v902_v62 }
 0x196   :  { %v2302_v45 = vshll.u32 %v2301_v59, 30  ;;  %v914_v1 = vshrl.u32 %v4281_v15, %v902_v62  ;;  %v900_v30 = vshrl.u32 %v899_v16, 5  ;;  %v910_v50 = vshll.u32 %v4279_v11, %v901_v26 }
 0x197   :  { %v658_v29 = vmul.f32 %v657_v21, %v655_v32  ;;  %v913_v35 = vshll.u32 %v4280_v13, %v901_v26  ;;  %v668_v20 = vadd.s32 3, %v664_v10  ;;  %v906_v34 = vor.u32 %v905_v42, %v904_v46 }
 0x198   :  { %v5103_v52 = vsub.s32 %v2299_v41, %v2302_v45  ;;  %v909_v43 = vor.u32 %v908_v25, %v907_v27  ;;  %v912_v63 = vor.u32 %v911_v14, %v910_v50  ;;  %v917_v56 = vshrl.u32 %v4282_v22, %v902_v62 }
 0x199   :  { %v659_v6 = vxor.u32 2147483648, %v658_v29  ;;  %v915_v47 = vor.u32 %v914_v1, %v913_v35  ;;  %v2325_v53 = vsub.s32 4, %v2301_v59  ;;  %v916_v49 = vshll.u32 %v4281_v15, %v901_v26 }
 0x19a   :  { %v2305_v2 = vsub.s32 0, %v5103_v52  ;;  %v5108_v31 = vshll.u32 %v895_v19, 8  ;;  %v903_v57 = vshrl.u32 %v4277_v5, %v902_v62  ;;  %vm919_vm0 = vcmp.lt.s32.totalorder %v900_v30, 1 }
 0x19b   :  { %v660_v24 = vsel %vm577_vm13, %v659_v6, %v658_v29  ;;  %v2555_v38 = vshrl.u32 %v2554_v12, 23  ;;  %v918_v55 = vor.u32 %v917_v56, %v916_v49  ;;  %vm922_vm1 = vcmp.lt.s32.totalorder %v900_v30, 4 }
 0x19c   :  { %v663_v0 = vsel %vm5086_vm14, %v4453_v51, %v660_v24  ;;  %v3848_v17 = vmin.u32 %v2305_v2, %v5103_v52  ;;  %v924_v41 = vsel %vm922_vm1, %v912_v63, 2102212464  ;;  %v927_v16 = vsel %vm919_vm0, %v906_v34, %v909_v43 }
 0x19d   :  { %4149 = vcosq.f32 %v663_v0  ;;  %v928_v60 = vsel %vm922_vm1, %v915_v47, 920167782  ;;  %v2326_v28 = vsel %vm2241_vm15, %v2325_v53, %v2301_v59  ;;  %vm921_vm2 = vcmp.lt.s32.totalorder %v900_v30, 3 }
 0x19e   :  { %4151 = vsinq.f32 %v663_v0  ;;  %v2307_v18 = vclz %v3848_v17  ;;  %vm920_vm3 = vcmp.lt.s32.totalorder %v900_v30, 2  ;;  %v923_v26 = vsel %vm919_vm0, %v903_v57, %v906_v34  ;;  %v5148_v34 = vpop.f32.mrb[7].mxu1 }
 0x19f   :  { %v929_v4 = vsel %vm921_vm2, %v912_v63, %v928_v60  ;;  %v931_v48 = vsel %vm919_vm0, %v909_v43, %v912_v63  ;;  %v925_v19 = vsel %vm921_vm2, %v909_v43, %v924_v41  ;;  %v932_v21 = vsel %vm922_vm1, %v918_v55, 1326507024 }
 0x1a0   :  { %v3849_v36 = vadd.s32 4294967294, %v2307_v18  ;;  %v930_v62 = vsel %vm920_vm3, %v927_v16, %v929_v4  ;;  %v933_v10 = vsel %vm921_vm2, %v915_v47, %v932_v21  ;;  %v3859_v59 = vadd.s32 4294967169, %v2555_v38 }
 0x1a1   :  { %v5127_v12 = vmul.u32.u64.low %v5108_v31, %v930_v62  ;;  %v5128_v32 = vmul.u32.u64.high %v5108_v31, %v930_v62, %v5127_v12  ;;  %vm5133_vm4 = vcmp.le.f32.partialorder %v2239_v39, 0.7853982  ;;  %v2295_v42 = vadd.s32 %v5054_v23, %v5065_v37 }
 0x1a2   :  { %vm3850_vm5 = vcmp.lt.s32.totalorder %v3849_v36, 0  ;;  %v934_v25 = vsel %vm920_vm3, %v931_v48, %v933_v10  ;;  %v2561_v1 = vadd.s32 1, %v3859_v59  ;;  %vm667_vm6 = vweird.f32 %v4453_v51 }
 0x1a3   :  { %v2310_v45 = vsel %vm3850_vm5, 0, %v3849_v36  ;;  %v5141_v27 = vmul.u32.u64.low %v5108_v31, %v934_v25  ;;  %v5142_v14 = vmul.u32.u64.high %v5108_v31, %v934_v25, %v5141_v27  ;;  %v2328_v39 = vsel %vm5133_vm4, 0, %v2326_v28 }
 0x1a4   :  { %v2311_v29 = vsub.s32 32, %v2310_v45  ;;  %v2315_v50 = vsub.s32 4294967266, %v2310_v45  ;;  %v926_v35 = vsel %vm920_vm3, %v923_v26, %v925_v19  ;;  %v669_v23 = vand.u32 3, %v668_v20 }
 0x1a5   :  { %v945_v37 = vadd.s32 1, %v5128_v32  ;;  %v2551_v43 = vand.u32 2147483647, %v4632_v44  ;;  %vm2562_vm7 = vcmp.gt.s32.totalorder %v2561_v1, 0  ;;  %v2312_v6 = vshll.u32 %v5103_v52, %v2310_v45 }
 0x1a6   :  { %v2313_v63 = vshrl.u32 %v2295_v42, %v2311_v29  ;;  %v2316_v47 = vadd.s32 127, %v2315_v50  ;;  %v2563_v56 = vsel %vm2562_vm7, %v2561_v1, 0  ;;  %v2332_v53 = vadd.s32 3, %v2328_v39 }
 0x1a7   :  { %v4150_v2 = vpop.eup %4149  ;;  %v942_v49 = vmul.u32 %v5108_v31, %v926_v35  ;;  %vm944_vm8 = vc.u32 %v5142_v14, %v5127_v12  ;;  %v2565_v30 = vand.u32 31, %v2563_v56  ;;  %vm674_vm9 = vcmp.eq.s32.totalorder %v669_v23, 2 }
 0x1a8   :  { %v4152_v24 = vpop.eup %4151  ;;  %v675_v20 = vxor.u32 2147483648, %v4150_v2  ;;  %v2314_v57 = vor.u32 %v2313_v63, %v2312_v6  ;;  %v2317_v38 = vshll.u32 %v2316_v47, 23  ;;  %v946_v0 = vsel %vm944_vm8, %v945_v37, %v5128_v32 }
 0x1a9   :  { %v672_v17 = vxor.u32 2147483648, %v4152_v24  ;;  %v947_v52 = vadd.s32 %v946_v0, %v942_v49  ;;  %v2566_v55 = vsub.s32 32, %v2565_v30  ;;  %vm670_vm10 = vcmp.lt.s32.totalorder %v669_v23, 2 }
 0x1aa   :  { %vm671_vm12 = vcmp.eq.s32.totalorder %v669_v23, 0  ;;  %v676_v41 = vsel %vm674_vm9, %v675_v20, %v4152_v24  ;;  %v2318_v16 = vor.u32 4788187, %v2317_v38  ;;  %v5157_v31 = vand.u32 3, %v2332_v53 }
 0x1ab   :  { %v673_v60 = vsel %vm671_vm12, %v4150_v2, %v672_v17  ;;  %v948_v18 = vadd.s32 536870912, %v947_v52  ;;  %v2558_v28 = vand.u32 8388607, %v2551_v43  ;;  %v2321_v48 = vcvt.s32.f32 %v2314_v57 }
 0x1ac   :  { %v677_v26 = vsel %vm670_vm10, %v673_v60, %v676_v41  ;;  %v2319_v4 = vand.u32 2147483647, %v2318_v16  ;;  %v2569_v36 = vshrl.u32 %v4278_v9, %v2566_v55  ;;  %v2572_v21 = vshrl.u32 %v4279_v11, %v2566_v55 }
 0x1ad   :  { %v678_v19 = vsel %vm667_vm6, nan, %v677_v26  ;;  %v949_v62 = vshrl.u32 %v948_v18, 30  ;;  %v2575_v10 = vshrl.u32 %v4280_v13, %v2566_v55  ;;  %v2564_v59 = vshrl.u32 %v2563_v56, 5 }
 0x1ae   :  { %3697 = vst [vmem:[#allocation2 + $0x10] sm:$0xff] %v678_v19  ;;  %v2322_v32 = vmul.f32 %v2321_v48, %v2319_v4  ;;  %v2577_v42 = vshll.u32 %v4280_v13, %v2565_v30  ;;  %v2578_v25 = vshrl.u32 %v4281_v15, %v2566_v55  ;;  %v2568_v27 = vshll.u32 %v4277_v5, %v2565_v30 }
 0x1af   :  { %v950_v45 = vshll.u32 %v949_v62, 30  ;;  %v2571_v1 = vshll.u32 %v4278_v9, %v2565_v30  ;;  %v2574_v51 = vshll.u32 %v4279_v11, %v2565_v30  ;;  %v2580_v39 = vshll.u32 %v4281_v15, %v2565_v30 }
 0x1b0   :  { %v2323_v29 = vxor.u32 2147483648, %v2322_v32  ;;  %v2579_v50 = vor.u32 %v2578_v25, %v2577_v42  ;;  %v2581_v35 = vshrl.u32 %v4282_v22, %v2566_v55  ;;  %vm889_vm11 = vcmp.lt.s32.totalorder %v4536_v54, 0 }
 0x1b1   :  { %v5174_v23 = vsub.s32 %v947_v52, %v950_v45  ;;  %v2570_v37 = vor.u32 %v2569_v36, %v2568_v27  ;;  %v2573_v6 = vor.u32 %v2572_v21, %v2571_v1  ;;  %v2576_v63 = vor.u32 %v2575_v10, %v2574_v51  ;;  %v5208_v27 = vpop.f32.mrb[8].mxu0 }
 0x1b2   :  { %v2324_v47 = vsel %vm2241_vm15, %v2323_v29, %v2322_v32  ;;  %v2559_v56 = vor.u32 8388608, %v2558_v28  ;;  %v2582_v2 = vor.u32 %v2581_v35, %v2580_v39  ;;  %v786_v53 = vand.u32 2139095040, %v4736_v3 }
 0x1b3   :  { %v2327_v49 = vsel %vm5133_vm4, %v4456_v58, %v2324_v47  ;;  %v953_v30 = vsub.s32 0, %v5174_v23  ;;  %v2567_v24 = vshrl.u32 %v4277_v5, %v2566_v55  ;;  %vm2586_vm13 = vcmp.lt.s32.totalorder %v2564_v59, 4 }
 0x1b4   :  { %4153 = vcosq.f32 %v2327_v49  ;;  %vm5186_vm14 = vcmp.le.f32.partialorder %v887_v61, 0.7853982  ;;  %vm2583_vm15 = vcmp.lt.s32.totalorder %v2564_v59, 1  ;;  %vm2585_vm0 = vcmp.lt.s32.totalorder %v2564_v59, 3 }
 0x1b5   :  { %v2592_v57 = vsel %vm2586_vm13, %v2579_v50, 920167782  ;;  %4155 = vsinq.f32 %v2327_v49  ;;  %v3796_v38 = vmin.u32 %v953_v30, %v5174_v23  ;;  %v2588_v46 = vsel %vm2586_vm13, %v2576_v63, 2102212464 }
 0x1b6   :  { %v2591_v0 = vsel %vm2583_vm15, %v2570_v37, %v2573_v6  ;;  %v973_v17 = vsub.s32 4, %v949_v62  ;;  %v2593_v52 = vsel %vm2585_vm0, %v2576_v63, %v2592_v57  ;;  %v2595_v55 = vsel %vm2583_vm15, %v2573_v6, %v2576_v63 }
 0x1b7   :  { %v2596_v41 = vsel %vm2586_vm13, %v2582_v2, 1326507024  ;;  %v955_v16 = vclz %v3796_v38  ;;  %vm2584_vm1 = vcmp.lt.s32.totalorder %v2564_v59, 2  ;;  %v2587_v60 = vsel %vm2583_vm15, %v2567_v24, %v2570_v37 }
 0x1b8   :  { %v2599_v61 = vshll.u32 %v2559_v56, 8  ;;  %v2589_v18 = vsel %vm2585_vm0, %v2573_v6, %v2588_v46  ;;  %v2594_v28 = vsel %vm2584_vm1, %v2591_v0, %v2593_v52  ;;  %v2597_v26 = vsel %vm2585_vm0, %v2579_v50, %v2596_v41 }
 0x1b9   :  { %v787_v4 = vshrl.u32 %v786_v53, 23  ;;  %v3797_v48 = vadd.s32 4294967294, %v955_v16  ;;  %v2598_v36 = vsel %vm2584_vm1, %v2595_v55, %v2597_v26  ;;  %v974_v10 = vsel %vm889_vm11, %v973_v17, %v949_v62 }
 0x1ba   :  { %v5196_v19 = vmul.u32.u64.low %v2599_v61, %v2594_v28  ;;  %v5197_v21 = vmul.u32.u64.high %v2599_v61, %v2594_v28, %v5196_v19  ;;  %v5202_v32 = vmul.u32.u64.low %v2599_v61, %v2598_v36  ;;  %v5203_v42 = vmul.u32.u64.high %v2599_v61, %v2598_v36, %v5202_v32 }
 0x1bb   :  { %v3791_v25 = vadd.s32 4294967169, %v787_v4  ;;  %vm2335_vm2 = vcmp.eq.s32.totalorder %v5157_v31, 0  ;;  %vm2338_vm3 = vcmp.eq.s32.totalorder %v5157_v31, 2  ;;  %vm3798_vm4 = vcmp.lt.s32.totalorder %v3797_v48, 0 }
 0x1bc   :  { %v2590_v45 = vsel %vm2584_vm1, %v2587_v60, %v2589_v18  ;;  %v943_v1 = vadd.s32 %v5127_v12, %v5142_v14  ;;  %v958_v51 = vsel %vm3798_vm4, 0, %v3797_v48  ;;  %v783_v29 = vand.u32 2147483647, %v4736_v3 }
 0x1bd   :  { %v793_v62 = vadd.s32 1, %v3791_v25  ;;  %v959_v50 = vsub.s32 32, %v958_v51  ;;  %v963_v39 = vsub.s32 4294967266, %v958_v51  ;;  %v976_v35 = vsel %vm5186_vm14, 0, %v974_v10 }
 0x1be   :  { %v2609_v37 = vadd.s32 1, %v5197_v21  ;;  %v4154_v6 = vpop.eup %4153  ;;  %v960_v59 = vshll.u32 %v5174_v23, %v958_v51  ;;  %v2606_v63 = vmul.u32 %v2599_v61, %v2590_v45  ;;  %vm2608_vm5 = vc.u32 %v5203_v42, %v5196_v19 }
 0x1bf   :  { %vm794_vm6 = vcmp.gt.s32.totalorder %v793_v62, 0  ;;  %v4156_v12 = vpop.eup %4155  ;;  %v2339_v14 = vxor.u32 2147483648, %v4154_v6  ;;  %v961_v47 = vshrl.u32 %v943_v1, %v959_v50  ;;  %v964_v56 = vadd.s32 127, %v963_v39 }
 0x1c0   :  { %v2610_v2 = vsel %vm2608_vm5, %v2609_v37, %v5197_v21  ;;  %v2336_v53 = vxor.u32 2147483648, %v4156_v12  ;;  %v980_v49 = vadd.s32 3, %v976_v35  ;;  %v795_v24 = vsel %vm794_vm6, %v793_v62, 0 }
 0x1c1   :  { %v2611_v30 = vadd.s32 %v2610_v2, %v2606_v63  ;;  %v2340_v57 = vsel %vm2338_vm3, %v2339_v14, %v4156_v12  ;;  %v962_v38 = vor.u32 %v961_v47, %v960_v59  ;;  %v965_v23 = vshll.u32 %v964_v56, 23 }
 0x1c2   :  { %v790_v46 = vand.u32 8388607, %v783_v29  ;;  %vm2334_vm7 = vcmp.lt.s32.totalorder %v5157_v31, 2  ;;  %v2337_v0 = vsel %vm2335_vm2, %v4154_v6, %v2336_v53  ;;  %v797_v52 = vand.u32 31, %v795_v24 }
 0x1c3   :  { %v2612_v17 = vadd.s32 536870912, %v2611_v30  ;;  %vm2331_vm8 = vweird.f32 %v4456_v58  ;;  %v2341_v55 = vsel %vm2334_vm7, %v2337_v0, %v2340_v57  ;;  %v966_v41 = vor.u32 4788187, %v965_v23 }
 0x1c4   :  { %v2342_v16 = vsel %vm2331_vm8, nan, %v2341_v55  ;;  %v798_v61 = vsub.s32 32, %v797_v52  ;;  %v969_v28 = vcvt.s32.f32 %v962_v38  ;;  %v5230_v26 = vand.u32 3, %v980_v49 }
 0x1c5   :  { %v5228_v60 = vshrl.u32 %v2612_v17, 30  ;;  %3713 = vst [vmem:[#allocation2 + $0x90] sm:$0xff] %v2342_v16  ;;  %v967_v18 = vand.u32 2147483647, %v966_v41  ;;  %v791_v4 = vor.u32 8388608, %v790_v46  ;;  %v800_v31 = vshll.u32 %v4277_v5, %v797_v52 }
 0x1c6   :  { %v801_v36 = vshrl.u32 %v4278_v9, %v798_v61  ;;  %v2450_v58 = vand.u32 2139095040, %v4829_v8  ;;  %v804_v10 = vshrl.u32 %v4279_v11, %v798_v61  ;;  %v807_v32 = vshrl.u32 %v4280_v13, %v798_v61 }
 0x1c7   :  { %v2614_v48 = vshll.u32 %v5228_v60, 30  ;;  %v970_v21 = vmul.f32 %v969_v28, %v967_v18  ;;  %v810_v25 = vshrl.u32 %v4281_v15, %v798_v61  ;;  %v796_v1 = vshrl.u32 %v795_v24, 5 }
 0x1c8   :  { %v803_v51 = vshll.u32 %v4278_v9, %v797_v52  ;;  %v806_v62 = vshll.u32 %v4279_v11, %v797_v52  ;;  %v802_v39 = vor.u32 %v801_v36, %v800_v31  ;;  %v809_v35 = vshll.u32 %v4280_v13, %v797_v52 }
 0x1c9   :  { %v5239_v45 = vsub.s32 %v2611_v30, %v2614_v48  ;;  %v971_v50 = vxor.u32 2147483648, %v970_v21  ;;  %v812_v37 = vshll.u32 %v4281_v15, %v797_v52  ;;  %v813_v12 = vshrl.u32 %v4282_v22, %v798_v61 }
 0x1ca   :  { %v805_v59 = vor.u32 %v804_v10, %v803_v51  ;;  %v808_v63 = vor.u32 %v807_v32, %v806_v62  ;;  %v2607_v47 = vadd.s32 %v5196_v19, %v5203_v42  ;;  %v811_v56 = vor.u32 %v810_v25, %v809_v35  ;;  %v5268_v51 = vpop.f32.mrb[8].mxu1 }
 0x1cb   :  { %v2617_v6 = vsub.s32 0, %v5239_v45  ;;  %v972_v14 = vsel %vm889_vm11, %v971_v50, %v970_v21  ;;  %v831_v2 = vshll.u32 %v791_v4, 8  ;;  %v814_v30 = vor.u32 %v813_v12, %v812_v37 }
 0x1cc   :  { %v975_v53 = vsel %vm5186_vm14, %v4536_v54, %v972_v14  ;;  %v2451_v24 = vshrl.u32 %v2450_v58, 23  ;;  %v799_v57 = vshrl.u32 %v4277_v5, %v798_v61  ;;  %vm815_vm9 = vcmp.lt.s32.totalorder %v796_v1, 1 }
 0x1cd   :  { %v3860_v49 = vmin.u32 %v2617_v6, %v5239_v45  ;;  %4157 = vcosq.f32 %v975_v53  ;;  %vm818_vm10 = vcmp.lt.s32.totalorder %v796_v1, 4  ;;  %vm2553_vm12 = vcmp.lt.s32.totalorder %v4632_v44, 0 }
 0x1ce   :  { %4159 = vsinq.f32 %v975_v53  ;;  %v820_v19 = vsel %vm818_vm10, %v808_v63, 2102212464  ;;  %v823_v42 = vsel %vm815_vm9, %v802_v39, %v805_v59  ;;  %vm816_vm11 = vcmp.lt.s32.totalorder %v796_v1, 2 }
 0x1cf   :  { %v2619_v38 = vclz %v3860_v49  ;;  %vm817_vm13 = vcmp.lt.s32.totalorder %v796_v1, 3  ;;  %v824_v23 = vsel %vm818_vm10, %v811_v56, 920167782  ;;  %v827_v20 = vsel %vm815_vm9, %v805_v59, %v808_v63 }
 0x1d0   :  { %v819_v0 = vsel %vm815_vm9, %v799_v57, %v802_v39  ;;  %v825_v17 = vsel %vm817_vm13, %v808_v63, %v824_v23  ;;  %v828_v52 = vsel %vm818_vm10, %v814_v30, 1326507024  ;;  %v821_v55 = vsel %vm817_vm13, %v805_v59, %v820_v19 }
 0x1d1   :  { %v3861_v46 = vadd.s32 4294967294, %v2619_v38  ;;  %v826_v41 = vsel %vm816_vm11, %v823_v42, %v825_v17  ;;  %v829_v16 = vsel %vm817_vm13, %v811_v56, %v828_v52  ;;  %v3855_v61 = vadd.s32 4294967169, %v2451_v24 }
 0x1d2   :  { %v830_v18 = vsel %vm816_vm11, %v827_v20, %v829_v16  ;;  %v5259_v28 = vmul.u32.u64.low %v831_v2, %v826_v41  ;;  %v5260_v4 = vmul.u32.u64.high %v831_v2, %v826_v41, %v5259_v28  ;;  %v2637_v31 = vsub.s32 4, %v5228_v60 }
 0x1d3   :  { %vm3862_vm14 = vcmp.lt.s32.totalorder %v3861_v46, 0  ;;  %v5264_v36 = vmul.u32.u64.low %v831_v2, %v830_v18  ;;  %v5265_v58 = vmul.u32.u64.high %v831_v2, %v830_v18, %v5264_v36  ;;  %v822_v32 = vsel %vm816_vm11, %v819_v0, %v821_v55 }
 0x1d4   :  { %v2622_v48 = vsel %vm3862_vm14, 0, %v3861_v46  ;;  %v2457_v25 = vadd.s32 1, %v3855_v61  ;;  %vm983_vm15 = vcmp.eq.s32.totalorder %v5230_v26, 0  ;;  %vm5273_vm0 = vcmp.le.f32.partialorder %v2551_v43, 0.7853982 }
 0x1d5   :  { %v2623_v21 = vsub.s32 32, %v2622_v48  ;;  %v2627_v10 = vsub.s32 4294967266, %v2622_v48  ;;  %v2624_v50 = vshll.u32 %v5239_v45, %v2622_v48  ;;  %v2447_v39 = vand.u32 2147483647, %v4829_v8 }
 0x1d6   :  { %v841_v1 = vadd.s32 1, %v5260_v4  ;;  %vm2458_vm1 = vcmp.gt.s32.totalorder %v2457_v25, 0  ;;  %v2638_v59 = vsel %vm2553_vm12, %v2637_v31, %v5228_v60  ;;  %v838_v63 = vmul.u32 %v831_v2, %v822_v32 }
 0x1d7   :  { %v2625_v35 = vshrl.u32 %v2607_v47, %v2623_v21  ;;  %v2628_v37 = vadd.s32 127, %v2627_v10  ;;  %v4158_v6 = vpop.eup %4157  ;;  %vm840_vm2 = vc.u32 %v5265_v58, %v5259_v28  ;;  %v2459_v43 = vsel %vm2458_vm1, %v2457_v25, 0 }
 0x1d8   :  { %v4160_v12 = vpop.eup %4159  ;;  %v987_v14 = vxor.u32 2147483648, %v4158_v6  ;;  %v842_v47 = vsel %vm840_vm2, %v841_v1, %v5260_v4  ;;  %vm986_vm3 = vcmp.eq.s32.totalorder %v5230_v26, 2  ;;  %v2461_v30 = vand.u32 31, %v2459_v43 }
 0x1d9   :  { %v2626_v45 = vor.u32 %v2625_v35, %v2624_v50  ;;  %v2629_v56 = vshll.u32 %v2628_v37, 23  ;;  %v984_v53 = vxor.u32 2147483648, %v4160_v12  ;;  %v843_v49 = vadd.s32 %v842_v47, %v838_v63 }
 0x1da   :  { %v988_v24 = vsel %vm986_vm3, %v987_v14, %v4160_v12  ;;  %v2640_v60 = vsel %vm5273_vm0, 0, %v2638_v59  ;;  %v2454_v2 = vand.u32 8388607, %v2447_v39  ;;  %vm982_vm4 = vcmp.lt.s32.totalorder %v5230_v26, 2 }
 0x1db   :  { %v2630_v57 = vor.u32 4788187, %v2629_v56  ;;  %v985_v38 = vsel %vm983_vm15, %v4158_v6, %v984_v53  ;;  %v844_v19 = vadd.s32 536870912, %v843_v49  ;;  %v2462_v42 = vsub.s32 32, %v2461_v30 }
 0x1dc   :  { %vm979_vm5 = vweird.f32 %v4536_v54  ;;  %v989_v23 = vsel %vm982_vm4, %v985_v38, %v988_v24  ;;  %v2633_v46 = vcvt.s32.f32 %v2626_v45  ;;  %v2644_v17 = vadd.s32 3, %v2640_v60 }
 0x1dd   :  { %v2631_v20 = vand.u32 2147483647, %v2630_v57  ;;  %v990_v0 = vsel %vm979_vm5, nan, %v989_v23  ;;  %v845_v52 = vshrl.u32 %v844_v19, 30  ;;  %v2465_v55 = vshrl.u32 %v4278_v9, %v2462_v42 }
 0x1de   :  { %3700 = vst [vmem:[#allocation2 + $0x28] sm:$0xff] %v990_v0  ;;  %v2455_v16 = vor.u32 8388608, %v2454_v2  ;;  %v2468_v61 = vshrl.u32 %v4279_v11, %v2462_v42  ;;  %v2471_v26 = vshrl.u32 %v4280_v13, %v2462_v42  ;;  %v2464_v4 = vshll.u32 %v4277_v5, %v2461_v30 }
 0x1df   :  { %v2634_v41 = vmul.f32 %v2633_v46, %v2631_v20  ;;  %v846_v18 = vshll.u32 %v845_v52, 30  ;;  %v2467_v54 = vshll.u32 %v4278_v9, %v2461_v30  ;;  %v2474_v48 = vshrl.u32 %v4281_v15, %v2462_v42 }
 0x1e0   :  { %v2460_v36 = vshrl.u32 %v2459_v43, 5  ;;  %v2470_v21 = vshll.u32 %v4279_v11, %v2461_v30  ;;  %v2473_v10 = vshll.u32 %v4280_v13, %v2461_v30  ;;  %v2466_v25 = vor.u32 %v2465_v55, %v2464_v4 }
 0x1e1   :  { %v2635_v31 = vxor.u32 2147483648, %v2634_v41  ;;  %v5303_v32 = vsub.s32 %v843_v49, %v846_v18  ;;  %v2469_v50 = vor.u32 %v2468_v61, %v2467_v54  ;;  %v2477_v35 = vshrl.u32 %v4282_v22, %v2462_v42  ;;  %v5333_v61 = vpop.f32.mrb[9].mxu0 }
 0x1e2   :  { %vm785_vm6 = vcmp.lt.s32.totalorder %v4736_v3, 0  ;;  %v2472_v1 = vor.u32 %v2471_v26, %v2470_v21  ;;  %v2475_v6 = vor.u32 %v2474_v48, %v2473_v10  ;;  %v2476_v59 = vshll.u32 %v4281_v15, %v2461_v30 }
 0x1e3   :  { %v2636_v37 = vsel %vm2553_vm12, %v2635_v31, %v2634_v41  ;;  %v5313_v43 = vand.u32 3, %v2644_v17  ;;  %v849_v12 = vsub.s32 0, %v5303_v32  ;;  %v1095_v14 = vand.u32 2147483647, %v4925_v40 }
 0x1e4   :  { %v2639_v63 = vsel %vm5273_vm0, %v4632_v44, %v2636_v37  ;;  %v2463_v45 = vshrl.u32 %v4277_v5, %v2462_v42  ;;  %v2478_v56 = vor.u32 %v2477_v35, %v2476_v59  ;;  %v2495_v47 = vshll.u32 %v2455_v16, 8 }
 0x1e5   :  { %4161 = vcosq.f32 %v2639_v63  ;;  %vm5320_vm7 = vcmp.le.f32.partialorder %v783_v29, 0.7853982  ;;  %v3792_v62 = vmin.u32 %v849_v12, %v5303_v32  ;;  %vm2479_vm8 = vcmp.lt.s32.totalorder %v2460_v36, 1 }
 0x1e6   :  { %4163 = vsinq.f32 %v2639_v63  ;;  %vm2482_vm9 = vcmp.lt.s32.totalorder %v2460_v36, 4  ;;  %v869_v49 = vsub.s32 4, %v845_v52  ;;  %v2487_v24 = vsel %vm2479_vm8, %v2466_v25, %v2469_v50 }
 0x1e7   :  { %v2484_v30 = vsel %vm2482_vm9, %v2472_v1, 2102212464  ;;  %v2488_v57 = vsel %vm2482_vm9, %v2475_v6, 920167782  ;;  %v851_v60 = vclz %v3792_v62  ;;  %vm2480_vm10 = vcmp.lt.s32.totalorder %v2460_v36, 2 }
 0x1e8   :  { %vm2481_vm12 = vcmp.lt.s32.totalorder %v2460_v36, 3  ;;  %v2491_v2 = vsel %vm2479_vm8, %v2469_v50, %v2472_v1  ;;  %v2483_v38 = vsel %vm2479_vm8, %v2463_v45, %v2466_v25  ;;  %v2492_v42 = vsel %vm2482_vm9, %v2478_v56, 1326507024 }
 0x1e9   :  { %v2489_v19 = vsel %vm2481_vm12, %v2472_v1, %v2488_v57  ;;  %v1098_v29 = vand.u32 2139095040, %v4925_v40  ;;  %v3793_v23 = vadd.s32 4294967294, %v851_v60  ;;  %v2485_v20 = vsel %vm2481_vm12, %v2469_v50, %v2484_v30 }
 0x1ea   :  { %v2490_v46 = vsel %vm2480_vm10, %v2487_v24, %v2489_v19  ;;  %v2493_v0 = vsel %vm2481_vm12, %v2475_v6, %v2492_v42  ;;  %vm2646_vm11 = vcmp.lt.s32.totalorder %v5313_v43, 2  ;;  %v870_v26 = vsel %vm785_vm6, %v869_v49, %v845_v52 }
 0x1eb   :  { %v2494_v17 = vsel %vm2480_vm10, %v2491_v2, %v2493_v0  ;;  %v5329_v55 = vmul.u32.u64.low %v2495_v47, %v2490_v46  ;;  %v5330_v41 = vmul.u32.u64.high %v2495_v47, %v2490_v46, %v5329_v55  ;;  %v1099_v16 = vshrl.u32 %v1098_v29, 23 }
 0x1ec   :  { %vm3794_vm13 = vcmp.lt.s32.totalorder %v3793_v23, 0  ;;  %v5337_v18 = vmul.u32.u64.low %v2495_v47, %v2494_v17  ;;  %v5338_v4 = vmul.u32.u64.high %v2495_v47, %v2494_v17, %v5337_v18  ;;  %vm2647_vm14 = vcmp.eq.s32.totalorder %v5313_v43, 0 }
 0x1ed   :  { %vm2650_vm15 = vcmp.eq.s32.totalorder %v5313_v43, 2  ;;  %v854_v54 = vsel %vm3794_vm13, 0, %v3793_v23  ;;  %v3803_v48 = vadd.s32 4294967169, %v1099_v16  ;;  %v839_v31 = vadd.s32 %v5259_v28, %v5265_v58 }
 0x1ee   :  { %v855_v21 = vsub.s32 32, %v854_v54  ;;  %v859_v10 = vsub.s32 4294967266, %v854_v54  ;;  %v2486_v25 = vsel %vm2480_vm10, %v2483_v38, %v2485_v20  ;;  %v872_v52 = vsel %vm5320_vm7, 0, %v870_v26 }
 0x1ef   :  { %v4162_v50 = vpop.eup %4161  ;;  %v2505_v35 = vadd.s32 1, %v5330_v41  ;;  %v1102_v37 = vand.u32 8388607, %v1095_v14  ;;  %v1105_v1 = vadd.s32 1, %v3803_v48  ;;  %v856_v63 = vshll.u32 %v5303_v32, %v854_v54 }
 0x1f0   :  { %v4164_v6 = vpop.eup %4163  ;;  %v2651_v59 = vxor.u32 2147483648, %v4162_v50  ;;  %v857_v12 = vshrl.u32 %v839_v31, %v855_v21  ;;  %v860_v28 = vadd.s32 127, %v859_v10  ;;  %v2502_v45 = vmul.u32 %v2495_v47, %v2486_v25 }
 0x1f1   :  { %v2648_v58 = vxor.u32 2147483648, %v4164_v6  ;;  %vm2504_vm0 = vc.u32 %v5338_v4, %v5329_v55  ;;  %vm1106_vm1 = vcmp.gt.s32.totalorder %v1105_v1, 0  ;;  %v876_v24 = vadd.s32 3, %v872_v52 }
 0x1f2   :  { %v2652_v36 = vsel %vm2650_vm15, %v2651_v59, %v4164_v6  ;;  %v858_v56 = vor.u32 %v857_v12, %v856_v63  ;;  %v861_v62 = vshll.u32 %v860_v28, 23  ;;  %v2506_v49 = vsel %vm2504_vm0, %v2505_v35, %v5330_v41 }
 0x1f3   :  { %v2649_v30 = vsel %vm2647_vm14, %v4162_v50, %v2648_v58  ;;  %v2507_v32 = vadd.s32 %v2506_v49, %v2502_v45  ;;  %v1107_v57 = vsel %vm1106_vm1, %v1105_v1, 0  ;;  %vm2643_vm2 = vweird.f32 %v4632_v44 }
 0x1f4   :  { %v2653_v47 = vsel %vm2646_vm11, %v2649_v30, %v2652_v36  ;;  %v862_v60 = vor.u32 4788187, %v861_v62  ;;  %v1103_v2 = vor.u32 8388608, %v1102_v37  ;;  %v1109_v42 = vand.u32 31, %v1107_v57 }
 0x1f5   :  { %v2654_v38 = vsel %vm2643_vm2, nan, %v2653_v47  ;;  %v2508_v19 = vadd.s32 536870912, %v2507_v32  ;;  %v865_v23 = vcvt.s32.f32 %v858_v56  ;;  %v5361_v20 = vand.u32 3, %v876_v24 }
 0x1f6   :  { %3716 = vst [vmem:[#allocation2 + $0xa8] sm:$0xff] %v2654_v38  ;;  %v863_v29 = vand.u32 2147483647, %v862_v60  ;;  %v1110_v0 = vsub.s32 32, %v1109_v42  ;;  %v5363_v41 = vshrl.u32 %v1107_v57, 5  ;;  %v5365_v16 = vshll.u32 %v1103_v2, 8 }
 0x1f7   :  { %v2509_v46 = vshrl.u32 %v2508_v19, 30  ;;  %v2762_v44 = vand.u32 2139095040, %v4977_v33  ;;  %vm2449_vm3 = vcmp.lt.s32.totalorder %v4829_v8, 0  ;;  %v1112_v26 = vshll.u32 %v4277_v5, %v1109_v42 }
 0x1f8   :  { %v866_v17 = vmul.f32 %v865_v23, %v863_v29  ;;  %v1113_v18 = vshrl.u32 %v4278_v9, %v1110_v0  ;;  %v1115_v54 = vshll.u32 %v4278_v9, %v1109_v42  ;;  %v1116_v31 = vshrl.u32 %v4279_v11, %v1110_v0 }
 0x1f9   :  { %v2510_v43 = vshll.u32 %v2509_v46, 30  ;;  %v1119_v21 = vshrl.u32 %v4280_v13, %v1110_v0  ;;  %v1122_v10 = vshrl.u32 %v4281_v15, %v1110_v0  ;;  %v1118_v50 = vshll.u32 %v4279_v11, %v1109_v42 }
 0x1fa   :  { %v867_v48 = vxor.u32 2147483648, %v866_v17  ;;  %v1121_v52 = vshll.u32 %v4280_v13, %v1109_v42  ;;  %v1125_v35 = vshrl.u32 %v4282_v22, %v1110_v0  ;;  %v1114_v1 = vor.u32 %v1113_v18, %v1112_v26 }
 0x1fb   :  { %v5375_v25 = vsub.s32 %v2507_v32, %v2510_v43  ;;  %v1117_v6 = vor.u32 %v1116_v31, %v1115_v54  ;;  %v1124_v59 = vshll.u32 %v4281_v15, %v1109_v42  ;;  %v1120_v28 = vor.u32 %v1119_v21, %v1118_v50  ;;  %v5418_v31 = vpop.f32.mrb[9].mxu1 }
 0x1fc   :  { %v868_v37 = vsel %vm785_vm6, %v867_v48, %v866_v17  ;;  %v1123_v58 = vor.u32 %v1122_v10, %v1121_v52  ;;  %v2533_v45 = vsub.s32 4, %v2509_v46  ;;  %v2763_v56 = vshrl.u32 %v2762_v44, 23 }
 0x1fd   :  { %v871_v63 = vsel %vm5320_vm7, %v4736_v3, %v868_v37  ;;  %v2513_v12 = vsub.s32 0, %v5375_v25  ;;  %v1126_v36 = vor.u32 %v1125_v35, %v1124_v59  ;;  %vm5389_vm4 = vcmp.le.f32.partialorder %v2447_v39, 0.7853982 }
 0x1fe   :  { %4165 = vcosq.f32 %v871_v63  ;;  %vm1127_vm5 = vcmp.lt.s32.totalorder %v5363_v41, 1  ;;  %vm1130_vm6 = vcmp.lt.s32.totalorder %v5363_v41, 4  ;;  %vm1128_vm7 = vcmp.lt.s32.totalorder %v5363_v41, 2 }
 0x1ff   :  { %4167 = vsinq.f32 %v871_v63  ;;  %v3856_v49 = vmin.u32 %v2513_v12, %v5375_v25  ;;  %vm1129_vm8 = vcmp.lt.s32.totalorder %v5363_v41, 3  ;;  %v1135_v53 = vsel %vm1127_vm5, %v1114_v1, %v1117_v6 }
 0x200   :  { %v1136_v30 = vsel %vm1130_vm6, %v1123_v58, 920167782  ;;  %v1111_v32 = vshrl.u32 %v4277_v5, %v1110_v0  ;;  %v1132_v57 = vsel %vm1130_vm6, %v1120_v28, 2102212464  ;;  %v1139_v39 = vsel %vm1127_vm5, %v1117_v6, %v1120_v28 }
 0x201   :  { %v2515_v24 = vclz %v3856_v49  ;;  %v2534_v47 = vsel %vm2449_vm3, %v2533_v45, %v2509_v46  ;;  %v1137_v60 = vsel %vm1129_vm8, %v1120_v28, %v1136_v30  ;;  %v1140_v2 = vsel %vm1130_vm6, %v1126_v36, 1326507024 }
 0x202   :  { %v3867_v38 = vadd.s32 4294967169, %v2763_v56  ;;  %v1131_v42 = vsel %vm1127_vm5, %v1111_v32, %v1114_v1  ;;  %v1138_v29 = vsel %vm1128_vm7, %v1135_v53, %v1137_v60  ;;  %v1141_v23 = vsel %vm1129_vm8, %v1123_v58, %v1140_v2 }
 0x203   :  { %v3857_v19 = vadd.s32 4294967294, %v2515_v24  ;;  %v1133_v17 = vsel %vm1129_vm8, %v1117_v6, %v1132_v57  ;;  %v1142_v44 = vsel %vm1128_vm7, %v1139_v39, %v1141_v23  ;;  %vm879_vm10 = vcmp.eq.s32.totalorder %v5361_v20, 0 }
 0x204   :  { %v5406_v0 = vmul.u32.u64.low %v5365_v16, %v1138_v29  ;;  %v5407_v43 = vmul.u32.u64.high %v5365_v16, %v1138_v29, %v5406_v0  ;;  %v5411_v46 = vmul.u32.u64.low %v5365_v16, %v1142_v44  ;;  %v5412_v26 = vmul.u32.u64.high %v5365_v16, %v1142_v44, %v5411_v46 }
 0x205   :  { %vm3858_vm9 = vcmp.lt.s32.totalorder %v3857_v19, 0  ;;  %v2769_v18 = vadd.s32 1, %v3867_v38  ;;  %vm882_vm12 = vcmp.eq.s32.totalorder %v5361_v20, 2  ;;  %v2503_v54 = vadd.s32 %v5329_v55, %v5338_v4 }
 0x206   :  { %v2518_v48 = vsel %vm3858_vm9, 0, %v3857_v19  ;;  %v1134_v50 = vsel %vm1128_vm7, %v1131_v42, %v1133_v17  ;;  %v2536_v35 = vsel %vm5389_vm4, 0, %v2534_v47  ;;  %v1153_v37 = vadd.s32 1, %v5407_v43 }
 0x207   :  { %v2519_v21 = vsub.s32 32, %v2518_v48  ;;  %v2523_v10 = vsub.s32 4294967266, %v2518_v48  ;;  %vm2770_vm11 = vcmp.gt.s32.totalorder %v2769_v18, 0  ;;  %v2759_v1 = vand.u32 2147483647, %v4977_v33 }
 0x208   :  { %v4166_v52 = vpop.eup %4165  ;;  %v2771_v6 = vsel %vm2770_vm11, %v2769_v18, 0  ;;  %v2520_v4 = vshll.u32 %v5375_v25, %v2518_v48  ;;  %v1150_v41 = vmul.u32 %v5365_v16, %v1134_v50  ;;  %vm1152_vm13 = vc.u32 %v5412_v26, %v5406_v0 }
 0x209   :  { %v4168_v59 = vpop.eup %4167  ;;  %v883_v55 = vxor.u32 2147483648, %v4166_v52  ;;  %v2521_v63 = vshrl.u32 %v2503_v54, %v2519_v21  ;;  %v2524_v12 = vadd.s32 127, %v2523_v10  ;;  %v2773_v58 = vand.u32 31, %v2771_v6 }
 0x20a   :  { %v880_v28 = vxor.u32 2147483648, %v4168_v59  ;;  %v1154_v49 = vsel %vm1152_vm13, %v1153_v37, %v5407_v43  ;;  %vm878_vm14 = vcmp.lt.s32.totalorder %v5361_v20, 2  ;;  %vm875_vm15 = vweird.f32 %v4736_v3 }
 0x20b   :  { %v884_v45 = vsel %vm882_vm12, %v883_v55, %v4168_v59  ;;  %v2522_v36 = vor.u32 %v2521_v63, %v2520_v4  ;;  %v2525_v56 = vshll.u32 %v2524_v12, 23  ;;  %v1155_v53 = vadd.s32 %v1154_v49, %v1150_v41 }
 0x20c   :  { %v881_v25 = vsel %vm879_vm10, %v4166_v52, %v880_v28  ;;  %v2774_v30 = vsub.s32 32, %v2773_v58  ;;  %v2540_v32 = vadd.s32 3, %v2536_v35  ;;  %v2766_v47 = vand.u32 8388607, %v2759_v1 }
 0x20d   :  { %v885_v16 = vsel %vm878_vm14, %v881_v25, %v884_v45  ;;  %v2526_v24 = vor.u32 4788187, %v2525_v56  ;;  %v1156_v39 = vadd.s32 536870912, %v1155_v53  ;;  %v2529_v38 = vcvt.s32.f32 %v2522_v36 }
 0x20e   :  { %v886_v57 = vsel %vm875_vm15, nan, %v885_v16  ;;  %v2777_v60 = vshrl.u32 %v4278_v9, %v2774_v30  ;;  %v2780_v20 = vshrl.u32 %v4279_v11, %v2774_v30  ;;  %v2783_v19 = vshrl.u32 %v4280_v13, %v2774_v30 }
 0x20f   :  { %3699 = vst [vmem:[#allocation2 + $0x20] sm:$0xff] %v886_v57  ;;  %v2527_v2 = vand.u32 2147483647, %v2526_v24  ;;  %v1157_v42 = vshrl.u32 %v1156_v39, 30  ;;  %v2776_v3 = vshll.u32 %v4277_v5, %v2773_v58  ;;  %v2779_v29 = vshll.u32 %v4278_v9, %v2773_v58 }
 0x210   :  { %v2786_v23 = vshrl.u32 %v4281_v15, %v2774_v30  ;;  %v2772_v44 = vshrl.u32 %v2771_v6, 5  ;;  %v2782_v43 = vshll.u32 %v4279_v11, %v2773_v58  ;;  %v2785_v46 = vshll.u32 %v4280_v13, %v2773_v58 }
 0x211   :  { %v2530_v17 = vmul.f32 %v2529_v38, %v2527_v2  ;;  %v1158_v18 = vshll.u32 %v1157_v42, 30  ;;  %v2778_v54 = vor.u32 %v2777_v60, %v2776_v3  ;;  %v2781_v48 = vor.u32 %v2780_v20, %v2779_v29 }
 0x212   :  { %v2789_v21 = vshrl.u32 %v4282_v22, %v2774_v30  ;;  %v2784_v50 = vor.u32 %v2783_v19, %v2782_v43  ;;  %v2787_v52 = vor.u32 %v2786_v23, %v2785_v46  ;;  %v2788_v35 = vshll.u32 %v4281_v15, %v2773_v58  ;;  %v5493_v43 = vpop.f32.mrb[10].mxu0 }
 0x213   :  { %v2531_v10 = vxor.u32 2147483648, %v2530_v17  ;;  %v5449_v37 = vand.u32 3, %v2540_v32  ;;  %v5451_v59 = vsub.s32 %v1155_v53, %v1158_v18  ;;  %v2767_v55 = vor.u32 8388608, %v2766_v47 }
 0x214   :  { %v2775_v6 = vshrl.u32 %v4277_v5, %v2774_v30  ;;  %v1181_v63 = vsub.s32 4, %v1157_v42  ;;  %v2790_v12 = vor.u32 %v2789_v21, %v2788_v35  ;;  %vm2791_vm0 = vcmp.lt.s32.totalorder %v2772_v44, 1 }
 0x215   :  { %v2532_v4 = vsel %vm2449_vm3, %v2531_v10, %v2530_v17  ;;  %v1161_v41 = vsub.s32 0, %v5451_v59  ;;  %vm2793_vm1 = vcmp.lt.s32.totalorder %v2772_v44, 3  ;;  %vm2794_vm2 = vcmp.lt.s32.totalorder %v2772_v44, 4 }
 0x216   :  { %v2535_v28 = vsel %vm5389_vm4, %v4829_v8, %v2532_v4  ;;  %v2796_v58 = vsel %vm2794_vm2, %v2784_v50, 2102212464  ;;  %v2799_v45 = vsel %vm2791_vm0, %v2778_v54, %v2781_v48  ;;  %v2800_v36 = vsel %vm2794_vm2, %v2787_v52, 920167782 }
 0x217   :  { %4169 = vcosq.f32 %v2535_v28  ;;  %v3804_v56 = vmin.u32 %v1161_v41, %v5451_v59  ;;  %vm2792_vm3 = vcmp.lt.s32.totalorder %v2772_v44, 2  ;;  %v2801_v49 = vsel %vm2793_vm1, %v2784_v50, %v2800_v36 }
 0x218   :  { %4171 = vsinq.f32 %v2535_v28  ;;  %v2802_v25 = vsel %vm2792_vm3, %v2799_v45, %v2801_v49  ;;  %v2803_v62 = vsel %vm2791_vm0, %v2781_v48, %v2784_v50  ;;  %v2804_v53 = vsel %vm2794_vm2, %v2790_v12, 1326507024 }
 0x219   :  { %v2807_v30 = vshll.u32 %v2767_v55, 8  ;;  %vm1097_vm4 = vcmp.lt.s32.totalorder %v4925_v40, 0  ;;  %v1163_v16 = vclz %v3804_v56  ;;  %v2795_v24 = vsel %vm2791_vm0, %v2775_v6, %v2778_v54 }
 0x21a   :  { %v2797_v32 = vsel %vm2793_vm1, %v2781_v48, %v2796_v58  ;;  %vm5470_vm5 = vcmp.le.f32.partialorder %v1095_v14, 0.7853982  ;;  %v2805_v39 = vsel %vm2793_vm1, %v2787_v52, %v2804_v53  ;;  %v1182_v38 = vsel %vm1097_vm4, %v1181_v63, %v1157_v42 }
 0x21b   :  { %v5475_v47 = vmul.u32.u64.low %v2807_v30, %v2802_v25  ;;  %v5476_v60 = vmul.u32.u64.high %v2807_v30, %v2802_v25, %v5475_v47  ;;  %v3805_v2 = vadd.s32 4294967294, %v1163_v16  ;;  %v2806_v20 = vsel %vm2792_vm3, %v2803_v62, %v2805_v39 }
 0x21c   :  { %v994_v19 = vand.u32 2139095040, %v5051_v7  ;;  %vm2542_vm6 = vcmp.lt.s32.totalorder %v5449_v37, 2  ;;  %v2798_v14 = vsel %vm2792_vm3, %v2795_v24, %v2797_v32  ;;  %v991_v23 = vand.u32 2147483647, %v5051_v7 }
 0x21d   :  { %v5485_v3 = vmul.u32.u64.low %v2807_v30, %v2806_v20  ;;  %v5486_v29 = vmul.u32.u64.high %v2807_v30, %v2806_v20, %v5485_v3  ;;  %vm2539_vm7 = vweird.f32 %v4829_v8  ;;  %vm2543_vm8 = vcmp.eq.s32.totalorder %v5449_v37, 0 }
 0x21e   :  { %v1151_v42 = vadd.s32 %v5406_v0, %v5412_v26  ;;  %vm3806_vm9 = vcmp.lt.s32.totalorder %v3805_v2, 0  ;;  %v995_v17 = vshrl.u32 %v994_v19, 23  ;;  %v1184_v44 = vsel %vm5470_vm5, 0, %v1182_v38 }
 0x21f   :  { %v1166_v46 = vsel %vm3806_vm9, 0, %v3805_v2  ;;  %v2817_v18 = vadd.s32 1, %v5476_v60  ;;  %v2658_v54 = vand.u32 2139095040, %v5148_v34  ;;  %v2814_v10 = vmul.u32 %v2807_v30, %v2798_v14 }
 0x220   :  { %v1167_v48 = vsub.s32 32, %v1166_v46  ;;  %v1171_v21 = vsub.s32 4294967266, %v1166_v46  ;;  %v3799_v50 = vadd.s32 4294967169, %v995_v17  ;;  %v1168_v35 = vshll.u32 %v5451_v59, %v1166_v46 }
 0x221   :  { %v4170_v52 = vpop.eup %4169  ;;  %vm2816_vm10 = vc.u32 %v5486_v29, %v5475_v47  ;;  %v998_v0 = vand.u32 8388607, %v991_v23  ;;  %v2659_v26 = vshrl.u32 %v2658_v54, 23  ;;  %vm2546_vm12 = vcmp.eq.s32.totalorder %v5449_v37, 2 }
 0x222   :  { %v4172_v55 = vpop.eup %4171  ;;  %v2547_v6 = vxor.u32 2147483648, %v4170_v52  ;;  %v1169_v4 = vshrl.u32 %v1151_v42, %v1167_v48  ;;  %v1172_v63 = vadd.s32 127, %v1171_v21  ;;  %v2818_v12 = vsel %vm2816_vm10, %v2817_v18, %v5476_v60 }
 0x223   :  { %v2544_v28 = vxor.u32 2147483648, %v4172_v55  ;;  %v2819_v41 = vadd.s32 %v2818_v12, %v2814_v10  ;;  %v1001_v58 = vadd.s32 1, %v3799_v50  ;;  %v1188_v56 = vadd.s32 3, %v1184_v44 }
 0x224   :  { %v2548_v45 = vsel %vm2546_vm12, %v2547_v6, %v4172_v55  ;;  %v1170_v59 = vor.u32 %v1169_v4, %v1168_v35  ;;  %v1173_v36 = vshll.u32 %v1172_v63, 23  ;;  %v999_v62 = vor.u32 8388608, %v998_v0 }
 0x225   :  { %v2545_v49 = vsel %vm2543_vm8, %v4170_v52, %v2544_v28  ;;  %v2820_v25 = vadd.s32 536870912, %v2819_v41  ;;  %vm1002_vm11 = vcmp.gt.s32.totalorder %v1001_v58, 0  ;;  %v3863_v24 = vadd.s32 4294967169, %v2659_v26 }
 0x226   :  { %v2549_v53 = vsel %vm2542_vm6, %v2545_v49, %v2548_v45  ;;  %v1174_v30 = vor.u32 4788187, %v1173_v36  ;;  %v1003_v16 = vsel %vm1002_vm11, %v1001_v58, 0  ;;  %vm5514_vm13 = vcmp.le.f32.partialorder %v2759_v1, 0.7853982 }
 0x227   :  { %v2550_v32 = vsel %vm2539_vm7, nan, %v2549_v53  ;;  %v2821_v60 = vshrl.u32 %v2820_v25, 30  ;;  %v1005_v2 = vand.u32 31, %v1003_v16  ;;  %v1177_v20 = vcvt.s32.f32 %v1170_v59 }
 0x228   :  { %3715 = vst [vmem:[#allocation2 + $0xa0] sm:$0xff] %v2550_v32  ;;  %v1175_v38 = vand.u32 2147483647, %v1174_v30  ;;  %v5518_v19 = vand.u32 3, %v1188_v56  ;;  %vm2761_vm14 = vcmp.lt.s32.totalorder %v4977_v33, 0  ;;  %v2815_v1 = vadd.s32 %v5475_v47, %v5486_v29 }
 0x229   :  { %v2822_v37 = vshll.u32 %v2821_v60, 30  ;;  %v2845_v14 = vsub.s32 4, %v2821_v60  ;;  %v1006_v3 = vsub.s32 32, %v1005_v2  ;;  %v2655_v8 = vand.u32 2147483647, %v5148_v34 }
 0x22a   :  { %v1178_v42 = vmul.f32 %v1177_v20, %v1175_v38  ;;  %v5524_v17 = vshll.u32 %v999_v62, 8  ;;  %v2665_v46 = vadd.s32 1, %v3863_v24  ;;  %v5530_v54 = vshrl.u32 %v1003_v16, 5 }
 0x22b   :  { %v5526_v44 = vsub.s32 %v2819_v41, %v2822_v37  ;;  %v2846_v18 = vsel %vm2761_vm14, %v2845_v14, %v2821_v60  ;;  %v1009_v48 = vshrl.u32 %v4278_v9, %v1006_v3  ;;  %v1008_v10 = vshll.u32 %v4277_v5, %v1005_v2 }
 0x22c   :  { %v1179_v21 = vxor.u32 2147483648, %v1178_v42  ;;  %v1012_v50 = vshrl.u32 %v4279_v11, %v1006_v3  ;;  %v1015_v52 = vshrl.u32 %v4280_v13, %v1006_v3  ;;  %v1011_v29 = vshll.u32 %v4278_v9, %v1005_v2 }
 0x22d   :  { %v2825_v47 = vsub.s32 0, %v5526_v44  ;;  %v1014_v35 = vshll.u32 %v4279_v11, %v1005_v2  ;;  %v1018_v0 = vshrl.u32 %v4281_v15, %v1006_v3  ;;  %v2848_v55 = vsel %vm5514_vm13, 0, %v2846_v18 }
 0x22e   :  { %v1180_v26 = vsel %vm1097_vm4, %v1179_v21, %v1178_v42  ;;  %v1010_v6 = vor.u32 %v1009_v48, %v1008_v10  ;;  %v1017_v4 = vshll.u32 %v4280_v13, %v1005_v2  ;;  %v1013_v28 = vor.u32 %v1012_v50, %v1011_v29  ;;  %v5572_v21 = vpop.f32.mrb[10].mxu1 }
 0x22f   :  { %v1183_v63 = vsel %vm5470_vm5, %v4925_v40, %v1180_v26  ;;  %v3868_v12 = vmin.u32 %v2825_v47, %v5526_v44  ;;  %v1016_v41 = vor.u32 %v1015_v52, %v1014_v35  ;;  %v1020_v45 = vshll.u32 %v4281_v15, %v1005_v2 }
 0x230   :  { %4173 = vcosq.f32 %v1183_v63  ;;  %v1019_v58 = vor.u32 %v1018_v0, %v1017_v4  ;;  %v1021_v59 = vshrl.u32 %v4282_v22, %v1006_v3  ;;  %v5553_v56 = vand.u32 8388607, %v2655_v8 }
 0x231   :  { %4175 = vsinq.f32 %v1183_v63  ;;  %v2827_v36 = vclz %v3868_v12  ;;  %vm2666_vm15 = vcmp.gt.s32.totalorder %v2665_v46, 0  ;;  %v2852_v49 = vadd.s32 3, %v2848_v55 }
 0x232   :  { %v1007_v57 = vshrl.u32 %v4277_v5, %v1006_v3  ;;  %v1022_v25 = vor.u32 %v1021_v59, %v1020_v45  ;;  %vm1023_vm0 = vcmp.lt.s32.totalorder %v5530_v54, 1  ;;  %vm1025_vm1 = vcmp.lt.s32.totalorder %v5530_v54, 3 }
 0x233   :  { %v3869_v62 = vadd.s32 4294967294, %v2827_v36  ;;  %vm1026_vm2 = vcmp.lt.s32.totalorder %v5530_v54, 4  ;;  %v1031_v53 = vsel %vm1023_vm0, %v1010_v6, %v1013_v28  ;;  %v1035_v24 = vsel %vm1023_vm0, %v1013_v28, %v1016_v41 }
 0x234   :  { %v1028_v30 = vsel %vm1026_vm2, %v1016_v41, 2102212464  ;;  %v1032_v16 = vsel %vm1026_vm2, %v1019_v58, 920167782  ;;  %v1036_v32 = vsel %vm1026_vm2, %v1022_v25, 1326507024  ;;  %v1027_v20 = vsel %vm1023_vm0, %v1007_v57, %v1010_v6 }
 0x235   :  { %vm3870_vm3 = vcmp.lt.s32.totalorder %v3869_v62, 0  ;;  %vm1024_vm4 = vcmp.lt.s32.totalorder %v5530_v54, 2  ;;  %v1033_v60 = vsel %vm1025_vm1, %v1016_v41, %v1032_v16  ;;  %v1037_v2 = vsel %vm1025_vm1, %v1019_v58, %v1036_v32 }
 0x236   :  { %v2830_v38 = vsel %vm3870_vm3, 0, %v3869_v62  ;;  %v1034_v37 = vsel %vm1024_vm4, %v1031_v53, %v1033_v60  ;;  %v1038_v14 = vsel %vm1024_vm4, %v1035_v24, %v1037_v2  ;;  %vm1187_vm5 = vweird.f32 %v4925_v40 }
 0x237   :  { %v2831_v3 = vsub.s32 32, %v2830_v38  ;;  %v2835_v42 = vsub.s32 4294967266, %v2830_v38  ;;  %v1029_v18 = vsel %vm1025_vm1, %v1013_v28, %v1028_v30  ;;  %v2667_v48 = vsel %vm2666_vm15, %v2665_v46, 0 }
 0x238   :  { %v5575_v10 = vmul.u32.u64.low %v5524_v17, %v1038_v14  ;;  %v5576_v50 = vmul.u32.u64.high %v5524_v17, %v1038_v14, %v5575_v10  ;;  %v5579_v52 = vmul.u32.u64.low %v5524_v17, %v1034_v37  ;;  %v5580_v47 = vmul.u32.u64.high %v5524_v17, %v1034_v37, %v5579_v52 }
 0x239   :  { %v2832_v29 = vshll.u32 %v5526_v44, %v2830_v38  ;;  %v2833_v35 = vshrl.u32 %v2815_v1, %v2831_v3  ;;  %v2836_v0 = vadd.s32 127, %v2835_v42  ;;  %v2669_v26 = vand.u32 31, %v2667_v48 }
 0x23a   :  { %v4174_v55 = vpop.eup %4173  ;;  %vm1190_vm6 = vcmp.lt.s32.totalorder %v5518_v19, 2  ;;  %vm1191_vm7 = vcmp.eq.s32.totalorder %v5518_v19, 0  ;;  %vm1194_vm8 = vcmp.eq.s32.totalorder %v5518_v19, 2  ;;  %v1030_v46 = vsel %vm1024_vm4, %v1027_v20, %v1029_v18 }
 0x23b   :  { %v4176_v6 = vpop.eup %4175  ;;  %v1195_v4 = vxor.u32 2147483648, %v4174_v55  ;;  %v2834_v63 = vor.u32 %v2833_v35, %v2832_v29  ;;  %v2837_v12 = vshll.u32 %v2836_v0, 23  ;;  %v2670_v28 = vsub.s32 32, %v2669_v26 }
 0x23c   :  { %v1192_v41 = vxor.u32 2147483648, %v4176_v6  ;;  %vm1048_vm9 = vc.u32 %v5576_v50, %v5579_v52  ;;  %v1049_v1 = vadd.s32 1, %v5580_v47  ;;  %v2663_v44 = vor.u32 8388608, %v5553_v56 }
 0x23d   :  { %v1196_v58 = vsel %vm1194_vm8, %v1195_v4, %v4176_v6  ;;  %v2838_v45 = vor.u32 4788187, %v2837_v12  ;;  %v5593_v59 = vand.u32 3, %v2852_v49  ;;  %v1046_v54 = vmul.u32 %v5524_v17, %v1030_v46 }
 0x23e   :  { %v1193_v36 = vsel %vm1191_vm7, %v4174_v55, %v1192_v41  ;;  %v2841_v57 = vcvt.s32.f32 %v2834_v63  ;;  %v1050_v25 = vsel %vm1048_vm9, %v1049_v1, %v5580_v47  ;;  %v5599_v62 = vshrl.u32 %v2667_v48, 5 }
 0x23f   :  { %v1197_v53 = vsel %vm1190_vm6, %v1193_v36, %v1196_v58  ;;  %v2839_v30 = vand.u32 2147483647, %v2838_v45  ;;  %v1051_v16 = vadd.s32 %v1050_v25, %v1046_v54  ;;  %v2673_v56 = vshrl.u32 %v4278_v9, %v2670_v28 }
 0x240   :  { %v1198_v49 = vsel %vm1187_vm5, nan, %v1197_v53  ;;  %v2672_v17 = vshll.u32 %v4277_v5, %v2669_v26  ;;  %v2676_v24 = vshrl.u32 %v4279_v11, %v2670_v28  ;;  %v5608_v32 = vshll.u32 %v2663_v44, 8 }
 0x241   :  { %3702 = vst [vmem:[#allocation2 + $0x38] sm:$0xff] %v1198_v49  ;;  %v2842_v60 = vmul.f32 %v2841_v57, %v2839_v30  ;;  %vm993_vm10 = vcmp.lt.s32.totalorder %v5051_v7, 0  ;;  %v1052_v2 = vadd.s32 536870912, %v1051_v16  ;;  %v2675_v19 = vshll.u32 %v4278_v9, %v2669_v26 }
 0x242   :  { %v2679_v38 = vshrl.u32 %v4280_v13, %v2670_v28  ;;  %v2678_v20 = vshll.u32 %v4279_v11, %v2669_v26  ;;  %v2681_v40 = vshll.u32 %v4280_v13, %v2669_v26  ;;  %v2682_v37 = vshrl.u32 %v4281_v15, %v2670_v28 }
 0x243   :  { %v2685_v14 = vshrl.u32 %v4282_v22, %v2670_v28  ;;  %v2843_v3 = vxor.u32 2147483648, %v2842_v60  ;;  %v1053_v42 = vshrl.u32 %v1052_v2, 30  ;;  %v2674_v18 = vor.u32 %v2673_v56, %v2672_v17 }
 0x244   :  { %v2677_v48 = vor.u32 %v2676_v24, %v2675_v19  ;;  %v2680_v10 = vor.u32 %v2679_v38, %v2678_v20  ;;  %v2683_v47 = vor.u32 %v2682_v37, %v2681_v40  ;;  %v2684_v29 = vshll.u32 %v4281_v15, %v2669_v26  ;;  %v5652_v19 = vpop.f32.mrb[11].mxu0 }
 0x245   :  { %v1303_v35 = vand.u32 2147483647, %v5208_v27  ;;  %v2844_v0 = vsel %vm2761_vm14, %v2843_v3, %v2842_v60  ;;  %v1054_v55 = vshll.u32 %v1053_v42, 30  ;;  %v2671_v46 = vshrl.u32 %v4277_v5, %v2670_v28 }
 0x246   :  { %v1306_v6 = vand.u32 2139095040, %v5208_v27  ;;  %v2847_v4 = vsel %vm5514_vm13, %v4977_v33, %v2844_v0  ;;  %v1077_v63 = vsub.s32 4, %v1053_v42  ;;  %v2686_v12 = vor.u32 %v2685_v14, %v2684_v29 }
 0x247   :  { %vm2687_vm12 = vcmp.lt.s32.totalorder %v5599_v62, 1  ;;  %4177 = vcosq.f32 %v2847_v4  ;;  %v5627_v26 = vsub.s32 %v1051_v16, %v1054_v55  ;;  %vm2690_vm11 = vcmp.lt.s32.totalorder %v5599_v62, 4 }
 0x248   :  { %v2695_v41 = vsel %vm2687_vm12, %v2674_v18, %v2677_v48  ;;  %4179 = vsinq.f32 %v2847_v4  ;;  %vm2689_vm14 = vcmp.lt.s32.totalorder %v5599_v62, 3  ;;  %v2692_v28 = vsel %vm2690_vm11, %v2680_v10, 2102212464 }
 0x249   :  { %v2696_v1 = vsel %vm2690_vm11, %v2683_v47, 920167782  ;;  %v1057_v44 = vsub.s32 0, %v5627_v26  ;;  %vm2688_vm15 = vcmp.lt.s32.totalorder %v5599_v62, 2  ;;  %v2699_v58 = vsel %vm2687_vm12, %v2677_v48, %v2680_v10 }
 0x24a   :  { %v2697_v39 = vsel %vm2689_vm14, %v2680_v10, %v2696_v1  ;;  %v1078_v45 = vsel %vm993_vm10, %v1077_v63, %v1053_v42  ;;  %v2691_v54 = vsel %vm2687_vm12, %v2671_v46, %v2674_v18  ;;  %v2700_v57 = vsel %vm2690_vm11, %v2686_v12, 1326507024 }
 0x24b   :  { %v2698_v36 = vsel %vm2688_vm15, %v2695_v41, %v2697_v39  ;;  %v3800_v25 = vmin.u32 %v1057_v44, %v5627_v26  ;;  %v2693_v53 = vsel %vm2689_vm14, %v2677_v48, %v2692_v28  ;;  %v2701_v30 = vsel %vm2689_vm14, %v2683_v47, %v2700_v57 }
 0x24c   :  { %v1307_v16 = vshrl.u32 %v1306_v6, 23  ;;  %vm5640_vm13 = vcmp.le.f32.partialorder %v991_v23, 0.7853982  ;;  %v2702_v49 = vsel %vm2688_vm15, %v2699_v58, %v2701_v30  ;;  %v2694_v38 = vsel %vm2688_vm15, %v2691_v54, %v2693_v53 }
 0x24d   :  { %v5647_v17 = vmul.u32.u64.low %v5608_v32, %v2698_v36  ;;  %v5648_v24 = vmul.u32.u64.high %v5608_v32, %v2698_v36, %v5647_v17  ;;  %v1059_v60 = vclz %v3800_v25  ;;  %v1080_v2 = vsel %vm5640_vm13, 0, %v1078_v45 }
 0x24e   :  { %v5657_v23 = vmul.u32.u64.low %v5608_v32, %v2702_v49  ;;  %v5658_v20 = vmul.u32.u64.high %v5608_v32, %v2702_v49, %v5657_v23  ;;  %v3811_v40 = vadd.s32 4294967169, %v1307_v16  ;;  %vm2851_vm0 = vweird.f32 %v4977_v33 }
 0x24f   :  { %vm2854_vm1 = vcmp.lt.s32.totalorder %v5593_v59, 2  ;;  %v3801_v37 = vadd.s32 4294967294, %v1059_v60  ;;  %v1310_v14 = vand.u32 8388607, %v1303_v35  ;;  %vm2855_vm2 = vcmp.eq.s32.totalorder %v5593_v59, 0 }
 0x250   :  { %vm2858_vm3 = vcmp.eq.s32.totalorder %v5593_v59, 2  ;;  %v2713_v62 = vadd.s32 1, %v5648_v24  ;;  %v1313_v3 = vadd.s32 1, %v3811_v40  ;;  %v1047_v18 = vadd.s32 %v5579_v52, %v5576_v50 }
 0x251   :  { %v4178_v42 = vpop.eup %4177  ;;  %vm3802_vm4 = vcmp.lt.s32.totalorder %v3801_v37, 0  ;;  %v1084_v48 = vadd.s32 3, %v1080_v2  ;;  %v2710_v10 = vmul.u32 %v5608_v32, %v2694_v38  ;;  %vm2712_vm5 = vc.u32 %v5658_v20, %v5647_v17 }
 0x252   :  { %v4180_v47 = vpop.eup %4179  ;;  %v2859_v29 = vxor.u32 2147483648, %v4178_v42  ;;  %v1062_v0 = vsel %vm3802_vm4, 0, %v3801_v37  ;;  %v2970_v55 = vand.u32 2139095040, %v5268_v51  ;;  %v1311_v63 = vor.u32 8388608, %v1310_v14 }
 0x253   :  { %v2856_v46 = vxor.u32 2147483648, %v4180_v47  ;;  %v1063_v6 = vsub.s32 32, %v1062_v0  ;;  %v1067_v4 = vsub.s32 4294967266, %v1062_v0  ;;  %v1064_v50 = vshll.u32 %v5627_v26, %v1062_v0 }
 0x254   :  { %v2860_v12 = vsel %vm2858_vm3, %v2859_v29, %v4180_v47  ;;  %v2714_v52 = vsel %vm2712_vm5, %v2713_v62, %v5648_v24  ;;  %vm1314_vm6 = vcmp.gt.s32.totalorder %v1313_v3, 0  ;;  %v2967_v58 = vand.u32 2147483647, %v5268_v51 }
 0x255   :  { %v2857_v32 = vsel %vm2855_vm2, %v4178_v42, %v2856_v46  ;;  %v1065_v41 = vshrl.u32 %v1047_v18, %v1063_v6  ;;  %v1068_v28 = vadd.s32 127, %v1067_v4  ;;  %v2715_v1 = vadd.s32 %v2714_v52, %v2710_v10 }
 0x256   :  { %v2861_v44 = vsel %vm2854_vm1, %v2857_v32, %v2860_v12  ;;  %v1315_v39 = vsel %vm1314_vm6, %v1313_v3, 0  ;;  %v2971_v45 = vshrl.u32 %v2970_v55, 23  ;;  %v5683_v30 = vand.u32 3, %v1084_v48 }
 0x257   :  { %v2862_v54 = vsel %vm2851_vm0, nan, %v2861_v44  ;;  %v1066_v26 = vor.u32 %v1065_v41, %v1064_v50  ;;  %v1069_v36 = vshll.u32 %v1068_v28, 23  ;;  %v2716_v57 = vadd.s32 536870912, %v2715_v1 }
 0x258   :  { %3718 = vst [vmem:[#allocation2 + $0xb8] sm:$0xff] %v2862_v54  ;;  %v1317_v25 = vand.u32 31, %v1315_v39  ;;  %vm2657_vm7 = vcmp.lt.s32.totalorder %v5148_v34, 0  ;;  %v5686_v49 = vshll.u32 %v1311_v63, 8  ;;  %v3875_v24 = vadd.s32 4294967169, %v2971_v45 }
 0x259   :  { %v1070_v53 = vor.u32 4788187, %v1069_v36  ;;  %v2717_v16 = vshrl.u32 %v2716_v57, 30  ;;  %v5690_v60 = vand.u32 8388607, %v2967_v58  ;;  %v1073_v2 = vcvt.s32.f32 %v1066_v26 }
 0x25a   :  { %v1318_v59 = vsub.s32 32, %v1317_v25  ;;  %v5693_v38 = vadd.s32 %v5647_v17, %v5658_v20  ;;  %v1316_v40 = vshrl.u32 %v1315_v39, 5  ;;  %v1320_v18 = vshll.u32 %v4277_v5, %v1317_v25 }
 0x25b   :  { %v1071_v33 = vand.u32 2147483647, %v1070_v53  ;;  %v2718_v23 = vshll.u32 %v2717_v16, 30  ;;  %vm5704_vm8 = vcmp.le.f32.partialorder %v2655_v8, 0.7853982  ;;  %v2741_v20 = vsub.s32 4, %v2717_v16 }
 0x25c   :  { %v1321_v37 = vshrl.u32 %v4278_v9, %v1318_v59  ;;  %v1324_v14 = vshrl.u32 %v4279_v11, %v1318_v59  ;;  %v1327_v62 = vshrl.u32 %v4280_v13, %v1318_v59  ;;  %v1330_v48 = vshrl.u32 %v4281_v15, %v1318_v59 }
 0x25d   :  { %v1074_v3 = vmul.f32 %v1073_v2, %v1071_v33  ;;  %v5698_v42 = vsub.s32 %v2715_v1, %v2718_v23  ;;  %v1323_v10 = vshll.u32 %v4278_v9, %v1317_v25  ;;  %v1326_v47 = vshll.u32 %v4279_v11, %v1317_v25 }
 0x25e   :  { %v2977_v29 = vadd.s32 1, %v3875_v24  ;;  %v1322_v46 = vor.u32 %v1321_v37, %v1320_v18  ;;  %v1329_v6 = vshll.u32 %v4280_v13, %v1317_v25  ;;  %v1332_v12 = vshll.u32 %v4281_v15, %v1317_v25 }
 0x25f   :  { %v1075_v0 = vxor.u32 2147483648, %v1074_v3  ;;  %v2721_v55 = vsub.s32 0, %v5698_v42  ;;  %v1325_v4 = vor.u32 %v1324_v14, %v1323_v10  ;;  %v1328_v63 = vor.u32 %v1327_v62, %v1326_v47  ;;  %v5733_v62 = vpop.f32.mrb[11].mxu1 }
 0x260   :  { %v1333_v8 = vshrl.u32 %v4282_v22, %v1318_v59  ;;  %v1319_v32 = vshrl.u32 %v4277_v5, %v1318_v59  ;;  %v1331_v41 = vor.u32 %v1330_v48, %v1329_v6  ;;  %v2742_v1 = vsel %vm2657_vm7, %v2741_v20, %v2717_v16 }
 0x261   :  { %v1076_v50 = vsel %vm993_vm10, %v1075_v0, %v1074_v3  ;;  %v3864_v52 = vmin.u32 %v2721_v55, %v5698_v42  ;;  %vm1335_vm9 = vcmp.lt.s32.totalorder %v1316_v40, 1  ;;  %vm1336_vm12 = vcmp.lt.s32.totalorder %v1316_v40, 2 }
 0x262   :  { %v1079_v28 = vsel %vm5640_vm13, %v5051_v7, %v1076_v50  ;;  %v1334_v44 = vor.u32 %v1333_v8, %v1332_v12  ;;  %vm1338_vm11 = vcmp.lt.s32.totalorder %v1316_v40, 4  ;;  %vm1337_vm10 = vcmp.lt.s32.totalorder %v1316_v40, 3 }
 0x263   :  { %4181 = vcosq.f32 %v1079_v28  ;;  %v2723_v39 = vclz %v3864_v52  ;;  %v1340_v45 = vsel %vm1338_vm11, %v1328_v63, 2102212464  ;;  %v1343_v54 = vsel %vm1335_vm9, %v1322_v46, %v1325_v4 }
 0x264   :  { %4183 = vsinq.f32 %v1079_v28  ;;  %v1339_v36 = vsel %vm1335_vm9, %v1319_v32, %v1322_v46  ;;  %v1344_v57 = vsel %vm1338_vm11, %v1331_v41, 920167782  ;;  %v1347_v25 = vsel %vm1335_vm9, %v1325_v4, %v1328_v63 }
 0x265   :  { %v3865_v26 = vadd.s32 4294967294, %v2723_v39  ;;  %v1341_v53 = vsel %vm1337_vm10, %v1325_v4, %v1340_v45  ;;  %v1345_v56 = vsel %vm1337_vm10, %v1328_v63, %v1344_v57  ;;  %v1348_v59 = vsel %vm1338_vm11, %v1334_v44, 1326507024 }
 0x266   :  { %vm2978_vm14 = vcmp.gt.s32.totalorder %v2977_v29, 0  ;;  %v2744_v16 = vsel %vm5704_vm8, 0, %v2742_v1  ;;  %v1346_v24 = vsel %vm1336_vm12, %v1343_v54, %v1345_v56  ;;  %v1349_v33 = vsel %vm1337_vm10, %v1331_v41, %v1348_v59 }
 0x267   :  { %vm3866_vm15 = vcmp.lt.s32.totalorder %v3865_v26, 0  ;;  %vm1087_vm13 = vcmp.eq.s32.totalorder %v5683_v30, 0  ;;  %v1350_v23 = vsel %vm1336_vm12, %v1347_v25, %v1349_v33  ;;  %vm1086_vm0 = vcmp.lt.s32.totalorder %v5683_v30, 2 }
 0x268   :  { %v2726_v2 = vsel %vm3866_vm15, 0, %v3865_v26  ;;  %v5729_v37 = vmul.u32.u64.low %v5686_v49, %v1346_v24  ;;  %v5730_v14 = vmul.u32.u64.high %v5686_v49, %v1346_v24, %v5729_v37  ;;  %v1342_v48 = vsel %vm1336_vm12, %v1339_v36, %v1341_v53 }
 0x269   :  { %v2727_v3 = vsub.s32 32, %v2726_v2  ;;  %v2731_v18 = vsub.s32 4294967266, %v2726_v2  ;;  %v2979_v20 = vsel %vm2978_vm14, %v2977_v29, 0  ;;  %vm1083_vm1 = vweird.f32 %v5051_v7 }
 0x26a   :  { %vm1090_vm2 = vcmp.eq.s32.totalorder %v5683_v30, 2  ;;  %v5740_v10 = vmul.u32.u64.low %v5686_v49, %v1350_v23  ;;  %v5741_v47 = vmul.u32.u64.high %v5686_v49, %v1350_v23, %v5740_v10  ;;  %v2981_v0 = vand.u32 31, %v2979_v20 }
 0x26b   :  { %v2728_v55 = vshll.u32 %v5698_v42, %v2726_v2  ;;  %v2729_v46 = vshrl.u32 %v5693_v38, %v2727_v3  ;;  %v2732_v6 = vadd.s32 127, %v2731_v18  ;;  %v2975_v4 = vor.u32 8388608, %v5690_v60 }
 0x26c   :  { %v2748_v63 = vadd.s32 3, %v2744_v16  ;;  %v1358_v40 = vmul.u32 %v5686_v49, %v1342_v48  ;;  %v1361_v29 = vadd.s32 1, %v5730_v14  ;;  %v2982_v12 = vsub.s32 32, %v2981_v0 }
 0x26d   :  { %v4182_v8 = vpop.eup %4181  ;;  %v2730_v50 = vor.u32 %v2729_v46, %v2728_v55  ;;  %v2733_v52 = vshll.u32 %v2732_v6, 23  ;;  %v5748_v32 = vshrl.u32 %v2979_v20, 5  ;;  %v2984_v41 = vshll.u32 %v4277_v5, %v2981_v0 }
 0x26e   :  { %v4184_v28 = vpop.eup %4183  ;;  %v1091_v42 = vxor.u32 2147483648, %v4182_v8  ;;  %vm1360_vm3 = vc.u32 %v5741_v47, %v5729_v37  ;;  %v2987_v60 = vshll.u32 %v4278_v9, %v2981_v0  ;;  %v2993_v38 = vshll.u32 %v4280_v13, %v2981_v0 }
 0x26f   :  { %v1088_v49 = vxor.u32 2147483648, %v4184_v28  ;;  %v2734_v1 = vor.u32 4788187, %v2733_v52  ;;  %v2737_v44 = vcvt.s32.f32 %v2730_v50  ;;  %v1362_v39 = vsel %vm1360_vm3, %v1361_v29, %v5730_v14 }
 0x270   :  { %v1092_v45 = vsel %vm1090_vm2, %v1091_v42, %v4184_v28  ;;  %v1363_v54 = vadd.s32 %v1362_v39, %v1358_v40  ;;  %v2985_v26 = vshrl.u32 %v4278_v9, %v2982_v12  ;;  %v2988_v36 = vshrl.u32 %v4279_v11, %v2982_v12 }
 0x271   :  { %v1089_v57 = vsel %vm1087_vm13, %v4182_v8, %v1088_v49  ;;  %v2735_v25 = vand.u32 2147483647, %v2734_v1  ;;  %vm1305_vm4 = vcmp.lt.s32.totalorder %v5208_v27, 0  ;;  %v2991_v53 = vshrl.u32 %v4280_v13, %v2982_v12 }
 0x272   :  { %v2994_v56 = vshrl.u32 %v4281_v15, %v2982_v12  ;;  %v1093_v59 = vsel %vm1086_vm0, %v1089_v57, %v1092_v45  ;;  %v1364_v16 = vadd.s32 536870912, %v1363_v54  ;;  %v2986_v24 = vor.u32 %v2985_v26, %v2984_v41 }
 0x273   :  { %v2990_v33 = vshll.u32 %v4279_v11, %v2981_v0  ;;  %v1094_v2 = vsel %vm1083_vm1, nan, %v1093_v59  ;;  %v2738_v23 = vmul.f32 %v2737_v44, %v2735_v25  ;;  %v2989_v14 = vor.u32 %v2988_v36, %v2987_v60 }
 0x274   :  { %v2995_v3 = vor.u32 %v2994_v56, %v2993_v38  ;;  %3701 = vst [vmem:[#allocation2 + $0x30] sm:$0xff] %v1094_v2  ;;  %v1365_v18 = vshrl.u32 %v1364_v16, 30  ;;  %v2997_v48 = vshrl.u32 %v4282_v22, %v2982_v12  ;;  %v5771_v20 = vshll.u32 %v2975_v4, 8  ;;  %v5833_v2 = vpop.f32.mrb[12].mxu0 }
 0x275   :  { %v1199_v10 = vand.u32 2147483647, %v5333_v61  ;;  %v2739_v30 = vxor.u32 2147483648, %v2738_v23  ;;  %v5774_v55 = vand.u32 3, %v2748_v63  ;;  %v2992_v46 = vor.u32 %v2991_v53, %v2990_v33 }
 0x276   :  { %v2996_v6 = vshll.u32 %v4281_v15, %v2981_v0  ;;  %v1366_v40 = vshll.u32 %v1365_v18, 30  ;;  %v1389_v7 = vsub.s32 4, %v1365_v18  ;;  %vm2999_vm5 = vcmp.lt.s32.totalorder %v5748_v32, 1 }
 0x277   :  { %vm3002_vm6 = vcmp.lt.s32.totalorder %v5748_v32, 4  ;;  %v2740_v29 = vsel %vm2657_vm7, %v2739_v30, %v2738_v23  ;;  %v3007_v4 = vsel %vm2999_vm5, %v2986_v24, %v2989_v14  ;;  %v2983_v52 = vshrl.u32 %v4277_v5, %v2982_v12 }
 0x278   :  { %v2998_v8 = vor.u32 %v2997_v48, %v2996_v6  ;;  %v3008_v63 = vsel %vm3002_vm6, %v2995_v3, 920167782  ;;  %v2743_v0 = vsel %vm5704_vm8, %v5148_v34, %v2740_v29  ;;  %v5788_v50 = vsub.s32 %v1363_v54, %v1366_v40 }
 0x279   :  { %vm3001_vm9 = vcmp.lt.s32.totalorder %v5748_v32, 3  ;;  %4185 = vcosq.f32 %v2743_v0  ;;  %vm3000_vm7 = vcmp.lt.s32.totalorder %v5748_v32, 2  ;;  %v3004_v41 = vsel %vm3002_vm6, %v2992_v46, 2102212464 }
 0x27a   :  { %v3009_v28 = vsel %vm3001_vm9, %v2992_v46, %v3008_v63  ;;  %4187 = vsinq.f32 %v2743_v0  ;;  %v1369_v42 = vsub.s32 0, %v5788_v50  ;;  %v1390_v17 = vsel %vm1305_vm4, %v1389_v7, %v1365_v18 }
 0x27b   :  { %v3010_v60 = vsel %vm3000_vm7, %v3007_v4, %v3009_v28  ;;  %v3011_v12 = vsel %vm2999_vm5, %v2989_v14, %v2992_v46  ;;  %v3012_v38 = vsel %vm3002_vm6, %v2998_v8, 1326507024  ;;  %v3003_v39 = vsel %vm2999_vm5, %v2983_v52, %v2986_v24 }
 0x27c   :  { %v5805_v49 = vmul.u32.u64.low %v5771_v20, %v3010_v60  ;;  %v5806_v1 = vmul.u32.u64.high %v5771_v20, %v3010_v60, %v5805_v49  ;;  %v3812_v44 = vmin.u32 %v1369_v42, %v5788_v50  ;;  %v3005_v45 = vsel %vm3001_vm9, %v2989_v14, %v3004_v41 }
 0x27d   :  { %v3013_v54 = vsel %vm3001_vm9, %v2995_v3, %v3012_v38  ;;  %vm5814_vm8 = vcmp.le.f32.partialorder %v1303_v35, 0.7853982  ;;  %v1202_v57 = vand.u32 2139095040, %v5333_v61  ;;  %v3006_v56 = vsel %vm3000_vm7, %v3003_v39, %v3005_v45 }
 0x27e   :  { %v3014_v36 = vsel %vm3000_vm7, %v3011_v12, %v3013_v54  ;;  %v1371_v25 = vclz %v3812_v44  ;;  %v1392_v53 = vsel %vm5814_vm8, 0, %v1390_v17  ;;  %vm2747_vm12 = vweird.f32 %v5148_v34 }
 0x27f   :  { %v5826_v59 = vmul.u32.u64.low %v5771_v20, %v3014_v36  ;;  %v5827_v16 = vmul.u32.u64.high %v5771_v20, %v3014_v36, %v5826_v59  ;;  %v1203_v35 = vshrl.u32 %v1202_v57, 23  ;;  %vm2750_vm11 = vcmp.lt.s32.totalorder %v5774_v55, 2 }
 0x280   :  { %v3813_v24 = vadd.s32 4294967294, %v1371_v25  ;;  %v1206_v33 = vand.u32 8388607, %v1199_v10  ;;  %vm2751_vm10 = vcmp.eq.s32.totalorder %v5774_v55, 0  ;;  %vm2754_vm14 = vcmp.eq.s32.totalorder %v5774_v55, 2 }
 0x281   :  { %v3025_v32 = vadd.s32 1, %v5806_v1  ;;  %v3807_v23 = vadd.s32 4294967169, %v1203_v35  ;;  %v1359_v14 = vadd.s32 %v5729_v37, %v5741_v47  ;;  %v1396_v3 = vadd.s32 3, %v1392_v53 }
 0x282   :  { %vm3814_vm15 = vcmp.lt.s32.totalorder %v3813_v24, 0  ;;  %v3022_v18 = vmul.u32 %v5771_v20, %v3006_v56  ;;  %vm3024_vm13 = vc.u32 %v5827_v16, %v5805_v49  ;;  %v2866_v6 = vand.u32 2139095040, %v5418_v31 }
 0x283   :  { %v4186_v48 = vpop.eup %4185  ;;  %v1374_v30 = vsel %vm3814_vm15, 0, %v3813_v24  ;;  %v1209_v46 = vadd.s32 1, %v3807_v23  ;;  %v1207_v4 = vor.u32 8388608, %v1206_v33  ;;  %v3026_v47 = vsel %vm3024_vm13, %v3025_v32, %v5806_v1 }
 0x284   :  { %v4188_v40 = vpop.eup %4187  ;;  %v2755_v7 = vxor.u32 2147483648, %v4186_v48  ;;  %v1375_v29 = vsub.s32 32, %v1374_v30  ;;  %v1379_v8 = vsub.s32 4294967266, %v1374_v30  ;;  %v1376_v37 = vshll.u32 %v5788_v50, %v1374_v30 }
 0x285   :  { %v2752_v63 = vxor.u32 2147483648, %v4188_v40  ;;  %vm1210_vm0 = vcmp.gt.s32.totalorder %v1209_v46, 0  ;;  %v3027_v41 = vadd.s32 %v3026_v47, %v3022_v18  ;;  %v2863_v17 = vand.u32 2147483647, %v5418_v31 }
 0x286   :  { %v2756_v20 = vsel %vm2754_vm14, %v2755_v7, %v4188_v40  ;;  %v1377_v0 = vshrl.u32 %v1359_v14, %v1375_v29  ;;  %v1380_v52 = vadd.s32 127, %v1379_v8  ;;  %v1211_v42 = vsel %vm1210_vm0, %v1209_v46, 0 }
 0x287   :  { %v2753_v28 = vsel %vm2751_vm10, %v4186_v48, %v2752_v63  ;;  %v2867_v60 = vshrl.u32 %v2866_v6, 23  ;;  %v3028_v1 = vadd.s32 536870912, %v3027_v41  ;;  %v1213_v39 = vand.u32 31, %v1211_v42 }
 0x288   :  { %v2757_v12 = vsel %vm2750_vm11, %v2753_v28, %v2756_v20  ;;  %v1378_v50 = vor.u32 %v1377_v0, %v1376_v37  ;;  %v1381_v38 = vshll.u32 %v1380_v52, 23  ;;  %v5855_v54 = vand.u32 3, %v1396_v3 }
 0x289   :  { %v2758_v44 = vsel %vm2747_vm12, nan, %v2757_v12  ;;  %vm2969_vm1 = vcmp.lt.s32.totalorder %v5268_v51, 0  ;;  %v3029_v36 = vshrl.u32 %v3028_v1, 30  ;;  %v1214_v57 = vsub.s32 32, %v1213_v39 }
 0x28a   :  { %3717 = vst [vmem:[#allocation2 + $0xb0] sm:$0xff] %v2758_v44  ;;  %v1382_v45 = vor.u32 4788187, %v1381_v38  ;;  %v5858_v25 = vshll.u32 %v1207_v4, 8  ;;  %v3871_v53 = vadd.s32 4294967169, %v2867_v60  ;;  %v1385_v59 = vcvt.s32.f32 %v1378_v50 }
 0x28b   :  { %v5862_v55 = vand.u32 8388607, %v2863_v17  ;;  %v5866_v34 = vadd.s32 %v5805_v49, %v5827_v16  ;;  %v3030_v35 = vshll.u32 %v3029_v36, 30  ;;  %v1212_v24 = vshrl.u32 %v1211_v42, 5 }
 0x28c   :  { %v1383_v56 = vand.u32 2147483647, %v1382_v45  ;;  %v1217_v33 = vshrl.u32 %v4278_v9, %v1214_v57  ;;  %v1220_v32 = vshrl.u32 %v4279_v11, %v1214_v57  ;;  %v1223_v23 = vshrl.u32 %v4280_v13, %v1214_v57 }
 0x28d   :  { %v5871_v3 = vsub.s32 %v3027_v41, %v3030_v35  ;;  %v1216_v18 = vshll.u32 %v4277_v5, %v1213_v39  ;;  %v1226_v48 = vshrl.u32 %v4281_v15, %v1214_v57  ;;  %vm5877_vm2 = vcmp.le.f32.partialorder %v2967_v58, 0.7853982 }
 0x28e   :  { %v1386_v14 = vmul.f32 %v1385_v59, %v1383_v56  ;;  %v3053_v16 = vsub.s32 4, %v3029_v36  ;;  %v1219_v30 = vshll.u32 %v4278_v9, %v1213_v39  ;;  %v1222_v46 = vshll.u32 %v4279_v11, %v1213_v39 }
 0x28f   :  { %v2873_v6 = vadd.s32 1, %v3871_v53  ;;  %v3033_v7 = vsub.s32 0, %v5871_v3  ;;  %v1218_v29 = vor.u32 %v1217_v33, %v1216_v18  ;;  %v1225_v8 = vshll.u32 %v4280_v13, %v1213_v39 }
 0x290   :  { %v1387_v40 = vxor.u32 2147483648, %v1386_v14  ;;  %v1221_v4 = vor.u32 %v1220_v32, %v1219_v30  ;;  %v1224_v63 = vor.u32 %v1223_v23, %v1222_v46  ;;  %v1228_v37 = vshll.u32 %v4281_v15, %v1213_v39  ;;  %v5906_v23 = vpop.f32.mrb[12].mxu1 }
 0x291   :  { %v1229_v58 = vshrl.u32 %v4282_v22, %v1214_v57  ;;  %v3876_v20 = vmin.u32 %v3033_v7, %v5871_v3  ;;  %v1215_v0 = vshrl.u32 %v4277_v5, %v1214_v57  ;;  %v1227_v52 = vor.u32 %v1226_v48, %v1225_v8 }
 0x292   :  { %v1388_v47 = vsel %vm1305_vm4, %v1387_v40, %v1386_v14  ;;  %v3054_v28 = vsel %vm2969_vm1, %v3053_v16, %v3029_v36  ;;  %vm1231_vm3 = vcmp.lt.s32.totalorder %v1212_v24, 1  ;;  %vm1232_vm5 = vcmp.lt.s32.totalorder %v1212_v24, 2 }
 0x293   :  { %v1391_v41 = vsel %vm5814_vm8, %v5208_v27, %v1388_v47  ;;  %v1230_v42 = vor.u32 %v1229_v58, %v1228_v37  ;;  %v3035_v60 = vclz %v3876_v20  ;;  %vm1234_vm6 = vcmp.lt.s32.totalorder %v1212_v24, 4 }
 0x294   :  { %4189 = vcosq.f32 %v1391_v41  ;;  %vm1233_vm4 = vcmp.lt.s32.totalorder %v1212_v24, 3  ;;  %v1236_v12 = vsel %vm1234_vm6, %v1224_v63, 2102212464  ;;  %v1239_v50 = vsel %vm1231_vm3, %v1218_v29, %v1221_v4 }
 0x295   :  { %4191 = vsinq.f32 %v1391_v41  ;;  %v3877_v38 = vadd.s32 4294967294, %v3035_v60  ;;  %v1235_v1 = vsel %vm1231_vm3, %v1215_v0, %v1218_v29  ;;  %v1240_v44 = vsel %vm1234_vm6, %v1227_v52, 920167782 }
 0x296   :  { %v1243_v39 = vsel %vm1231_vm3, %v1221_v4, %v1224_v63  ;;  %v1237_v45 = vsel %vm1233_vm4, %v1221_v4, %v1236_v12  ;;  %v1241_v26 = vsel %vm1233_vm4, %v1224_v63, %v1240_v44  ;;  %v1244_v57 = vsel %vm1234_vm6, %v1230_v42, 1326507024 }
 0x297   :  { %vm2874_vm9 = vcmp.gt.s32.totalorder %v2873_v6, 0  ;;  %vm3878_vm7 = vcmp.lt.s32.totalorder %v3877_v38, 0  ;;  %v3056_v36 = vsel %vm5877_vm2, 0, %v3054_v28  ;;  %v1242_v53 = vsel %vm1232_vm5, %v1239_v50, %v1241_v26 }
 0x298   :  { %v1245_v56 = vsel %vm1233_vm4, %v1227_v52, %v1244_v57  ;;  %vm1399_vm8 = vcmp.eq.s32.totalorder %v5855_v54, 0  ;;  %v3038_v59 = vsel %vm3878_vm7, 0, %v3877_v38  ;;  %vm1398_vm12 = vcmp.lt.s32.totalorder %v5855_v54, 2 }
 0x299   :  { %v1246_v35 = vsel %vm1232_vm5, %v1243_v39, %v1245_v56  ;;  %v5902_v33 = vmul.u32.u64.low %v5858_v25, %v1242_v53  ;;  %v5903_v32 = vmul.u32.u64.high %v5858_v25, %v1242_v53, %v5902_v33  ;;  %v3039_v14 = vsub.s32 32, %v3038_v59 }
 0x29a   :  { %v3043_v18 = vsub.s32 4294967266, %v3038_v59  ;;  %v1238_v48 = vsel %vm1232_vm5, %v1235_v1, %v1237_v45  ;;  %v2875_v16 = vsel %vm2874_vm9, %v2873_v6, 0  ;;  %vm1395_vm11 = vweird.f32 %v5208_v27 }
 0x29b   :  { %vm1402_vm10 = vcmp.eq.s32.totalorder %v5855_v54, 2  ;;  %v5913_v30 = vmul.u32.u64.low %v5858_v25, %v1246_v35  ;;  %v5914_v46 = vmul.u32.u64.high %v5858_v25, %v1246_v35, %v5913_v30  ;;  %v2877_v40 = vand.u32 31, %v2875_v16 }
 0x29c   :  { %v3040_v7 = vshll.u32 %v5871_v3, %v3038_v59  ;;  %v3041_v29 = vshrl.u32 %v5866_v34, %v3039_v14  ;;  %v3044_v8 = vadd.s32 127, %v3043_v18  ;;  %v2871_v4 = vor.u32 8388608, %v5862_v55 }
 0x29d   :  { %v3060_v63 = vadd.s32 3, %v3056_v36  ;;  %v1254_v24 = vmul.u32 %v5858_v25, %v1238_v48  ;;  %v1257_v6 = vadd.s32 1, %v5903_v32  ;;  %v2878_v37 = vsub.s32 32, %v2877_v40 }
 0x29e   :  { %v4190_v58 = vpop.eup %4189  ;;  %v3042_v47 = vor.u32 %v3041_v29, %v3040_v7  ;;  %v3045_v20 = vshll.u32 %v3044_v8, 23  ;;  %v5921_v0 = vshrl.u32 %v2875_v16, 5  ;;  %v2880_v52 = vshll.u32 %v4277_v5, %v2877_v40 }
 0x29f   :  { %v4192_v41 = vpop.eup %4191  ;;  %v1403_v3 = vxor.u32 2147483648, %v4190_v58  ;;  %vm1256_vm14 = vc.u32 %v5914_v46, %v5902_v33  ;;  %v2883_v55 = vshll.u32 %v4278_v9, %v2877_v40  ;;  %v2889_v34 = vshll.u32 %v4280_v13, %v2877_v40 }
 0x2a0   :  { %v1400_v25 = vxor.u32 2147483648, %v4192_v41  ;;  %v3046_v28 = vor.u32 4788187, %v3045_v20  ;;  %v3049_v42 = vcvt.s32.f32 %v3042_v47  ;;  %v1258_v60 = vsel %vm1256_vm14, %v1257_v6, %v5903_v32 }
 0x2a1   :  { %v1404_v12 = vsel %vm1402_vm10, %v1403_v3, %v4192_v41  ;;  %v1259_v50 = vadd.s32 %v1258_v60, %v1254_v24  ;;  %v2881_v38 = vshrl.u32 %v4278_v9, %v2878_v37  ;;  %v2884_v1 = vshrl.u32 %v4279_v11, %v2878_v37 }
 0x2a2   :  { %v1401_v44 = vsel %vm1399_vm8, %v4190_v58, %v1400_v25  ;;  %v3047_v39 = vand.u32 2147483647, %v3046_v28  ;;  %vm1201_vm15 = vcmp.lt.s32.totalorder %v5333_v61, 0  ;;  %v2887_v45 = vshrl.u32 %v4280_v13, %v2878_v37 }
 0x2a3   :  { %v2890_v26 = vshrl.u32 %v4281_v15, %v2878_v37  ;;  %v1405_v57 = vsel %vm1398_vm12, %v1401_v44, %v1404_v12  ;;  %v1260_v36 = vadd.s32 536870912, %v1259_v50  ;;  %v2882_v53 = vor.u32 %v2881_v38, %v2880_v52 }
 0x2a4   :  { %v2886_v56 = vshll.u32 %v4279_v11, %v2877_v40  ;;  %v1406_v59 = vsel %vm1395_vm11, nan, %v1405_v57  ;;  %v3050_v35 = vmul.f32 %v3049_v42, %v3047_v39  ;;  %v2885_v32 = vor.u32 %v2884_v1, %v2883_v55 }
 0x2a5   :  { %v2891_v14 = vor.u32 %v2890_v26, %v2889_v34  ;;  %3704 = vst [vmem:[#allocation2 + $0x48] sm:$0xff] %v1406_v59  ;;  %v1261_v18 = vshrl.u32 %v1260_v36, 30  ;;  %v2893_v48 = vshrl.u32 %v4282_v22, %v2878_v37  ;;  %v5944_v16 = vshll.u32 %v2871_v4, 8  ;;  %v5996_v26 = vpop.f32.mrb[13].mxu0 }
 0x2a6   :  { %v1511_v30 = vand.u32 2147483647, %v5493_v43  ;;  %v3051_v54 = vxor.u32 2147483648, %v3050_v35  ;;  %v5947_v7 = vand.u32 3, %v3060_v63  ;;  %v2888_v29 = vor.u32 %v2887_v45, %v2886_v56 }
 0x2a7   :  { %v2892_v8 = vshll.u32 %v4281_v15, %v2877_v40  ;;  %v1262_v24 = vshll.u32 %v1261_v18, 30  ;;  %v1285_v27 = vsub.s32 4, %v1261_v18  ;;  %vm2895_vm13 = vcmp.lt.s32.totalorder %v5921_v0, 1 }
 0x2a8   :  { %vm2898_vm0 = vcmp.lt.s32.totalorder %v5921_v0, 4  ;;  %v3052_v6 = vsel %vm2969_vm1, %v3051_v54, %v3050_v35  ;;  %v2903_v4 = vsel %vm2895_vm13, %v2882_v53, %v2885_v32  ;;  %v2879_v20 = vshrl.u32 %v4277_v5, %v2878_v37 }
 0x2a9   :  { %v2894_v58 = vor.u32 %v2893_v48, %v2892_v8  ;;  %v2904_v63 = vsel %vm2898_vm0, %v2891_v14, 920167782  ;;  %v3055_v40 = vsel %vm5877_vm2, %v5268_v51, %v3052_v6  ;;  %v5961_v47 = vsub.s32 %v1259_v50, %v1262_v24 }
 0x2aa   :  { %vm2897_vm3 = vcmp.lt.s32.totalorder %v5921_v0, 3  ;;  %4193 = vcosq.f32 %v3055_v40  ;;  %vm2896_vm1 = vcmp.lt.s32.totalorder %v5921_v0, 2  ;;  %v2900_v52 = vsel %vm2898_vm0, %v2888_v29, 2102212464 }
 0x2ab   :  { %v2905_v41 = vsel %vm2897_vm3, %v2888_v29, %v2904_v63  ;;  %4195 = vsinq.f32 %v3055_v40  ;;  %v1265_v3 = vsub.s32 0, %v5961_v47  ;;  %v1286_v49 = vsel %vm1201_vm15, %v1285_v27, %v1261_v18 }
 0x2ac   :  { %v2906_v55 = vsel %vm2896_vm1, %v2903_v4, %v2905_v41  ;;  %v2907_v37 = vsel %vm2895_vm13, %v2885_v32, %v2888_v29  ;;  %v2908_v34 = vsel %vm2898_vm0, %v2894_v58, 1326507024  ;;  %v2899_v60 = vsel %vm2895_vm13, %v2879_v20, %v2882_v53 }
 0x2ad   :  { %v5978_v25 = vmul.u32.u64.low %v5944_v16, %v2906_v55  ;;  %v5979_v28 = vmul.u32.u64.high %v5944_v16, %v2906_v55, %v5978_v25  ;;  %v3808_v42 = vmin.u32 %v1265_v3, %v5961_v47  ;;  %v2901_v12 = vsel %vm2897_vm3, %v2885_v32, %v2900_v52 }
 0x2ae   :  { %v2909_v50 = vsel %vm2897_vm3, %v2891_v14, %v2908_v34  ;;  %vm5987_vm2 = vcmp.le.f32.partialorder %v1199_v10, 0.7853982  ;;  %v1514_v44 = vand.u32 2139095040, %v5493_v43  ;;  %v2902_v57 = vsel %vm2896_vm1, %v2899_v60, %v2901_v12 }
 0x2af   :  { %v2910_v1 = vsel %vm2896_vm1, %v2907_v37, %v2909_v50  ;;  %v1267_v39 = vclz %v3808_v42  ;;  %v1288_v45 = vsel %vm5987_vm2, 0, %v1286_v49  ;;  %vm3059_vm5 = vweird.f32 %v5268_v51 }
 0x2b0   :  { %v6001_v36 = vmul.u32.u64.low %v5944_v16, %v2910_v1  ;;  %v6002_v10 = vmul.u32.u64.high %v5944_v16, %v2910_v1, %v6001_v36  ;;  %v1515_v53 = vshrl.u32 %v1514_v44, 23  ;;  %vm3062_vm6 = vcmp.lt.s32.totalorder %v5947_v7, 2 }
 0x2b1   :  { %v3809_v56 = vadd.s32 4294967294, %v1267_v39  ;;  %v1518_v59 = vand.u32 8388607, %v1511_v30  ;;  %vm3063_vm4 = vcmp.eq.s32.totalorder %v5947_v7, 0  ;;  %vm3066_vm9 = vcmp.eq.s32.totalorder %v5947_v7, 2 }
 0x2b2   :  { %v2921_v0 = vadd.s32 1, %v5979_v28  ;;  %v3819_v35 = vadd.s32 4294967169, %v1515_v53  ;;  %v1255_v32 = vadd.s32 %v5902_v33, %v5914_v46  ;;  %v1292_v14 = vadd.s32 3, %v1288_v45 }
 0x2b3   :  { %vm3810_vm7 = vcmp.lt.s32.totalorder %v3809_v56, 0  ;;  %v2918_v18 = vmul.u32 %v5944_v16, %v2902_v57  ;;  %vm2920_vm8 = vc.u32 %v6002_v10, %v5978_v25  ;;  %v3178_v8 = vand.u32 2139095040, %v5572_v21 }
 0x2b4   :  { %v4194_v48 = vpop.eup %4193  ;;  %v1270_v54 = vsel %vm3810_vm7, 0, %v3809_v56  ;;  %v1521_v29 = vadd.s32 1, %v3819_v35  ;;  %v1519_v4 = vor.u32 8388608, %v1518_v59  ;;  %v2922_v46 = vsel %vm2920_vm8, %v2921_v0, %v5979_v28 }
 0x2b5   :  { %v4196_v24 = vpop.eup %4195  ;;  %v3067_v27 = vxor.u32 2147483648, %v4194_v48  ;;  %v1271_v6 = vsub.s32 32, %v1270_v54  ;;  %v1275_v58 = vsub.s32 4294967266, %v1270_v54  ;;  %v1272_v33 = vshll.u32 %v5961_v47, %v1270_v54 }
 0x2b6   :  { %v3064_v63 = vxor.u32 2147483648, %v4196_v24  ;;  %vm1522_vm12 = vcmp.gt.s32.totalorder %v1521_v29, 0  ;;  %v2923_v52 = vadd.s32 %v2922_v46, %v2918_v18  ;;  %v3175_v49 = vand.u32 2147483647, %v5572_v21 }
 0x2b7   :  { %v3068_v16 = vsel %vm3066_vm9, %v3067_v27, %v4196_v24  ;;  %v1273_v40 = vshrl.u32 %v1255_v32, %v1271_v6  ;;  %v1276_v20 = vadd.s32 127, %v1275_v58  ;;  %v1523_v3 = vsel %vm1522_vm12, %v1521_v29, 0 }
 0x2b8   :  { %v3065_v41 = vsel %vm3063_vm4, %v4194_v48, %v3064_v63  ;;  %v3179_v55 = vshrl.u32 %v3178_v8, 23  ;;  %v2924_v28 = vadd.s32 536870912, %v2923_v52  ;;  %v1525_v60 = vand.u32 31, %v1523_v3 }
 0x2b9   :  { %v3069_v37 = vsel %vm3062_vm6, %v3065_v41, %v3068_v16  ;;  %v1274_v47 = vor.u32 %v1273_v40, %v1272_v33  ;;  %v1277_v34 = vshll.u32 %v1276_v20, 23  ;;  %v6028_v50 = vand.u32 3, %v1292_v14 }
 0x2ba   :  { %v3070_v42 = vsel %vm3059_vm5, nan, %v3069_v37  ;;  %vm2865_vm11 = vcmp.lt.s32.totalorder %v5418_v31, 0  ;;  %v2925_v1 = vshrl.u32 %v2924_v28, 30  ;;  %v1526_v44 = vsub.s32 32, %v1525_v60 }
 0x2bb   :  { %3720 = vst [vmem:[#allocation2 + $0xc8] sm:$0xff] %v3070_v42  ;;  %v1278_v12 = vor.u32 4788187, %v1277_v34  ;;  %v6031_v39 = vshll.u32 %v1519_v4, 8  ;;  %v3883_v45 = vadd.s32 4294967169, %v3179_v55  ;;  %v1281_v36 = vcvt.s32.f32 %v1274_v47 }
 0x2bc   :  { %v6035_v7 = vand.u32 8388607, %v3175_v49  ;;  %v6039_v51 = vadd.s32 %v5978_v25, %v6002_v10  ;;  %v2926_v53 = vshll.u32 %v2925_v1, 30  ;;  %v1524_v56 = vshrl.u32 %v1523_v3, 5 }
 0x2bd   :  { %v1279_v57 = vand.u32 2147483647, %v1278_v12  ;;  %v1529_v59 = vshrl.u32 %v4278_v9, %v1526_v44  ;;  %v1532_v0 = vshrl.u32 %v4279_v11, %v1526_v44  ;;  %v1535_v35 = vshrl.u32 %v4280_v13, %v1526_v44 }
 0x2be   :  { %v6044_v14 = vsub.s32 %v2923_v52, %v2926_v53  ;;  %v1528_v18 = vshll.u32 %v4277_v5, %v1525_v60  ;;  %v1538_v48 = vshrl.u32 %v4281_v15, %v1526_v44  ;;  %vm6050_vm10 = vcmp.le.f32.partialorder %v2863_v17, 0.7853982 }
 0x2bf   :  { %v1282_v32 = vmul.f32 %v1281_v36, %v1279_v57  ;;  %v2949_v10 = vsub.s32 4, %v2925_v1  ;;  %v1531_v54 = vshll.u32 %v4278_v9, %v1525_v60  ;;  %v1534_v29 = vshll.u32 %v4279_v11, %v1525_v60 }
 0x2c0   :  { %v3185_v8 = vadd.s32 1, %v3883_v45  ;;  %v2929_v27 = vsub.s32 0, %v6044_v14  ;;  %v1530_v6 = vor.u32 %v1529_v59, %v1528_v18  ;;  %v1537_v58 = vshll.u32 %v4280_v13, %v1525_v60 }
 0x2c1   :  { %v1283_v24 = vxor.u32 2147483648, %v1282_v32  ;;  %v1533_v4 = vor.u32 %v1532_v0, %v1531_v54  ;;  %v1536_v63 = vor.u32 %v1535_v35, %v1534_v29  ;;  %v1540_v33 = vshll.u32 %v4281_v15, %v1525_v60  ;;  %v6079_v35 = vpop.f32.mrb[13].mxu1 }
 0x2c2   :  { %v1541_v17 = vshrl.u32 %v4282_v22, %v1526_v44  ;;  %v3872_v16 = vmin.u32 %v2929_v27, %v6044_v14  ;;  %v1527_v40 = vshrl.u32 %v4277_v5, %v1526_v44  ;;  %v1539_v20 = vor.u32 %v1538_v48, %v1537_v58 }
 0x2c3   :  { %v1284_v46 = vsel %vm1201_vm15, %v1283_v24, %v1282_v32  ;;  %v2950_v41 = vsel %vm2865_vm11, %v2949_v10, %v2925_v1  ;;  %vm1543_vm14 = vcmp.lt.s32.totalorder %v1524_v56, 1  ;;  %vm1544_vm13 = vcmp.lt.s32.totalorder %v1524_v56, 2 }
 0x2c4   :  { %v1287_v52 = vsel %vm5987_vm2, %v5333_v61, %v1284_v46  ;;  %v1542_v3 = vor.u32 %v1541_v17, %v1540_v33  ;;  %v2931_v55 = vclz %v3872_v16  ;;  %vm1546_vm0 = vcmp.lt.s32.totalorder %v1524_v56, 4 }
 0x2c5   :  { %4197 = vcosq.f32 %v1287_v52  ;;  %vm1545_vm15 = vcmp.lt.s32.totalorder %v1524_v56, 3  ;;  %v1548_v37 = vsel %vm1546_vm0, %v1536_v63, 2102212464  ;;  %v1551_v47 = vsel %vm1543_vm14, %v1530_v6, %v1533_v4 }
 0x2c6   :  { %4199 = vsinq.f32 %v1287_v52  ;;  %v3873_v34 = vadd.s32 4294967294, %v2931_v55  ;;  %v1547_v28 = vsel %vm1543_vm14, %v1527_v40, %v1530_v6  ;;  %v1552_v42 = vsel %vm1546_vm0, %v1539_v20, 920167782 }
 0x2c7   :  { %v1555_v60 = vsel %vm1543_vm14, %v1533_v4, %v1536_v63  ;;  %v1549_v12 = vsel %vm1545_vm15, %v1533_v4, %v1548_v37  ;;  %v1553_v38 = vsel %vm1545_vm15, %v1536_v63, %v1552_v42  ;;  %v1556_v44 = vsel %vm1546_vm0, %v1542_v3, 1326507024 }
 0x2c8   :  { %vm3186_vm3 = vcmp.gt.s32.totalorder %v3185_v8, 0  ;;  %vm3874_vm1 = vcmp.lt.s32.totalorder %v3873_v34, 0  ;;  %v2952_v1 = vsel %vm6050_vm10, 0, %v2950_v41  ;;  %v1554_v45 = vsel %vm1544_vm13, %v1551_v47, %v1553_v38 }
 0x2c9   :  { %v1557_v57 = vsel %vm1545_vm15, %v1539_v20, %v1556_v44  ;;  %vm1295_vm2 = vcmp.eq.s32.totalorder %v6028_v50, 0  ;;  %v2934_v36 = vsel %vm3874_vm1, 0, %v3873_v34  ;;  %vm1294_vm5 = vcmp.lt.s32.totalorder %v6028_v50, 2 }
 0x2ca   :  { %v1558_v53 = vsel %vm1544_vm13, %v1555_v60, %v1557_v57  ;;  %v6075_v59 = vmul.u32.u64.low %v6031_v39, %v1554_v45  ;;  %v6076_v0 = vmul.u32.u64.high %v6031_v39, %v1554_v45, %v6075_v59  ;;  %v2935_v32 = vsub.s32 32, %v2934_v36 }
 0x2cb   :  { %v2939_v18 = vsub.s32 4294967266, %v2934_v36  ;;  %v1550_v48 = vsel %vm1544_vm13, %v1547_v28, %v1549_v12  ;;  %v3187_v10 = vsel %vm3186_vm3, %v3185_v8, 0  ;;  %vm1291_vm6 = vweird.f32 %v5333_v61 }
 0x2cc   :  { %vm1298_vm4 = vcmp.eq.s32.totalorder %v6028_v50, 2  ;;  %v6086_v54 = vmul.u32.u64.low %v6031_v39, %v1558_v53  ;;  %v6087_v29 = vmul.u32.u64.high %v6031_v39, %v1558_v53, %v6086_v54  ;;  %v3189_v24 = vand.u32 31, %v3187_v10 }
 0x2cd   :  { %v2936_v27 = vshll.u32 %v6044_v14, %v2934_v36  ;;  %v2937_v6 = vshrl.u32 %v6039_v51, %v2935_v32  ;;  %v2940_v58 = vadd.s32 127, %v2939_v18  ;;  %v3183_v4 = vor.u32 8388608, %v6035_v7 }
 0x2ce   :  { %v2956_v63 = vadd.s32 3, %v2952_v1  ;;  %v1566_v56 = vmul.u32 %v6031_v39, %v1550_v48  ;;  %v1569_v8 = vadd.s32 1, %v6076_v0  ;;  %v3190_v33 = vsub.s32 32, %v3189_v24 }
 0x2cf   :  { %v4198_v17 = vpop.eup %4197  ;;  %v2938_v46 = vor.u32 %v2937_v6, %v2936_v27  ;;  %v2941_v16 = vshll.u32 %v2940_v58, 23  ;;  %v6094_v40 = vshrl.u32 %v3187_v10, 5  ;;  %v3192_v20 = vshll.u32 %v4277_v5, %v3189_v24 }
 0x2d0   :  { %v4200_v52 = vpop.eup %4199  ;;  %v1299_v14 = vxor.u32 2147483648, %v4198_v17  ;;  %vm1568_vm9 = vc.u32 %v6087_v29, %v6075_v59  ;;  %v3195_v7 = vshll.u32 %v4278_v9, %v3189_v24  ;;  %v3201_v51 = vshll.u32 %v4280_v13, %v3189_v24 }
 0x2d1   :  { %v1296_v39 = vxor.u32 2147483648, %v4200_v52  ;;  %v2942_v41 = vor.u32 4788187, %v2941_v16  ;;  %v2945_v3 = vcvt.s32.f32 %v2938_v46  ;;  %v1570_v55 = vsel %vm1568_vm9, %v1569_v8, %v6076_v0 }
 0x2d2   :  { %v1300_v37 = vsel %vm1298_vm4, %v1299_v14, %v4200_v52  ;;  %v1571_v47 = vadd.s32 %v1570_v55, %v1566_v56  ;;  %v3193_v34 = vshrl.u32 %v4278_v9, %v3190_v33  ;;  %v3196_v28 = vshrl.u32 %v4279_v11, %v3190_v33 }
 0x2d3   :  { %v1297_v42 = vsel %vm1295_vm2, %v4198_v17, %v1296_v39  ;;  %v2943_v60 = vand.u32 2147483647, %v2942_v41  ;;  %vm1513_vm7 = vcmp.lt.s32.totalorder %v5493_v43, 0  ;;  %v3199_v12 = vshrl.u32 %v4280_v13, %v3190_v33 }
 0x2d4   :  { %v3202_v38 = vshrl.u32 %v4281_v15, %v3190_v33  ;;  %v1301_v44 = vsel %vm1294_vm5, %v1297_v42, %v1300_v37  ;;  %v1572_v1 = vadd.s32 536870912, %v1571_v47  ;;  %v3194_v45 = vor.u32 %v3193_v34, %v3192_v20 }
 0x2d5   :  { %v3198_v57 = vshll.u32 %v4279_v11, %v3189_v24  ;;  %v1302_v36 = vsel %vm1291_vm6, nan, %v1301_v44  ;;  %v2946_v53 = vmul.f32 %v2945_v3, %v2943_v60  ;;  %v3197_v0 = vor.u32 %v3196_v28, %v3195_v7 }
 0x2d6   :  { %v3203_v32 = vor.u32 %v3202_v38, %v3201_v51  ;;  %3703 = vst [vmem:[#allocation2 + $0x40] sm:$0xff] %v1302_v36  ;;  %v1573_v18 = vshrl.u32 %v1572_v1, 30  ;;  %v3205_v48 = vshrl.u32 %v4282_v22, %v3190_v33  ;;  %v6117_v10 = vshll.u32 %v3183_v4, 8  ;;  %v6179_v36 = vpop.f32.mrb[14].mxu0 }
 0x2d7   :  { %v1407_v54 = vand.u32 2147483647, %v5652_v19  ;;  %v2947_v50 = vxor.u32 2147483648, %v2946_v53  ;;  %v6120_v27 = vand.u32 3, %v2956_v63  ;;  %v3200_v6 = vor.u32 %v3199_v12, %v3198_v57 }
 0x2d8   :  { %v3204_v58 = vshll.u32 %v4281_v15, %v3189_v24  ;;  %v1574_v56 = vshll.u32 %v1573_v18, 30  ;;  %v1597_v61 = vsub.s32 4, %v1573_v18  ;;  %vm3207_vm8 = vcmp.lt.s32.totalorder %v6094_v40, 1 }
 0x2d9   :  { %vm3210_vm12 = vcmp.lt.s32.totalorder %v6094_v40, 4  ;;  %v2948_v8 = vsel %vm2865_vm11, %v2947_v50, %v2946_v53  ;;  %v3215_v4 = vsel %vm3207_vm8, %v3194_v45, %v3197_v0  ;;  %v3191_v16 = vshrl.u32 %v4277_v5, %v3190_v33 }
 0x2da   :  { %v3206_v17 = vor.u32 %v3205_v48, %v3204_v58  ;;  %v3216_v63 = vsel %vm3210_vm12, %v3203_v32, 920167782  ;;  %v2951_v24 = vsel %vm6050_vm10, %v5418_v31, %v2948_v8  ;;  %v6134_v46 = vsub.s32 %v1571_v47, %v1574_v56 }
 0x2db   :  { %vm3209_vm14 = vcmp.lt.s32.totalorder %v6094_v40, 3  ;;  %4201 = vcosq.f32 %v2951_v24  ;;  %vm3208_vm11 = vcmp.lt.s32.totalorder %v6094_v40, 2  ;;  %v3212_v20 = vsel %vm3210_vm12, %v3200_v6, 2102212464 }
 0x2dc   :  { %v3217_v52 = vsel %vm3209_vm14, %v3200_v6, %v3216_v63  ;;  %4203 = vsinq.f32 %v2951_v24  ;;  %v1577_v14 = vsub.s32 0, %v6134_v46  ;;  %v1598_v25 = vsel %vm1513_vm7, %v1597_v61, %v1573_v18 }
 0x2dd   :  { %v3218_v7 = vsel %vm3208_vm11, %v3215_v4, %v3217_v52  ;;  %v3219_v33 = vsel %vm3207_vm8, %v3197_v0, %v3200_v6  ;;  %v3220_v51 = vsel %vm3210_vm12, %v3206_v17, 1326507024  ;;  %v3211_v55 = vsel %vm3207_vm8, %v3191_v16, %v3194_v45 }
 0x2de   :  { %v6151_v39 = vmul.u32.u64.low %v6117_v10, %v3218_v7  ;;  %v6152_v41 = vmul.u32.u64.high %v6117_v10, %v3218_v7, %v6151_v39  ;;  %v3820_v3 = vmin.u32 %v1577_v14, %v6134_v46  ;;  %v3213_v37 = vsel %vm3209_vm14, %v3197_v0, %v3212_v20 }
 0x2df   :  { %v3221_v47 = vsel %vm3209_vm14, %v3203_v32, %v3220_v51  ;;  %vm6160_vm10 = vcmp.le.f32.partialorder %v1511_v30, 0.7853982  ;;  %v1410_v42 = vand.u32 2139095040, %v5652_v19  ;;  %v3214_v38 = vsel %vm3208_vm11, %v3211_v55, %v3213_v37 }
 0x2e0   :  { %v3222_v28 = vsel %vm3208_vm11, %v3219_v33, %v3221_v47  ;;  %v1579_v60 = vclz %v3820_v3  ;;  %v1600_v12 = vsel %vm6160_vm10, 0, %v1598_v25  ;;  %vm2955_vm13 = vweird.f32 %v5418_v31 }
 0x2e1   :  { %v6172_v44 = vmul.u32.u64.low %v6117_v10, %v3222_v28  ;;  %v6173_v1 = vmul.u32.u64.high %v6117_v10, %v3222_v28, %v6172_v44  ;;  %v1411_v30 = vshrl.u32 %v1410_v42, 23  ;;  %vm2958_vm0 = vcmp.lt.s32.totalorder %v6120_v27, 2 }
 0x2e2   :  { %v3821_v45 = vadd.s32 4294967294, %v1579_v60  ;;  %v1414_v57 = vand.u32 8388607, %v1407_v54  ;;  %vm2959_vm15 = vcmp.eq.s32.totalorder %v6120_v27, 0  ;;  %vm2962_vm3 = vcmp.eq.s32.totalorder %v6120_v27, 2 }
 0x2e3   :  { %v3233_v40 = vadd.s32 1, %v6152_v41  ;;  %v3815_v53 = vadd.s32 4294967169, %v1411_v30  ;;  %v1567_v0 = vadd.s32 %v6075_v59, %v6087_v29  ;;  %v1604_v32 = vadd.s32 3, %v1600_v12 }
 0x2e4   :  { %vm3822_vm1 = vcmp.lt.s32.totalorder %v3821_v45, 0  ;;  %v3230_v18 = vmul.u32 %v6117_v10, %v3214_v38  ;;  %vm3232_vm2 = vc.u32 %v6173_v1, %v6151_v39  ;;  %v3074_v58 = vand.u32 2139095040, %v5733_v62 }
 0x2e5   :  { %v4202_v48 = vpop.eup %4201  ;;  %v1582_v50 = vsel %vm3822_vm1, 0, %v3821_v45  ;;  %v1417_v6 = vadd.s32 1, %v3815_v53  ;;  %v1415_v4 = vor.u32 8388608, %v1414_v57  ;;  %v3234_v29 = vsel %vm3232_vm2, %v3233_v40, %v6152_v41 }
 0x2e6   :  { %v4204_v56 = vpop.eup %4203  ;;  %v2963_v61 = vxor.u32 2147483648, %v4202_v48  ;;  %v1583_v8 = vsub.s32 32, %v1582_v50  ;;  %v1587_v17 = vsub.s32 4294967266, %v1582_v50  ;;  %v1584_v59 = vshll.u32 %v6134_v46, %v1582_v50 }
 0x2e7   :  { %v2960_v63 = vxor.u32 2147483648, %v4204_v56  ;;  %vm1418_vm5 = vcmp.gt.s32.totalorder %v1417_v6, 0  ;;  %v3235_v20 = vadd.s32 %v3234_v29, %v3230_v18  ;;  %v3071_v25 = vand.u32 2147483647, %v5733_v62 }
 0x2e8   :  { %v2964_v10 = vsel %vm2962_vm3, %v2963_v61, %v4204_v56  ;;  %v1585_v24 = vshrl.u32 %v1567_v0, %v1583_v8  ;;  %v1588_v16 = vadd.s32 127, %v1587_v17  ;;  %v1419_v14 = vsel %vm1418_vm5, %v1417_v6, 0 }
 0x2e9   :  { %v2961_v52 = vsel %vm2959_vm15, %v4202_v48, %v2960_v63  ;;  %v3075_v7 = vshrl.u32 %v3074_v58, 23  ;;  %v3236_v41 = vadd.s32 536870912, %v3235_v20  ;;  %v1421_v55 = vand.u32 31, %v1419_v14 }
 0x2ea   :  { %v2965_v33 = vsel %vm2958_vm0, %v2961_v52, %v2964_v10  ;;  %v1586_v46 = vor.u32 %v1585_v24, %v1584_v59  ;;  %v1589_v51 = vshll.u32 %v1588_v16, 23  ;;  %v6201_v47 = vand.u32 3, %v1604_v32 }
 0x2eb   :  { %v2966_v3 = vsel %vm2955_vm13, nan, %v2965_v33  ;;  %vm3177_vm6 = vcmp.lt.s32.totalorder %v5572_v21, 0  ;;  %v3237_v28 = vshrl.u32 %v3236_v41, 30  ;;  %v1422_v42 = vsub.s32 32, %v1421_v55 }
 0x2ec   :  { %3719 = vst [vmem:[#allocation2 + $0xc0] sm:$0xff] %v2966_v3  ;;  %v1590_v37 = vor.u32 4788187, %v1589_v51  ;;  %v6204_v60 = vshll.u32 %v1415_v4, 8  ;;  %v3879_v12 = vadd.s32 4294967169, %v3075_v7  ;;  %v1593_v44 = vcvt.s32.f32 %v1586_v46 }
 0x2ed   :  { %v6208_v27 = vand.u32 8388607, %v3071_v25  ;;  %v6212_v31 = vadd.s32 %v6151_v39, %v6173_v1  ;;  %v3238_v30 = vshll.u32 %v3237_v28, 30  ;;  %v1420_v45 = vshrl.u32 %v1419_v14, 5 }
 0x2ee   :  { %v1591_v38 = vand.u32 2147483647, %v1590_v37  ;;  %v1425_v57 = vshrl.u32 %v4278_v9, %v1422_v42  ;;  %v1428_v40 = vshrl.u32 %v4279_v11, %v1422_v42  ;;  %v1431_v53 = vshrl.u32 %v4280_v13, %v1422_v42 }
 0x2ef   :  { %v6217_v32 = vsub.s32 %v3235_v20, %v3238_v30  ;;  %v1424_v18 = vshll.u32 %v4277_v5, %v1421_v55  ;;  %v1434_v48 = vshrl.u32 %v4281_v15, %v1422_v42  ;;  %vm6223_vm4 = vcmp.le.f32.partialorder %v3175_v49, 0.7853982 }
 0x2f0   :  { %v1594_v0 = vmul.f32 %v1593_v44, %v1591_v38  ;;  %v3261_v1 = vsub.s32 4, %v3237_v28  ;;  %v1427_v50 = vshll.u32 %v4278_v9, %v1421_v55  ;;  %v1430_v6 = vshll.u32 %v4279_v11, %v1421_v55 }
 0x2f1   :  { %v3081_v58 = vadd.s32 1, %v3879_v12  ;;  %v3241_v61 = vsub.s32 0, %v6217_v32  ;;  %v1426_v8 = vor.u32 %v1425_v57, %v1424_v18  ;;  %v1433_v17 = vshll.u32 %v4280_v13, %v1421_v55 }
 0x2f2   :  { %v1595_v56 = vxor.u32 2147483648, %v1594_v0  ;;  %v1429_v4 = vor.u32 %v1428_v40, %v1427_v50  ;;  %v1432_v63 = vor.u32 %v1431_v53, %v1430_v6  ;;  %v1436_v59 = vshll.u32 %v4281_v15, %v1421_v55  ;;  %v6252_v53 = vpop.f32.mrb[14].mxu1 }
 0x2f3   :  { %v1437_v49 = vshrl.u32 %v4282_v22, %v1422_v42  ;;  %v3884_v10 = vmin.u32 %v3241_v61, %v6217_v32  ;;  %v1423_v24 = vshrl.u32 %v4277_v5, %v1422_v42  ;;  %v1435_v16 = vor.u32 %v1434_v48, %v1433_v17 }
 0x2f4   :  { %v1596_v29 = vsel %vm1513_vm7, %v1595_v56, %v1594_v0  ;;  %v3262_v52 = vsel %vm3177_vm6, %v3261_v1, %v3237_v28  ;;  %vm1439_vm9 = vcmp.lt.s32.totalorder %v1420_v45, 1  ;;  %vm1440_vm8 = vcmp.lt.s32.totalorder %v1420_v45, 2 }
 0x2f5   :  { %v1599_v20 = vsel %vm6160_vm10, %v5493_v43, %v1596_v29  ;;  %v1438_v14 = vor.u32 %v1437_v49, %v1436_v59  ;;  %v3243_v7 = vclz %v3884_v10  ;;  %vm1442_vm12 = vcmp.lt.s32.totalorder %v1420_v45, 4 }
 0x2f6   :  { %4205 = vcosq.f32 %v1599_v20  ;;  %vm1441_vm7 = vcmp.lt.s32.totalorder %v1420_v45, 3  ;;  %v1444_v33 = vsel %vm1442_vm12, %v1432_v63, 2102212464  ;;  %v1447_v46 = vsel %vm1439_vm9, %v1426_v8, %v1429_v4 }
 0x2f7   :  { %4207 = vsinq.f32 %v1599_v20  ;;  %v3885_v51 = vadd.s32 4294967294, %v3243_v7  ;;  %v1443_v41 = vsel %vm1439_vm9, %v1423_v24, %v1426_v8  ;;  %v1448_v3 = vsel %vm1442_vm12, %v1435_v16, 920167782 }
 0x2f8   :  { %v1451_v55 = vsel %vm1439_vm9, %v1429_v4, %v1432_v63  ;;  %v1445_v37 = vsel %vm1441_vm7, %v1429_v4, %v1444_v33  ;;  %v1449_v34 = vsel %vm1441_vm7, %v1432_v63, %v1448_v3  ;;  %v1452_v42 = vsel %vm1442_vm12, %v1438_v14, 1326507024 }
 0x2f9   :  { %vm3082_vm14 = vcmp.gt.s32.totalorder %v3081_v58, 0  ;;  %vm3886_vm11 = vcmp.lt.s32.totalorder %v3885_v51, 0  ;;  %v3264_v28 = vsel %vm6223_vm4, 0, %v3262_v52  ;;  %v1450_v12 = vsel %vm1440_vm8, %v1447_v46, %v1449_v34 }
 0x2fa   :  { %v1453_v38 = vsel %vm1441_vm7, %v1435_v16, %v1452_v42  ;;  %vm1607_vm10 = vcmp.eq.s32.totalorder %v6201_v47, 0  ;;  %v3246_v44 = vsel %vm3886_vm11, 0, %v3885_v51  ;;  %vm1606_vm13 = vcmp.lt.s32.totalorder %v6201_v47, 2 }
 0x2fb   :  { %v1454_v30 = vsel %vm1440_vm8, %v1451_v55, %v1453_v38  ;;  %v6248_v57 = vmul.u32.u64.low %v6204_v60, %v1450_v12  ;;  %v6249_v40 = vmul.u32.u64.high %v6204_v60, %v1450_v12, %v6248_v57  ;;  %v3247_v0 = vsub.s32 32, %v3246_v44 }
 0x2fc   :  { %v3251_v18 = vsub.s32 4294967266, %v3246_v44  ;;  %v1446_v48 = vsel %vm1440_vm8, %v1443_v41, %v1445_v37  ;;  %v3083_v1 = vsel %vm3082_vm14, %v3081_v58, 0  ;;  %vm1603_vm0 = vweird.f32 %v5493_v43 }
 0x2fd   :  { %vm1610_vm15 = vcmp.eq.s32.totalorder %v6201_v47, 2  ;;  %v6259_v50 = vmul.u32.u64.low %v6204_v60, %v1454_v30  ;;  %v6260_v6 = vmul.u32.u64.high %v6204_v60, %v1454_v30, %v6259_v50  ;;  %v3085_v56 = vand.u32 31, %v3083_v1 }
 0x2fe   :  { %v3248_v61 = vshll.u32 %v6217_v32, %v3246_v44  ;;  %v3249_v8 = vshrl.u32 %v6212_v31, %v3247_v0  ;;  %v3252_v17 = vadd.s32 127, %v3251_v18  ;;  %v3079_v4 = vor.u32 8388608, %v6208_v27 }
 0x2ff   :  { %v3268_v63 = vadd.s32 3, %v3264_v28  ;;  %v1462_v45 = vmul.u32 %v6204_v60, %v1446_v48  ;;  %v1465_v58 = vadd.s32 1, %v6249_v40  ;;  %v3086_v59 = vsub.s32 32, %v3085_v56 }
 0x300   :  { %v4206_v49 = vpop.eup %4205  ;;  %v3250_v29 = vor.u32 %v3249_v8, %v3248_v61  ;;  %v3253_v10 = vshll.u32 %v3252_v17, 23  ;;  %v6267_v24 = vshrl.u32 %v3083_v1, 5  ;;  %v3088_v16 = vshll.u32 %v4277_v5, %v3085_v56 }
 0x301   :  { %v4208_v20 = vpop.eup %4207  ;;  %v1611_v32 = vxor.u32 2147483648, %v4206_v49  ;;  %vm1464_vm3 = vc.u32 %v6260_v6, %v6248_v57  ;;  %v3091_v27 = vshll.u32 %v4278_v9, %v3085_v56  ;;  %v3097_v31 = vshll.u32 %v4280_v13, %v3085_v56 }
 0x302   :  { %v1608_v60 = vxor.u32 2147483648, %v4208_v20  ;;  %v3254_v52 = vor.u32 4788187, %v3253_v10  ;;  %v3257_v14 = vcvt.s32.f32 %v3250_v29  ;;  %v1466_v7 = vsel %vm1464_vm3, %v1465_v58, %v6249_v40 }
 0x303   :  { %v1612_v33 = vsel %vm1610_vm15, %v1611_v32, %v4208_v20  ;;  %v1467_v46 = vadd.s32 %v1466_v7, %v1462_v45  ;;  %v3089_v51 = vshrl.u32 %v4278_v9, %v3086_v59  ;;  %v3092_v41 = vshrl.u32 %v4279_v11, %v3086_v59 }
 0x304   :  { %v1609_v3 = vsel %vm1607_vm10, %v4206_v49, %v1608_v60  ;;  %v3255_v55 = vand.u32 2147483647, %v3254_v52  ;;  %vm1409_vm1 = vcmp.lt.s32.totalorder %v5652_v19, 0  ;;  %v3095_v37 = vshrl.u32 %v4280_v13, %v3086_v59 }
 0x305   :  { %v3098_v34 = vshrl.u32 %v4281_v15, %v3086_v59  ;;  %v1613_v42 = vsel %vm1606_vm13, %v1609_v3, %v1612_v33  ;;  %v1468_v28 = vadd.s32 536870912, %v1467_v46  ;;  %v3090_v12 = vor.u32 %v3089_v51, %v3088_v16 }
 0x306   :  { %v3094_v38 = vshll.u32 %v4279_v11, %v3085_v56  ;;  %v1614_v44 = vsel %vm1603_vm0, nan, %v1613_v42  ;;  %v3258_v30 = vmul.f32 %v3257_v14, %v3255_v55  ;;  %v3093_v40 = vor.u32 %v3092_v41, %v3091_v27 }
 0x307   :  { %v3099_v0 = vor.u32 %v3098_v34, %v3097_v31  ;;  %3706 = vst [vmem:[#allocation2 + $0x58] sm:$0xff] %v1614_v44  ;;  %v1469_v18 = vshrl.u32 %v1468_v28, 30  ;;  %v3101_v48 = vshrl.u32 %v4282_v22, %v3086_v59  ;;  %v6290_v1 = vshll.u32 %v3079_v4, 8  ;;  %v6342_v34 = vpop.f32.mrb[15].mxu0 }
 0x308   :  { %v1719_v50 = vand.u32 2147483647, %v5833_v2  ;;  %v3259_v47 = vxor.u32 2147483648, %v3258_v30  ;;  %v6293_v61 = vand.u32 3, %v3268_v63  ;;  %v3096_v8 = vor.u32 %v3095_v37, %v3094_v38 }
 0x309   :  { %v3100_v17 = vshll.u32 %v4281_v15, %v3085_v56  ;;  %v1470_v45 = vshll.u32 %v1469_v18, 30  ;;  %v1493_v43 = vsub.s32 4, %v1469_v18  ;;  %vm3103_vm2 = vcmp.lt.s32.totalorder %v6267_v24, 1 }
 0x30a   :  { %vm3106_vm5 = vcmp.lt.s32.totalorder %v6267_v24, 4  ;;  %v3260_v58 = vsel %vm3177_vm6, %v3259_v47, %v3258_v30  ;;  %v3111_v4 = vsel %vm3103_vm2, %v3090_v12, %v3093_v40  ;;  %v3087_v10 = vshrl.u32 %v4277_v5, %v3086_v59 }
 0x30b   :  { %v3102_v49 = vor.u32 %v3101_v48, %v3100_v17  ;;  %v3112_v63 = vsel %vm3106_vm5, %v3099_v0, 920167782  ;;  %v3263_v56 = vsel %vm6223_vm4, %v5572_v21, %v3260_v58  ;;  %v6307_v29 = vsub.s32 %v1467_v46, %v1470_v45 }
 0x30c   :  { %vm3105_vm9 = vcmp.lt.s32.totalorder %v6267_v24, 3  ;;  %4209 = vcosq.f32 %v3263_v56  ;;  %vm3104_vm6 = vcmp.lt.s32.totalorder %v6267_v24, 2  ;;  %v3108_v16 = vsel %vm3106_vm5, %v3096_v8, 2102212464 }
 0x30d   :  { %v3113_v20 = vsel %vm3105_vm9, %v3096_v8, %v3112_v63  ;;  %4211 = vsinq.f32 %v3263_v56  ;;  %v1473_v32 = vsub.s32 0, %v6307_v29  ;;  %v1494_v39 = vsel %vm1409_vm1, %v1493_v43, %v1469_v18 }
 0x30e   :  { %v3114_v27 = vsel %vm3104_vm6, %v3111_v4, %v3113_v20  ;;  %v3115_v59 = vsel %vm3103_vm2, %v3093_v40, %v3096_v8  ;;  %v3116_v31 = vsel %vm3106_vm5, %v3102_v49, 1326507024  ;;  %v3107_v7 = vsel %vm3103_vm2, %v3087_v10, %v3090_v12 }
 0x30f   :  { %v6324_v60 = vmul.u32.u64.low %v6290_v1, %v3114_v27  ;;  %v6325_v52 = vmul.u32.u64.high %v6290_v1, %v3114_v27, %v6324_v60  ;;  %v3816_v14 = vmin.u32 %v1473_v32, %v6307_v29  ;;  %v3109_v33 = vsel %vm3105_vm9, %v3093_v40, %v3108_v16 }
 0x310   :  { %v3117_v46 = vsel %vm3105_vm9, %v3099_v0, %v3116_v31  ;;  %vm6333_vm4 = vcmp.le.f32.partialorder %v1407_v54, 0.7853982  ;;  %v1722_v3 = vand.u32 2139095040, %v5833_v2  ;;  %v3110_v42 = vsel %vm3104_vm6, %v3107_v7, %v3109_v33 }
 0x311   :  { %v3118_v41 = vsel %vm3104_vm6, %v3115_v59, %v3117_v46  ;;  %v1475_v55 = vclz %v3816_v14  ;;  %v1496_v37 = vsel %vm6333_vm4, 0, %v1494_v39  ;;  %vm3267_vm8 = vweird.f32 %v5572_v21 }
 0x312   :  { %v6347_v28 = vmul.u32.u64.low %v6290_v1, %v3118_v41  ;;  %v6348_v54 = vmul.u32.u64.high %v6290_v1, %v3118_v41, %v6347_v28  ;;  %v1723_v12 = vshrl.u32 %v1722_v3, 23  ;;  %vm3270_vm12 = vcmp.lt.s32.totalorder %v6293_v61, 2 }
 0x313   :  { %v3817_v38 = vadd.s32 4294967294, %v1475_v55  ;;  %v1726_v44 = vand.u32 8388607, %v1719_v50  ;;  %vm3271_vm7 = vcmp.eq.s32.totalorder %v6293_v61, 0  ;;  %vm3274_vm14 = vcmp.eq.s32.totalorder %v6293_v61, 2 }
 0x314   :  { %v3129_v24 = vadd.s32 1, %v6325_v52  ;;  %v3827_v30 = vadd.s32 4294967169, %v1723_v12  ;;  %v1463_v40 = vadd.s32 %v6248_v57, %v6260_v6  ;;  %v1500_v0 = vadd.s32 3, %v1496_v37 }
 0x315   :  { %vm3818_vm11 = vcmp.lt.s32.totalorder %v3817_v38, 0  ;;  %v3126_v18 = vmul.u32 %v6290_v1, %v3110_v42  ;;  %vm3128_vm10 = vc.u32 %v6348_v54, %v6324_v60  ;;  %v3386_v17 = vand.u32 2139095040, %v5906_v23 }
 0x316   :  { %v4210_v48 = vpop.eup %4209  ;;  %v1478_v47 = vsel %vm3818_vm11, 0, %v3817_v38  ;;  %v1729_v8 = vadd.s32 1, %v3827_v30  ;;  %v1727_v4 = vor.u32 8388608, %v1726_v44  ;;  %v3130_v6 = vsel %vm3128_vm10, %v3129_v24, %v6325_v52 }
 0x317   :  { %v4212_v45 = vpop.eup %4211  ;;  %v3275_v43 = vxor.u32 2147483648, %v4210_v48  ;;  %v1479_v58 = vsub.s32 32, %v1478_v47  ;;  %v1483_v49 = vsub.s32 4294967266, %v1478_v47  ;;  %v1480_v57 = vshll.u32 %v6307_v29, %v1478_v47 }
 0x318   :  { %v3272_v63 = vxor.u32 2147483648, %v4212_v45  ;;  %vm1730_vm13 = vcmp.gt.s32.totalorder %v1729_v8, 0  ;;  %v3131_v16 = vadd.s32 %v3130_v6, %v3126_v18  ;;  %v3383_v39 = vand.u32 2147483647, %v5906_v23 }
 0x319   :  { %v3276_v1 = vsel %vm3274_vm14, %v3275_v43, %v4212_v45  ;;  %v1481_v56 = vshrl.u32 %v1463_v40, %v1479_v58  ;;  %v1484_v10 = vadd.s32 127, %v1483_v49  ;;  %v1731_v32 = vsel %vm1730_vm13, %v1729_v8, 0 }
 0x31a   :  { %v3273_v20 = vsel %vm3271_vm7, %v4210_v48, %v3272_v63  ;;  %v3387_v27 = vshrl.u32 %v3386_v17, 23  ;;  %v3132_v52 = vadd.s32 536870912, %v3131_v16  ;;  %v1733_v7 = vand.u32 31, %v1731_v32 }
 0x31b   :  { %v3277_v59 = vsel %vm3270_vm12, %v3273_v20, %v3276_v1  ;;  %v1482_v29 = vor.u32 %v1481_v56, %v1480_v57  ;;  %v1485_v31 = vshll.u32 %v1484_v10, 23  ;;  %v6374_v46 = vand.u32 3, %v1500_v0 }
 0x31c   :  { %v3278_v14 = vsel %vm3267_vm8, nan, %v3277_v59  ;;  %vm3073_vm0 = vcmp.lt.s32.totalorder %v5733_v62, 0  ;;  %v3133_v41 = vshrl.u32 %v3132_v52, 30  ;;  %v1734_v3 = vsub.s32 32, %v1733_v7 }
 0x31d   :  { %3722 = vst [vmem:[#allocation2 + $0xd8] sm:$0xff] %v3278_v14  ;;  %v1486_v33 = vor.u32 4788187, %v1485_v31  ;;  %v6377_v55 = vshll.u32 %v1727_v4, 8  ;;  %v3891_v37 = vadd.s32 4294967169, %v3387_v27  ;;  %v1489_v28 = vcvt.s32.f32 %v1482_v29 }
 0x31e   :  { %v6381_v61 = vand.u32 8388607, %v3383_v39  ;;  %v6385_v21 = vadd.s32 %v6324_v60, %v6348_v54  ;;  %v3134_v12 = vshll.u32 %v3133_v41, 30  ;;  %v1732_v38 = vshrl.u32 %v1731_v32, 5 }
 0x31f   :  { %v1487_v42 = vand.u32 2147483647, %v1486_v33  ;;  %v1737_v44 = vshrl.u32 %v4278_v9, %v1734_v3  ;;  %v1740_v24 = vshrl.u32 %v4279_v11, %v1734_v3  ;;  %v1743_v30 = vshrl.u32 %v4280_v13, %v1734_v3 }
 0x320   :  { %v6390_v0 = vsub.s32 %v3131_v16, %v3134_v12  ;;  %v1736_v18 = vshll.u32 %v4277_v5, %v1733_v7  ;;  %v1746_v48 = vshrl.u32 %v4281_v15, %v1734_v3  ;;  %vm6396_vm15 = vcmp.le.f32.partialorder %v3071_v25, 0.7853982 }
 0x321   :  { %v1490_v40 = vmul.f32 %v1489_v28, %v1487_v42  ;;  %v3157_v54 = vsub.s32 4, %v3133_v41  ;;  %v1739_v47 = vshll.u32 %v4278_v9, %v1733_v7  ;;  %v1742_v8 = vshll.u32 %v4279_v11, %v1733_v7 }
 0x322   :  { %v3393_v17 = vadd.s32 1, %v3891_v37  ;;  %v3137_v43 = vsub.s32 0, %v6390_v0  ;;  %v1738_v58 = vor.u32 %v1737_v44, %v1736_v18  ;;  %v1745_v49 = vshll.u32 %v4280_v13, %v1733_v7 }
 0x323   :  { %v1491_v45 = vxor.u32 2147483648, %v1490_v40  ;;  %v1741_v4 = vor.u32 %v1740_v24, %v1739_v47  ;;  %v1744_v63 = vor.u32 %v1743_v30, %v1742_v8  ;;  %v1748_v57 = vshll.u32 %v4281_v15, %v1733_v7  ;;  %v6425_v30 = vpop.f32.mrb[15].mxu1 }
 0x324   :  { %v1749_v25 = vshrl.u32 %v4282_v22, %v1734_v3  ;;  %v3880_v1 = vmin.u32 %v3137_v43, %v6390_v0  ;;  %v1735_v56 = vshrl.u32 %v4277_v5, %v1734_v3  ;;  %v1747_v10 = vor.u32 %v1746_v48, %v1745_v49 }
 0x325   :  { %v1492_v6 = vsel %vm1409_vm1, %v1491_v45, %v1490_v40  ;;  %v3158_v20 = vsel %vm3073_vm0, %v3157_v54, %v3133_v41  ;;  %vm1751_vm3 = vcmp.lt.s32.totalorder %v1732_v38, 1  ;;  %vm1752_vm2 = vcmp.lt.s32.totalorder %v1732_v38, 2 }
 0x326   :  { %v1495_v16 = vsel %vm6333_vm4, %v5652_v19, %v1492_v6  ;;  %v1750_v32 = vor.u32 %v1749_v25, %v1748_v57  ;;  %v3139_v27 = vclz %v3880_v1  ;;  %vm1754_vm5 = vcmp.lt.s32.totalorder %v1732_v38, 4 }
 0x327   :  { %4213 = vcosq.f32 %v1495_v16  ;;  %vm1753_vm1 = vcmp.lt.s32.totalorder %v1732_v38, 3  ;;  %v1756_v59 = vsel %vm1754_vm5, %v1744_v63, 2102212464  ;;  %v1759_v29 = vsel %vm1751_vm3, %v1738_v58, %v1741_v4 }
 0x328   :  { %4215 = vsinq.f32 %v1495_v16  ;;  %v3881_v31 = vadd.s32 4294967294, %v3139_v27  ;;  %v1755_v52 = vsel %vm1751_vm3, %v1735_v56, %v1738_v58  ;;  %v1760_v14 = vsel %vm1754_vm5, %v1747_v10, 920167782 }
 0x329   :  { %v1763_v7 = vsel %vm1751_vm3, %v1741_v4, %v1744_v63  ;;  %v1757_v33 = vsel %vm1753_vm1, %v1741_v4, %v1756_v59  ;;  %v1761_v51 = vsel %vm1753_vm1, %v1744_v63, %v1760_v14  ;;  %v1764_v3 = vsel %vm1754_vm5, %v1750_v32, 1326507024 }
 0x32a   :  { %vm3394_vm9 = vcmp.gt.s32.totalorder %v3393_v17, 0  ;;  %vm3882_vm6 = vcmp.lt.s32.totalorder %v3881_v31, 0  ;;  %v3160_v41 = vsel %vm6396_vm15, 0, %v3158_v20  ;;  %v1762_v37 = vsel %vm1752_vm2, %v1759_v29, %v1761_v51 }
 0x32b   :  { %v1765_v42 = vsel %vm1753_vm1, %v1747_v10, %v1764_v3  ;;  %vm1503_vm4 = vcmp.eq.s32.totalorder %v6374_v46, 0  ;;  %v3142_v28 = vsel %vm3882_vm6, 0, %v3881_v31  ;;  %vm1502_vm8 = vcmp.lt.s32.totalorder %v6374_v46, 2 }
 0x32c   :  { %v1766_v12 = vsel %vm1752_vm2, %v1763_v7, %v1765_v42  ;;  %v6421_v44 = vmul.u32.u64.low %v6377_v55, %v1762_v37  ;;  %v6422_v24 = vmul.u32.u64.high %v6377_v55, %v1762_v37, %v6421_v44  ;;  %v3143_v40 = vsub.s32 32, %v3142_v28 }
 0x32d   :  { %v3147_v18 = vsub.s32 4294967266, %v3142_v28  ;;  %v1758_v48 = vsel %vm1752_vm2, %v1755_v52, %v1757_v33  ;;  %v3395_v54 = vsel %vm3394_vm9, %v3393_v17, 0  ;;  %vm1499_vm12 = vweird.f32 %v5652_v19 }
 0x32e   :  { %vm1506_vm7 = vcmp.eq.s32.totalorder %v6374_v46, 2  ;;  %v6432_v47 = vmul.u32.u64.low %v6377_v55, %v1766_v12  ;;  %v6433_v8 = vmul.u32.u64.high %v6377_v55, %v1766_v12, %v6432_v47  ;;  %v3397_v45 = vand.u32 31, %v3395_v54 }
 0x32f   :  { %v3144_v43 = vshll.u32 %v6390_v0, %v3142_v28  ;;  %v3145_v58 = vshrl.u32 %v6385_v21, %v3143_v40  ;;  %v3148_v49 = vadd.s32 127, %v3147_v18  ;;  %v3391_v4 = vor.u32 8388608, %v6381_v61 }
 0x330   :  { %v3164_v63 = vadd.s32 3, %v3160_v41  ;;  %v1774_v38 = vmul.u32 %v6377_v55, %v1758_v48  ;;  %v1777_v17 = vadd.s32 1, %v6422_v24  ;;  %v3398_v57 = vsub.s32 32, %v3397_v45 }
 0x331   :  { %v4214_v25 = vpop.eup %4213  ;;  %v3146_v6 = vor.u32 %v3145_v58, %v3144_v43  ;;  %v3149_v1 = vshll.u32 %v3148_v49, 23  ;;  %v6440_v56 = vshrl.u32 %v3395_v54, 5  ;;  %v3400_v10 = vshll.u32 %v4277_v5, %v3397_v45 }
 0x332   :  { %v4216_v16 = vpop.eup %4215  ;;  %v1507_v0 = vxor.u32 2147483648, %v4214_v25  ;;  %vm1776_vm14 = vc.u32 %v6433_v8, %v6421_v44  ;;  %v3403_v61 = vshll.u32 %v4278_v9, %v3397_v45  ;;  %v3409_v21 = vshll.u32 %v4280_v13, %v3397_v45 }
 0x333   :  { %v1504_v55 = vxor.u32 2147483648, %v4216_v16  ;;  %v3150_v20 = vor.u32 4788187, %v3149_v1  ;;  %v3153_v32 = vcvt.s32.f32 %v3146_v6  ;;  %v1778_v27 = vsel %vm1776_vm14, %v1777_v17, %v6422_v24 }
 0x334   :  { %v1508_v59 = vsel %vm1506_vm7, %v1507_v0, %v4216_v16  ;;  %v1779_v29 = vadd.s32 %v1778_v27, %v1774_v38  ;;  %v3401_v31 = vshrl.u32 %v4278_v9, %v3398_v57  ;;  %v3404_v52 = vshrl.u32 %v4279_v11, %v3398_v57 }
 0x335   :  { %v1505_v14 = vsel %vm1503_vm4, %v4214_v25, %v1504_v55  ;;  %v3151_v7 = vand.u32 2147483647, %v3150_v20  ;;  %vm1721_vm11 = vcmp.lt.s32.totalorder %v5833_v2, 0  ;;  %v3407_v33 = vshrl.u32 %v4280_v13, %v3398_v57 }
 0x336   :  { %v3410_v51 = vshrl.u32 %v4281_v15, %v3398_v57  ;;  %v1509_v3 = vsel %vm1502_vm8, %v1505_v14, %v1508_v59  ;;  %v1780_v41 = vadd.s32 536870912, %v1779_v29  ;;  %v3402_v37 = vor.u32 %v3401_v31, %v3400_v10 }
 0x337   :  { %v3406_v42 = vshll.u32 %v4279_v11, %v3397_v45  ;;  %v1510_v28 = vsel %vm1499_vm12, nan, %v1509_v3  ;;  %v3154_v12 = vmul.f32 %v3153_v32, %v3151_v7  ;;  %v3405_v24 = vor.u32 %v3404_v52, %v3403_v61 }
 0x338   :  { %v3411_v40 = vor.u32 %v3410_v51, %v3409_v21  ;;  %3705 = vst [vmem:[#allocation2 + $0x50] sm:$0xff] %v1510_v28  ;;  %v1781_v18 = vshrl.u32 %v1780_v41, 30  ;;  %v3413_v48 = vshrl.u32 %v4282_v22, %v3398_v57  ;;  %v6463_v54 = vshll.u32 %v3391_v4, 8 }
 0x339   :  { %v1615_v47 = vand.u32 2147483647, %v5996_v26  ;;  %v3155_v46 = vxor.u32 2147483648, %v3154_v12  ;;  %v6466_v43 = vand.u32 3, %v3164_v63  ;;  %v3408_v58 = vor.u32 %v3407_v33, %v3406_v42 }
 0x33a   :  { %v3412_v49 = vshll.u32 %v4281_v15, %v3397_v45  ;;  %v1782_v38 = vshll.u32 %v1781_v18, 30  ;;  %v1805_v19 = vsub.s32 4, %v1781_v18  ;;  %vm3415_vm10 = vcmp.lt.s32.totalorder %v6440_v56, 1 }
 0x33b   :  { %vm3418_vm13 = vcmp.lt.s32.totalorder %v6440_v56, 4  ;;  %v3156_v17 = vsel %vm3073_vm0, %v3155_v46, %v3154_v12  ;;  %v3423_v4 = vsel %vm3415_vm10, %v3402_v37, %v3405_v24  ;;  %v3399_v1 = vshrl.u32 %v4277_v5, %v3398_v57 }
 0x33c   :  { %v3414_v25 = vor.u32 %v3413_v48, %v3412_v49  ;;  %v3424_v63 = vsel %vm3418_vm13, %v3411_v40, 920167782  ;;  %v3159_v45 = vsel %vm6396_vm15, %v5733_v62, %v3156_v17  ;;  %v6480_v6 = vsub.s32 %v1779_v29, %v1782_v38 }
 0x33d   :  { %vm3417_vm3 = vcmp.lt.s32.totalorder %v6440_v56, 3  ;;  %4217 = vcosq.f32 %v3159_v45  ;;  %vm3416_vm0 = vcmp.lt.s32.totalorder %v6440_v56, 2  ;;  %v3420_v10 = vsel %vm3418_vm13, %v3408_v58, 2102212464 }
 0x33e   :  { %v3425_v16 = vsel %vm3417_vm3, %v3408_v58, %v3424_v63  ;;  %4219 = vsinq.f32 %v3159_v45  ;;  %v1785_v0 = vsub.s32 0, %v6480_v6  ;;  %v1806_v60 = vsel %vm1721_vm11, %v1805_v19, %v1781_v18 }
 0x33f   :  { %v3426_v61 = vsel %vm3416_vm0, %v3423_v4, %v3425_v16  ;;  %v3427_v57 = vsel %vm3415_vm10, %v3405_v24, %v3408_v58  ;;  %v3428_v21 = vsel %vm3418_vm13, %v3414_v25, 1326507024  ;;  %v3419_v27 = vsel %vm3415_vm10, %v3399_v1, %v3402_v37 }
 0x340   :  { %v6497_v55 = vmul.u32.u64.low %v6463_v54, %v3426_v61  ;;  %v6498_v20 = vmul.u32.u64.high %v6463_v54, %v3426_v61, %v6497_v55  ;;  %v3828_v32 = vmin.u32 %v1785_v0, %v6480_v6  ;;  %v3421_v59 = vsel %vm3417_vm3, %v3405_v24, %v3420_v10 }
 0x341   :  { %v3429_v29 = vsel %vm3417_vm3, %v3411_v40, %v3428_v21  ;;  %vm6506_vm15 = vcmp.le.f32.partialorder %v1719_v50, 0.7853982  ;;  %v1618_v14 = vand.u32 2139095040, %v5996_v26  ;;  %v3422_v51 = vsel %vm3416_vm0, %v3419_v27, %v3421_v59 }
 0x342   :  { %v3430_v52 = vsel %vm3416_vm0, %v3427_v57, %v3429_v29  ;;  %v1787_v7 = vclz %v3828_v32  ;;  %v1808_v33 = vsel %vm6506_vm15, 0, %v1806_v60  ;;  %vm3163_vm2 = vweird.f32 %v5733_v62 }
 0x343   :  { %v6518_v3 = vmul.u32.u64.low %v6463_v54, %v3430_v52  ;;  %v6519_v41 = vmul.u32.u64.high %v6463_v54, %v3430_v52, %v6518_v3  ;;  %v1619_v50 = vshrl.u32 %v1618_v14, 23  ;;  %vm3166_vm5 = vcmp.lt.s32.totalorder %v6466_v43, 2 }
 0x344   :  { %v3829_v37 = vadd.s32 4294967294, %v1787_v7  ;;  %v1622_v42 = vand.u32 8388607, %v1615_v47  ;;  %vm3167_vm1 = vcmp.eq.s32.totalorder %v6466_v43, 0  ;;  %vm3170_vm9 = vcmp.eq.s32.totalorder %v6466_v43, 2 }
 0x345   :  { %v3441_v56 = vadd.s32 1, %v6498_v20  ;;  %v3823_v28 = vadd.s32 4294967169, %v1619_v50  ;;  %v1775_v12 = vadd.s32 %v6421_v44, %v6433_v8  ;;  %v1812_v24 = vadd.s32 3, %v1808_v33 }
 0x346   :  { %vm3830_vm6 = vcmp.lt.s32.totalorder %v3829_v37, 0  ;;  %v3438_v40 = vmul.u32 %v6463_v54, %v3422_v51  ;;  %vm3440_vm4 = vc.u32 %v6519_v41, %v6497_v55  ;;  %v3282_v58 = vand.u32 2139095040, %v6079_v35 }
 0x347   :  { %v4218_v18 = vpop.eup %4217  ;;  %v1790_v48 = vsel %vm3830_vm6, 0, %v3829_v37  ;;  %v1625_v46 = vadd.s32 1, %v3823_v28  ;;  %v1623_v25 = vor.u32 8388608, %v1622_v42  ;;  %v3442_v8 = vsel %vm3440_vm4, %v3441_v56, %v6498_v20 }
 0x348   :  { %v4220_v49 = vpop.eup %4219  ;;  %v3171_v38 = vxor.u32 2147483648, %v4218_v18  ;;  %v1791_v19 = vsub.s32 32, %v1790_v48  ;;  %v1795_v17 = vsub.s32 4294967266, %v1790_v48  ;;  %v1792_v44 = vshll.u32 %v6480_v6, %v1790_v48 }
 0x349   :  { %v3168_v4 = vxor.u32 2147483648, %v4220_v49  ;;  %vm1626_vm8 = vcmp.gt.s32.totalorder %v1625_v46, 0  ;;  %v3443_v1 = vadd.s32 %v3442_v8, %v3438_v40  ;;  %v3279_v0 = vand.u32 2147483647, %v6079_v35 }
 0x34a   :  { %v3172_v54 = vsel %vm3170_vm9, %v3171_v38, %v4220_v49  ;;  %v1793_v63 = vshrl.u32 %v1775_v12, %v1791_v19  ;;  %v1796_v45 = vadd.s32 127, %v1795_v17  ;;  %v1627_v16 = vsel %vm1626_vm8, %v1625_v46, 0 }
 0x34b   :  { %v3169_v10 = vsel %vm3167_vm1, %v4218_v18, %v3168_v4  ;;  %v3283_v60 = vshrl.u32 %v3282_v58, 23  ;;  %v3444_v21 = vadd.s32 536870912, %v3443_v1  ;;  %v1629_v32 = vand.u32 31, %v1627_v16 }
 0x34c   :  { %v3173_v61 = vsel %vm3166_vm5, %v3169_v10, %v3172_v54  ;;  %v1794_v6 = vor.u32 %v1793_v63, %v1792_v44  ;;  %v1797_v57 = vshll.u32 %v1796_v45, 23  ;;  %v6545_v59 = vand.u32 3, %v1812_v24 }
 0x34d   :  { %v3174_v20 = vsel %vm3163_vm2, nan, %v3173_v61  ;;  %vm3385_vm12 = vcmp.lt.s32.totalorder %v5906_v23, 0  ;;  %v3445_v29 = vshrl.u32 %v3444_v21, 30  ;;  %v1630_v52 = vsub.s32 32, %v1629_v32 }
 0x34e   :  { %3721 = vst [vmem:[#allocation2 + $0xd0] sm:$0xff] %v3174_v20  ;;  %v1798_v27 = vor.u32 4788187, %v1797_v57  ;;  %v6548_v14 = vshll.u32 %v1623_v25, 8  ;;  %v3887_v7 = vadd.s32 4294967169, %v3283_v60  ;;  %v1801_v51 = vcvt.s32.f32 %v1794_v6 }
 0x34f   :  { %v6552_v43 = vand.u32 8388607, %v3279_v0  ;;  %v6556_v62 = vadd.s32 %v6497_v55, %v6519_v41  ;;  %v3446_v3 = vshll.u32 %v3445_v29, 30  ;;  %v1628_v50 = vshrl.u32 %v1627_v16, 5 }
 0x350   :  { %v1799_v33 = vand.u32 2147483647, %v1798_v27  ;;  %v1633_v37 = vshrl.u32 %v4278_v9, %v1630_v52  ;;  %v1636_v42 = vshrl.u32 %v4279_v11, %v1630_v52  ;;  %v1639_v56 = vshrl.u32 %v4280_v13, %v1630_v52 }
 0x351   :  { %v6561_v12 = vsub.s32 %v3443_v1, %v3446_v3  ;;  %v1632_v24 = vshll.u32 %v4277_v5, %v1629_v32  ;;  %v1642_v40 = vshrl.u32 %v4281_v15, %v1630_v52  ;;  %vm6567_vm7 = vcmp.le.f32.partialorder %v3383_v39, 0.7853982 }
 0x352   :  { %v1802_v28 = vmul.f32 %v1801_v51, %v1799_v33  ;;  %v3469_v41 = vsub.s32 4, %v3445_v29  ;;  %v1635_v18 = vshll.u32 %v4278_v9, %v1629_v32  ;;  %v1638_v48 = vshll.u32 %v4279_v11, %v1629_v32 }
 0x353   :  { %v3289_v46 = vadd.s32 1, %v3887_v7  ;;  %v3449_v49 = vsub.s32 0, %v6561_v12  ;;  %v1634_v38 = vor.u32 %v1633_v37, %v1632_v24  ;;  %v1641_v19 = vshll.u32 %v4280_v13, %v1629_v32 }
 0x354   :  { %v1803_v58 = vxor.u32 2147483648, %v1802_v28  ;;  %v1637_v17 = vor.u32 %v1636_v42, %v1635_v18  ;;  %v1640_v25 = vor.u32 %v1639_v56, %v1638_v48  ;;  %v1644_v4 = vshll.u32 %v4281_v15, %v1629_v32 }
 0x355   :  { %v1645_v39 = vshrl.u32 %v4282_v22, %v1630_v52  ;;  %v3892_v8 = vmin.u32 %v3449_v49, %v6561_v12  ;;  %v1631_v54 = vshrl.u32 %v4277_v5, %v1630_v52  ;;  %v1643_v63 = vor.u32 %v1642_v40, %v1641_v19 }
 0x356   :  { %v1804_v44 = vsel %vm1721_vm11, %v1803_v58, %v1802_v28  ;;  %v3470_v1 = vsel %vm3385_vm12, %v3469_v41, %v3445_v29  ;;  %vm1647_vm14 = vcmp.lt.s32.totalorder %v1628_v50, 1  ;;  %vm1648_vm10 = vcmp.lt.s32.totalorder %v1628_v50, 2 }
 0x357   :  { %v1807_v45 = vsel %vm6506_vm15, %v5833_v2, %v1804_v44  ;;  %v1646_v10 = vor.u32 %v1645_v39, %v1644_v4  ;;  %v3451_v16 = vclz %v3892_v8  ;;  %vm1650_vm13 = vcmp.lt.s32.totalorder %v1628_v50, 4 }
 0x358   :  { %4221 = vcosq.f32 %v1807_v45  ;;  %vm1649_vm11 = vcmp.lt.s32.totalorder %v1628_v50, 3  ;;  %v1652_v60 = vsel %vm1650_vm13, %v1640_v25, 2102212464  ;;  %v1655_v61 = vsel %vm1647_vm14, %v1634_v38, %v1637_v17 }
 0x359   :  { %4223 = vsinq.f32 %v1807_v45  ;;  %v3893_v6 = vadd.s32 4294967294, %v3451_v16  ;;  %v1651_v57 = vsel %vm1647_vm14, %v1631_v54, %v1634_v38  ;;  %v1656_v21 = vsel %vm1650_vm13, %v1643_v63, 920167782 }
 0x35a   :  { %v1659_v20 = vsel %vm1647_vm14, %v1637_v17, %v1640_v25  ;;  %v1653_v32 = vsel %vm1649_vm11, %v1637_v17, %v1652_v60  ;;  %v1657_v31 = vsel %vm1649_vm11, %v1640_v25, %v1656_v21  ;;  %v1660_v27 = vsel %vm1650_vm13, %v1646_v10, 1326507024 }
 0x35b   :  { %vm3290_vm3 = vcmp.gt.s32.totalorder %v3289_v46, 0  ;;  %vm3894_vm0 = vcmp.lt.s32.totalorder %v3893_v6, 0  ;;  %v3472_v29 = vsel %vm6567_vm7, 0, %v3470_v1  ;;  %v1658_v52 = vsel %vm1648_vm10, %v1655_v61, %v1657_v31 }
 0x35c   :  { %v1661_v7 = vsel %vm1649_vm11, %v1643_v63, %v1660_v27  ;;  %vm1815_vm15 = vcmp.eq.s32.totalorder %v6545_v59, 0  ;;  %v3454_v33 = vsel %vm3894_vm0, 0, %v3893_v6  ;;  %vm1814_vm2 = vcmp.lt.s32.totalorder %v6545_v59, 2 }
 0x35d   :  { %v1662_v51 = vsel %vm1648_vm10, %v1659_v20, %v1661_v7  ;;  %v6592_v3 = vmul.u32.u64.low %v6548_v14, %v1658_v52  ;;  %v6593_v37 = vmul.u32.u64.high %v6548_v14, %v1658_v52, %v6592_v3  ;;  %v3455_v42 = vsub.s32 32, %v3454_v33 }
 0x35e   :  { %v3459_v56 = vsub.s32 4294967266, %v3454_v33  ;;  %v1654_v28 = vsel %vm1648_vm10, %v1651_v57, %v1653_v32  ;;  %v3291_v24 = vsel %vm3290_vm3, %v3289_v46, 0  ;;  %vm1811_vm5 = vweird.f32 %v5833_v2 }
 0x35f   :  { %vm1818_vm1 = vcmp.eq.s32.totalorder %v6545_v59, 2  ;;  %v6601_v40 = vmul.u32.u64.low %v6548_v14, %v1662_v51  ;;  %v6602_v41 = vmul.u32.u64.high %v6548_v14, %v1662_v51, %v6601_v40  ;;  %v3293_v18 = vand.u32 31, %v3291_v24 }
 0x360   :  { %v3456_v48 = vshll.u32 %v6561_v12, %v3454_v33  ;;  %v3457_v58 = vshrl.u32 %v6556_v62, %v3455_v42  ;;  %v3460_v49 = vadd.s32 127, %v3459_v56  ;;  %v3287_v38 = vor.u32 8388608, %v6552_v43 }
 0x361   :  { %v3476_v19 = vadd.s32 3, %v3472_v29  ;;  %v1670_v50 = vmul.u32 %v6548_v14, %v1654_v28  ;;  %v1673_v46 = vadd.s32 1, %v6593_v37  ;;  %v3294_v17 = vsub.s32 32, %v3293_v18 }
 0x362   :  { %v4222_v25 = vpop.eup %4221  ;;  %v3458_v4 = vor.u32 %v3457_v58, %v3456_v48  ;;  %v3461_v39 = vshll.u32 %v3460_v49, 23  ;;  %v6609_v44 = vshrl.u32 %v3291_v24, 5  ;;  %v3296_v8 = vshll.u32 %v4277_v5, %v3293_v18 }
 0x363   :  { %v4224_v54 = vpop.eup %4223  ;;  %v1819_v12 = vxor.u32 2147483648, %v4222_v25  ;;  %vm1672_vm9 = vc.u32 %v6602_v41, %v6592_v3  ;;  %v3299_v43 = vshll.u32 %v4278_v9, %v3293_v18  ;;  %v3305_v62 = vshll.u32 %v4280_v13, %v3293_v18 }
 0x364   :  { %v1816_v14 = vxor.u32 2147483648, %v4224_v54  ;;  %v3462_v63 = vor.u32 4788187, %v3461_v39  ;;  %v3465_v45 = vcvt.s32.f32 %v3458_v4  ;;  %v1674_v1 = vsel %vm1672_vm9, %v1673_v46, %v6593_v37 }
 0x365   :  { %v1820_v10 = vsel %vm1818_vm1, %v1819_v12, %v4224_v54  ;;  %v1675_v16 = vadd.s32 %v1674_v1, %v1670_v50  ;;  %v3297_v60 = vshrl.u32 %v4278_v9, %v3294_v17  ;;  %v3300_v61 = vshrl.u32 %v4279_v11, %v3294_v17 }
 0x366   :  { %v1817_v6 = vsel %vm1815_vm15, %v4222_v25, %v1816_v14  ;;  %v3463_v57 = vand.u32 2147483647, %v3462_v63  ;;  %vm1617_vm6 = vcmp.lt.s32.totalorder %v5996_v26, 0  ;;  %v3303_v21 = vshrl.u32 %v4280_v13, %v3294_v17 }
 0x367   :  { %v3306_v20 = vshrl.u32 %v4281_v15, %v3294_v17  ;;  %v1821_v32 = vsel %vm1814_vm2, %v1817_v6, %v1820_v10  ;;  %v1676_v31 = vadd.s32 536870912, %v1675_v16  ;;  %v3298_v27 = vor.u32 %v3297_v60, %v3296_v8 }
 0x368   :  { %v3302_v29 = vshll.u32 %v4279_v11, %v3293_v18  ;;  %v1822_v52 = vsel %vm1811_vm5, nan, %v1821_v32  ;;  %v3466_v7 = vmul.f32 %v3465_v45, %v3463_v57  ;;  %v3301_v33 = vor.u32 %v3300_v61, %v3299_v43 }
 0x369   :  { %v3307_v51 = vor.u32 %v3306_v20, %v3305_v62  ;;  %3708 = vst [vmem:[#allocation2 + $0x68] sm:$0xff] %v1822_v52  ;;  %v1677_v37 = vshrl.u32 %v1676_v31, 30  ;;  %v3309_v42 = vshrl.u32 %v4282_v22, %v3294_v17  ;;  %v6632_v56 = vshll.u32 %v3287_v38, 8 }
 0x36a   :  { %v1927_v28 = vand.u32 2147483647, %v6179_v36  ;;  %v3467_v59 = vxor.u32 2147483648, %v3466_v7  ;;  %v6635_v24 = vand.u32 3, %v3476_v19  ;;  %v3304_v40 = vor.u32 %v3303_v21, %v3302_v29 }
 0x36b   :  { %v3308_v48 = vshll.u32 %v4281_v15, %v3293_v18  ;;  %v1678_v58 = vshll.u32 %v1677_v37, 30  ;;  %v1701_v2 = vsub.s32 4, %v1677_v37  ;;  %vm3311_vm4 = vcmp.lt.s32.totalorder %v6609_v44, 1 }
 0x36c   :  { %vm3314_vm8 = vcmp.lt.s32.totalorder %v6609_v44, 4  ;;  %v3468_v49 = vsel %vm3385_vm12, %v3467_v59, %v3466_v7  ;;  %v3319_v38 = vsel %vm3311_vm4, %v3298_v27, %v3301_v33  ;;  %v3295_v25 = vshrl.u32 %v4277_v5, %v3294_v17 }
 0x36d   :  { %v3310_v50 = vor.u32 %v3309_v42, %v3308_v48  ;;  %v3320_v19 = vsel %vm3314_vm8, %v3307_v51, 920167782  ;;  %v3471_v18 = vsel %vm6567_vm7, %v5906_v23, %v3468_v49  ;;  %v6649_v46 = vsub.s32 %v1675_v16, %v1678_v58 }
 0x36e   :  { %vm3313_vm14 = vcmp.lt.s32.totalorder %v6609_v44, 3  ;;  %4225 = vcosq.f32 %v3471_v18  ;;  %vm3312_vm12 = vcmp.lt.s32.totalorder %v6609_v44, 2  ;;  %v3316_v4 = vsel %vm3314_vm8, %v3304_v40, 2102212464 }
 0x36f   :  { %v3321_v39 = vsel %vm3313_vm14, %v3304_v40, %v3320_v19  ;;  %4227 = vsinq.f32 %v3471_v18  ;;  %v1681_v8 = vsub.s32 0, %v6649_v46  ;;  %v1702_v55 = vsel %vm1617_vm6, %v1701_v2, %v1677_v37 }
 0x370   :  { %v3322_v54 = vsel %vm3312_vm12, %v3319_v38, %v3321_v39  ;;  %v3323_v17 = vsel %vm3311_vm4, %v3301_v33, %v3304_v40  ;;  %v3324_v12 = vsel %vm3314_vm8, %v3310_v50, 1326507024  ;;  %v3315_v63 = vsel %vm3311_vm4, %v3295_v25, %v3298_v27 }
 0x371   :  { %v6666_v43 = vmul.u32.u64.low %v6632_v56, %v3322_v54  ;;  %v6667_v62 = vmul.u32.u64.high %v6632_v56, %v3322_v54, %v6666_v43  ;;  %v3824_v14 = vmin.u32 %v1681_v8, %v6649_v46  ;;  %v3317_v45 = vsel %vm3313_vm14, %v3301_v33, %v3316_v4 }
 0x372   :  { %v3325_v1 = vsel %vm3313_vm14, %v3307_v51, %v3324_v12  ;;  %vm6675_vm7 = vcmp.le.f32.partialorder %v1615_v47, 0.7853982  ;;  %v1930_v60 = vand.u32 2139095040, %v6179_v36  ;;  %v3318_v57 = vsel %vm3312_vm12, %v3315_v63, %v3317_v45 }
 0x373   :  { %v3326_v16 = vsel %vm3312_vm12, %v3323_v17, %v3325_v1  ;;  %v1683_v61 = vclz %v3824_v14  ;;  %v1704_v6 = vsel %vm6675_vm7, 0, %v1702_v55  ;;  %vm3475_vm10 = vweird.f32 %v5906_v23 }
 0x374   :  { %v6687_v21 = vmul.u32.u64.low %v6632_v56, %v3326_v16  ;;  %v6688_v20 = vmul.u32.u64.high %v6632_v56, %v3326_v16, %v6687_v21  ;;  %v1931_v47 = vshrl.u32 %v1930_v60, 23  ;;  %vm3478_vm13 = vcmp.lt.s32.totalorder %v6635_v24, 2 }
 0x375   :  { %v3825_v32 = vadd.s32 4294967294, %v1683_v61  ;;  %v1934_v31 = vand.u32 8388607, %v1927_v28  ;;  %vm3479_vm11 = vcmp.eq.s32.totalorder %v6635_v24, 0  ;;  %vm3482_vm3 = vcmp.eq.s32.totalorder %v6635_v24, 2 }
 0x376   :  { %v3337_v44 = vadd.s32 1, %v6667_v62  ;;  %v3835_v27 = vadd.s32 4294967169, %v1931_v47  ;;  %v1671_v29 = vadd.s32 %v6592_v3, %v6602_v41  ;;  %v1708_v52 = vadd.s32 3, %v1704_v6 }
 0x377   :  { %vm3826_vm0 = vcmp.lt.s32.totalorder %v3825_v32, 0  ;;  %v3334_v7 = vmul.u32 %v6632_v56, %v3318_v57  ;;  %vm3336_vm15 = vc.u32 %v6688_v20, %v6666_v43  ;;  %v3594_v42 = vand.u32 2139095040, %v6252_v53 }
 0x378   :  { %v4226_v33 = vpop.eup %4225  ;;  %v1686_v51 = vsel %vm3826_vm0, 0, %v3825_v32  ;;  %v1937_v37 = vadd.s32 1, %v3835_v27  ;;  %v1935_v2 = vor.u32 8388608, %v1934_v31  ;;  %v3338_v41 = vsel %vm3336_vm15, %v3337_v44, %v6667_v62 }
 0x379   :  { %v4228_v59 = vpop.eup %4227  ;;  %v3483_v40 = vxor.u32 2147483648, %v4226_v33  ;;  %v1687_v48 = vsub.s32 32, %v1686_v51  ;;  %v1691_v58 = vsub.s32 4294967266, %v1686_v51  ;;  %v1688_v3 = vshll.u32 %v6649_v46, %v1686_v51 }
 0x37a   :  { %v3480_v49 = vxor.u32 2147483648, %v4228_v59  ;;  %vm1938_vm2 = vcmp.gt.s32.totalorder %v1937_v37, 0  ;;  %v3339_v19 = vadd.s32 %v3338_v41, %v3334_v7  ;;  %v3591_v4 = vand.u32 2147483647, %v6252_v53 }
 0x37b   :  { %v3484_v56 = vsel %vm3482_vm3, %v3483_v40, %v4228_v59  ;;  %v1689_v50 = vshrl.u32 %v1671_v29, %v1687_v48  ;;  %v1692_v38 = vadd.s32 127, %v1691_v58  ;;  %v1939_v25 = vsel %vm1938_vm2, %v1937_v37, 0 }
 0x37c   :  { %v3481_v18 = vsel %vm3479_vm11, %v4226_v33, %v3480_v49  ;;  %v3595_v39 = vshrl.u32 %v3594_v42, 23  ;;  %v3340_v54 = vadd.s32 536870912, %v3339_v19  ;;  %v1941_v12 = vand.u32 31, %v1939_v25 }
 0x37d   :  { %v3485_v8 = vsel %vm3478_vm13, %v3481_v18, %v3484_v56  ;;  %v1690_v46 = vor.u32 %v1689_v50, %v1688_v3  ;;  %v1693_v55 = vshll.u32 %v1692_v38, 23  ;;  %v6714_v14 = vand.u32 3, %v1708_v52 }
 0x37e   :  { %v3486_v17 = vsel %vm3475_vm10, nan, %v3485_v8  ;;  %vm3281_vm5 = vcmp.lt.s32.totalorder %v6079_v35, 0  ;;  %v3341_v63 = vshrl.u32 %v3340_v54, 30  ;;  %v1942_v45 = vsub.s32 32, %v1941_v12 }
 0x37f   :  { %3724 = vst [vmem:[#allocation2 + $0xe8] sm:$0xff] %v3486_v17  ;;  %v1694_v62 = vor.u32 4788187, %v1693_v55  ;;  %v6717_v1 = vshll.u32 %v1935_v2, 8  ;;  %v3899_v16 = vadd.s32 4294967169, %v3595_v39  ;;  %v1697_v61 = vcvt.s32.f32 %v1690_v46 }
 0x380   :  { %v6721_v24 = vand.u32 8388607, %v3591_v4  ;;  %v6725_v23 = vadd.s32 %v6666_v43, %v6688_v20  ;;  %v3342_v6 = vshll.u32 %v3341_v63, 30  ;;  %v1940_v57 = vshrl.u32 %v1939_v25, 5 }
 0x381   :  { %v1695_v60 = vand.u32 2147483647, %v1694_v62  ;;  %v1945_v21 = vshrl.u32 %v4278_v9, %v1942_v45  ;;  %v1948_v47 = vshrl.u32 %v4279_v11, %v1942_v45  ;;  %v1951_v32 = vshrl.u32 %v4280_v13, %v1942_v45 }
 0x382   :  { %v6730_v44 = vsub.s32 %v3339_v19, %v3342_v6  ;;  %v1944_v27 = vshll.u32 %v4277_v5, %v1941_v12  ;;  %v1954_v29 = vshrl.u32 %v4281_v15, %v1942_v45  ;;  %vm6736_vm1 = vcmp.le.f32.partialorder %v3279_v0, 0.7853982 }
 0x383   :  { %v1698_v31 = vmul.f32 %v1697_v61, %v1695_v60  ;;  %v3365_v20 = vsub.s32 4, %v3341_v63  ;;  %v1947_v52 = vshll.u32 %v4278_v9, %v1941_v12  ;;  %v1950_v7 = vshll.u32 %v4279_v11, %v1941_v12 }
 0x384   :  { %v3601_v33 = vadd.s32 1, %v3899_v16  ;;  %v3345_v37 = vsub.s32 0, %v6730_v44  ;;  %v1946_v42 = vor.u32 %v1945_v21, %v1944_v27  ;;  %v1953_v59 = vshll.u32 %v4280_v13, %v1941_v12 }
 0x385   :  { %v1699_v51 = vxor.u32 2147483648, %v1698_v31  ;;  %v1949_v40 = vor.u32 %v1948_v47, %v1947_v52  ;;  %v1952_v48 = vor.u32 %v1951_v32, %v1950_v7  ;;  %v1956_v58 = vshll.u32 %v4281_v15, %v1941_v12 }
 0x386   :  { %v1957_v0 = vshrl.u32 %v4282_v22, %v1942_v45  ;;  %v3888_v49 = vmin.u32 %v3345_v37, %v6730_v44  ;;  %v1943_v3 = vshrl.u32 %v4277_v5, %v1942_v45  ;;  %v1955_v41 = vor.u32 %v1954_v29, %v1953_v59 }
 0x387   :  { %v1700_v2 = vsel %vm1617_vm6, %v1699_v51, %v1698_v31  ;;  %v3366_v50 = vsel %vm3281_vm5, %v3365_v20, %v3341_v63  ;;  %vm1959_vm9 = vcmp.lt.s32.totalorder %v1940_v57, 1  ;;  %vm1960_vm4 = vcmp.lt.s32.totalorder %v1940_v57, 2 }
 0x388   :  { %v1703_v56 = vsel %vm6675_vm7, %v5996_v26, %v1700_v2  ;;  %v1958_v38 = vor.u32 %v1957_v0, %v1956_v58  ;;  %v3347_v19 = vclz %v3888_v49  ;;  %vm1962_vm8 = vcmp.lt.s32.totalorder %v1940_v57, 4 }
 0x389   :  { %4229 = vcosq.f32 %v1703_v56  ;;  %vm1961_vm6 = vcmp.lt.s32.totalorder %v1940_v57, 3  ;;  %v1964_v18 = vsel %vm1962_vm8, %v1952_v48, 2102212464  ;;  %v1967_v25 = vsel %vm1959_vm9, %v1946_v42, %v1949_v40 }
 0x38a   :  { %4231 = vsinq.f32 %v1703_v56  ;;  %v3889_v39 = vadd.s32 4294967294, %v3347_v19  ;;  %v1963_v8 = vsel %vm1959_vm9, %v1943_v3, %v1946_v42  ;;  %v1968_v46 = vsel %vm1962_vm8, %v1955_v41, 920167782 }
 0x38b   :  { %v1971_v55 = vsel %vm1959_vm9, %v1949_v40, %v1952_v48  ;;  %v1965_v54 = vsel %vm1961_vm6, %v1949_v40, %v1964_v18  ;;  %v1969_v10 = vsel %vm1961_vm6, %v1952_v48, %v1968_v46  ;;  %v1972_v17 = vsel %vm1962_vm8, %v1958_v38, 1326507024 }
 0x38c   :  { %vm3602_vm14 = vcmp.gt.s32.totalorder %v3601_v33, 0  ;;  %vm3890_vm12 = vcmp.lt.s32.totalorder %v3889_v39, 0  ;;  %v3368_v12 = vsel %vm6736_vm1, 0, %v3366_v50  ;;  %v1970_v62 = vsel %vm1960_vm4, %v1967_v25, %v1969_v10 }
 0x38d   :  { %v1973_v63 = vsel %vm1961_vm6, %v1955_v41, %v1972_v17  ;;  %vm1711_vm7 = vcmp.eq.s32.totalorder %v6714_v14, 0  ;;  %v3350_v45 = vsel %vm3890_vm12, 0, %v3889_v39  ;;  %vm1710_vm10 = vcmp.lt.s32.totalorder %v6714_v14, 2 }
 0x38e   :  { %v1974_v16 = vsel %vm1960_vm4, %v1971_v55, %v1973_v63  ;;  %v6761_v60 = vmul.u32.u64.low %v6717_v1, %v1970_v62  ;;  %v6762_v61 = vmul.u32.u64.high %v6717_v1, %v1970_v62, %v6761_v60  ;;  %v3351_v6 = vsub.s32 32, %v3350_v45 }
 0x38f   :  { %v3355_v21 = vsub.s32 4294967266, %v3350_v45  ;;  %v1966_v47 = vsel %vm1960_vm4, %v1963_v8, %v1965_v54  ;;  %v3603_v32 = vsel %vm3602_vm14, %v3601_v33, 0  ;;  %vm1707_vm13 = vweird.f32 %v5996_v26 }
 0x390   :  { %vm1714_vm11 = vcmp.eq.s32.totalorder %v6714_v14, 2  ;;  %v6770_v31 = vmul.u32.u64.low %v6717_v1, %v1974_v16  ;;  %v6771_v27 = vmul.u32.u64.high %v6717_v1, %v1974_v16, %v6770_v31  ;;  %v3605_v29 = vand.u32 31, %v3603_v32 }
 0x391   :  { %v3352_v20 = vshll.u32 %v6730_v44, %v3350_v45  ;;  %v3353_v52 = vshrl.u32 %v6725_v23, %v3351_v6  ;;  %v3356_v7 = vadd.s32 127, %v3355_v21  ;;  %v3599_v51 = vor.u32 8388608, %v6721_v24 }
 0x392   :  { %v3372_v37 = vadd.s32 3, %v3368_v12  ;;  %v1982_v57 = vmul.u32 %v6717_v1, %v1966_v47  ;;  %v1985_v33 = vadd.s32 1, %v6762_v61  ;;  %v3606_v42 = vsub.s32 32, %v3605_v29 }
 0x393   :  { %v4230_v59 = vpop.eup %4229  ;;  %v3354_v40 = vor.u32 %v3353_v52, %v3352_v20  ;;  %v3357_v48 = vshll.u32 %v3356_v7, 23  ;;  %v6778_v58 = vshrl.u32 %v3603_v32, 5  ;;  %v3608_v0 = vshll.u32 %v4277_v5, %v3605_v29 }
 0x394   :  { %v4232_v2 = vpop.eup %4231  ;;  %v1715_v44 = vxor.u32 2147483648, %v4230_v59  ;;  %vm1984_vm3 = vc.u32 %v6771_v27, %v6761_v60  ;;  %v3611_v24 = vshll.u32 %v4278_v9, %v3605_v29  ;;  %v3617_v23 = vshll.u32 %v4280_v13, %v3605_v29 }
 0x395   :  { %v1712_v1 = vxor.u32 2147483648, %v4232_v2  ;;  %v3358_v49 = vor.u32 4788187, %v3357_v48  ;;  %v3361_v3 = vcvt.s32.f32 %v3354_v40  ;;  %v1986_v41 = vsel %vm1984_vm3, %v1985_v33, %v6762_v61 }
 0x396   :  { %v1716_v56 = vsel %vm1714_vm11, %v1715_v44, %v4232_v2  ;;  %v1987_v50 = vadd.s32 %v1986_v41, %v1982_v57  ;;  %v3609_v38 = vshrl.u32 %v4278_v9, %v3606_v42  ;;  %v3612_v19 = vshrl.u32 %v4279_v11, %v3606_v42 }
 0x397   :  { %v1713_v18 = vsel %vm1711_vm7, %v4230_v59, %v1712_v1  ;;  %v3359_v25 = vand.u32 2147483647, %v3358_v49  ;;  %v3615_v39 = vshrl.u32 %v4280_v13, %v3606_v42  ;;  %v3618_v8 = vshrl.u32 %v4281_v15, %v3606_v42 }
 0x398   :  { %v1717_v46 = vsel %vm1710_vm10, %v1713_v18, %v1716_v56  ;;  %v1988_v55 = vadd.s32 536870912, %v1987_v50  ;;  %v3610_v54 = vor.u32 %v3609_v38, %v3608_v0  ;;  %v3614_v10 = vshll.u32 %v4279_v11, %v3605_v29 }
 0x399   :  { %v1718_v17 = vsel %vm1707_vm13, nan, %v1717_v46  ;;  %v3362_v12 = vmul.f32 %v3361_v3, %v3359_v25  ;;  %v3613_v62 = vor.u32 %v3612_v19, %v3611_v24  ;;  %v3619_v63 = vor.u32 %v3618_v8, %v3617_v23 }
 0x39a   :  { %3707 = vst [vmem:[#allocation2 + $0x60] sm:$0xff] %v1718_v17  ;;  %v1989_v45 = vshrl.u32 %v1988_v55, 30  ;;  %v3621_v16 = vshrl.u32 %v4282_v22, %v3606_v42  ;;  %v3616_v6 = vor.u32 %v3615_v39, %v3614_v10  ;;  %v3620_v21 = vshll.u32 %v4281_v15, %v3605_v29 }
 0x39b   :  { %v3363_v61 = vxor.u32 2147483648, %v3362_v12  ;;  %v6801_v14 = vshll.u32 %v3599_v51, 8  ;;  %v6803_v47 = vand.u32 3, %v3372_v37  ;;  %vm3623_vm0 = vcmp.lt.s32.totalorder %v6778_v58, 1 }
 0x39c   :  { %v1990_v32 = vshll.u32 %v1989_v45, 30  ;;  %vm3626_vm15 = vcmp.lt.s32.totalorder %v6778_v58, 4  ;;  %v3622_v31 = vor.u32 %v3621_v16, %v3620_v21  ;;  %v3631_v20 = vsel %vm3623_vm0, %v3610_v54, %v3613_v62 }
 0x39d   :  { %v3364_v26 = vsel %vm3281_vm5, %v3363_v61, %v3362_v12  ;;  %v3632_v52 = vsel %vm3626_vm15, %v3619_v63, 920167782  ;;  %v3607_v51 = vshrl.u32 %v4277_v5, %v3606_v42  ;;  %vm3625_vm2 = vcmp.lt.s32.totalorder %v6778_v58, 3 }
 0x39e   :  { %v3367_v29 = vsel %vm6736_vm1, %v6079_v35, %v3364_v26  ;;  %v6816_v7 = vsub.s32 %v1987_v50, %v1990_v32  ;;  %vm3624_vm5 = vcmp.lt.s32.totalorder %v6778_v58, 2  ;;  %v3628_v37 = vsel %vm3626_vm15, %v3616_v6, 2102212464 }
 0x39f   :  { %4233 = vcosq.f32 %v3367_v29  ;;  %v3633_v57 = vsel %vm3625_vm2, %v3616_v6, %v3632_v52  ;;  %v2013_v59 = vsub.s32 4, %v1989_v45  ;;  %v3635_v40 = vsel %vm3623_vm0, %v3613_v62, %v3616_v6 }
 0x3a0   :  { %4235 = vsinq.f32 %v3367_v29  ;;  %v1993_v33 = vsub.s32 0, %v6816_v7  ;;  %v3634_v43 = vsel %vm3624_vm5, %v3631_v20, %v3633_v57  ;;  %v3636_v42 = vsel %vm3626_vm15, %v3622_v31, 1326507024 }
 0x3a1   :  { %v6831_v48 = vmul.u32.u64.low %v6801_v14, %v3634_v43  ;;  %v6832_v0 = vmul.u32.u64.high %v6801_v14, %v3634_v43, %v6831_v48  ;;  %v3627_v44 = vsel %vm3623_vm0, %v3607_v51, %v3610_v54  ;;  %v3629_v24 = vsel %vm3625_vm2, %v3613_v62, %v3628_v37 }
 0x3a2   :  { %v3836_v2 = vmin.u32 %v1993_v33, %v6816_v7  ;;  %v3637_v23 = vsel %vm3625_vm2, %v3619_v63, %v3636_v42  ;;  %vm1929_vm1 = vcmp.lt.s32.totalorder %v6179_v36, 0  ;;  %v1826_v49 = vand.u32 2139095040, %v6342_v34 }
 0x3a3   :  { %v3638_v1 = vsel %vm3624_vm5, %v3635_v40, %v3637_v23  ;;  %v2014_v41 = vsel %vm1929_vm1, %v2013_v59, %v1989_v45  ;;  %v1823_v56 = vand.u32 2147483647, %v6342_v34  ;;  %v3630_v50 = vsel %vm3624_vm5, %v3627_v44, %v3629_v24 }
 0x3a4   :  { %v1995_v3 = vclz %v3836_v2  ;;  %v6848_v38 = vmul.u32.u64.low %v6801_v14, %v3638_v1  ;;  %v6849_v19 = vmul.u32.u64.high %v6801_v14, %v3638_v1, %v6848_v38  ;;  %v1827_v18 = vshrl.u32 %v1826_v49, 23 }
 0x3a5   :  { %vm3371_vm9 = vweird.f32 %v6079_v35  ;;  %vm3374_vm4 = vcmp.lt.s32.totalorder %v6803_v47, 2  ;;  %vm6855_vm8 = vcmp.le.f32.partialorder %v1927_v28, 0.7853982  ;;  %vm3375_vm6 = vcmp.eq.s32.totalorder %v6803_v47, 0 }
 0x3a6   :  { %v3837_v39 = vadd.s32 4294967294, %v1995_v3  ;;  %vm3378_vm14 = vcmp.eq.s32.totalorder %v6803_v47, 2  ;;  %v3649_v58 = vadd.s32 1, %v6832_v0  ;;  %v3831_v8 = vadd.s32 4294967169, %v1827_v18 }
 0x3a7   :  { %v1983_v46 = vadd.s32 %v6761_v60, %v6771_v27  ;;  %v2016_v55 = vsel %vm6855_vm8, 0, %v2014_v41  ;;  %v3646_v28 = vmul.u32 %v6801_v14, %v3630_v50  ;;  %vm3648_vm7 = vc.u32 %v6849_v19, %v6831_v48 }
 0x3a8   :  { %vm3838_vm12 = vcmp.lt.s32.totalorder %v3837_v39, 0  ;;  %v1830_v17 = vand.u32 8388607, %v1823_v56  ;;  %v1833_v12 = vadd.s32 1, %v3831_v8  ;;  %v3490_v60 = vand.u32 2139095040, %v6425_v30 }
 0x3a9   :  { %v4234_v54 = vpop.eup %4233  ;;  %v1998_v10 = vsel %vm3838_vm12, 0, %v3837_v39  ;;  %v3650_v6 = vsel %vm3648_vm7, %v3649_v58, %v6832_v0  ;;  %v2020_v20 = vadd.s32 3, %v2016_v55  ;;  %v3487_v44 = vand.u32 2147483647, %v6425_v30 }
 0x3aa   :  { %v4236_v62 = vpop.eup %4235  ;;  %v3379_v63 = vxor.u32 2147483648, %v4234_v54  ;;  %v1999_v45 = vsub.s32 32, %v1998_v10  ;;  %v2003_v16 = vsub.s32 4294967266, %v1998_v10  ;;  %v2000_v61 = vshll.u32 %v6816_v7, %v1998_v10 }
 0x3ab   :  { %v3376_v27 = vxor.u32 2147483648, %v4236_v62  ;;  %vm1834_vm10 = vcmp.gt.s32.totalorder %v1833_v12, 0  ;;  %v3651_v26 = vadd.s32 %v3650_v6, %v3646_v28  ;;  %v1831_v52 = vor.u32 8388608, %v1830_v17 }
 0x3ac   :  { %v3380_v21 = vsel %vm3378_vm14, %v3379_v63, %v4236_v62  ;;  %v2001_v14 = vshrl.u32 %v1983_v46, %v1999_v45  ;;  %v2004_v32 = vadd.s32 127, %v2003_v16  ;;  %v1835_v29 = vsel %vm1834_vm10, %v1833_v12, 0 }
 0x3ad   :  { %v3377_v31 = vsel %vm3375_vm6, %v4234_v54, %v3376_v27  ;;  %v3652_v57 = vadd.s32 536870912, %v3651_v26  ;;  %v1837_v59 = vand.u32 31, %v1835_v29  ;;  %v3491_v43 = vshrl.u32 %v3490_v60, 23 }
 0x3ae   :  { %v3381_v51 = vsel %vm3374_vm4, %v3377_v31, %v3380_v21  ;;  %v2002_v37 = vor.u32 %v2001_v14, %v2000_v61  ;;  %v2005_v7 = vshll.u32 %v2004_v32, 23  ;;  %v6884_v0 = vand.u32 3, %v2020_v20 }
 0x3af   :  { %v3382_v33 = vsel %vm3371_vm9, nan, %v3381_v51  ;;  %v6882_v42 = vshrl.u32 %v3652_v57, 30  ;;  %v1838_v2 = vsub.s32 32, %v1837_v59  ;;  %v6888_v1 = vshll.u32 %v1831_v52, 8 }
 0x3b0   :  { %3723 = vst [vmem:[#allocation2 + $0xe0] sm:$0xff] %v3382_v33  ;;  %v2006_v40 = vor.u32 4788187, %v2005_v7  ;;  %v2009_v47 = vcvt.s32.f32 %v2002_v37  ;;  %v3895_v41 = vadd.s32 4294967169, %v3491_v43  ;;  %v1840_v18 = vshll.u32 %v4277_v5, %v1837_v59 }
 0x3b1   :  { %v3654_v23 = vshll.u32 %v6882_v42, 30  ;;  %v1841_v35 = vshrl.u32 %v4278_v9, %v1838_v2  ;;  %v1844_v49 = vshrl.u32 %v4279_v11, %v1838_v2  ;;  %v1847_v3 = vshrl.u32 %v4280_v13, %v1838_v2 }
 0x3b2   :  { %v2007_v24 = vand.u32 2147483647, %v2006_v40  ;;  %v1850_v39 = vshrl.u32 %v4281_v15, %v1838_v2  ;;  %v3647_v58 = vadd.s32 %v6831_v48, %v6849_v19  ;;  %v1836_v8 = vshrl.u32 %v1835_v29, 5 }
 0x3b3   :  { %v6893_v38 = vsub.s32 %v3651_v26, %v3654_v23  ;;  %v1843_v46 = vshll.u32 %v4278_v9, %v1837_v59  ;;  %v1846_v55 = vshll.u32 %v4279_v11, %v1837_v59  ;;  %v1842_v10 = vor.u32 %v1841_v35, %v1840_v18 }
 0x3b4   :  { %v2010_v50 = vmul.f32 %v2009_v47, %v2007_v24  ;;  %v1849_v17 = vshll.u32 %v4280_v13, %v1837_v59  ;;  %v1852_v63 = vshll.u32 %v4281_v15, %v1837_v59  ;;  %v1853_v45 = vshrl.u32 %v4282_v22, %v1838_v2 }
 0x3b5   :  { %v3657_v54 = vsub.s32 0, %v6893_v38  ;;  %v1845_v12 = vor.u32 %v1844_v49, %v1843_v46  ;;  %v1848_v62 = vor.u32 %v1847_v3, %v1846_v55  ;;  %v3497_v60 = vadd.s32 1, %v3895_v41 }
 0x3b6   :  { %v2011_v28 = vxor.u32 2147483648, %v2010_v50  ;;  %v1851_v16 = vor.u32 %v1850_v39, %v1849_v17  ;;  %v1839_v61 = vshrl.u32 %v4277_v5, %v1838_v2  ;;  %v1854_v6 = vor.u32 %v1853_v45, %v1852_v63 }
 0x3b7   :  { %v3900_v19 = vmin.u32 %v3657_v54, %v6893_v38  ;;  %vm1855_vm13 = vcmp.lt.s32.totalorder %v1836_v8, 1  ;;  %vm3593_vm11 = vcmp.lt.s32.totalorder %v6252_v53, 0  ;;  %vm1856_vm3 = vcmp.lt.s32.totalorder %v1836_v8, 2 }
 0x3b8   :  { %v2012_v48 = vsel %vm1929_vm1, %v2011_v28, %v2010_v50  ;;  %vm1858_vm0 = vcmp.lt.s32.totalorder %v1836_v8, 4  ;;  %vm1857_vm15 = vcmp.lt.s32.totalorder %v1836_v8, 3  ;;  %v1863_v32 = vsel %vm1855_vm13, %v1842_v10, %v1845_v12 }
 0x3b9   :  { %v2015_v27 = vsel %vm6855_vm8, %v6179_v36, %v2012_v48  ;;  %v3659_v21 = vclz %v3900_v19  ;;  %v1860_v14 = vsel %vm1858_vm0, %v1848_v62, 2102212464  ;;  %v1859_v31 = vsel %vm1855_vm13, %v1839_v61, %v1842_v10 }
 0x3ba   :  { %4237 = vcosq.f32 %v2015_v27  ;;  %v1864_v20 = vsel %vm1858_vm0, %v1851_v16, 920167782  ;;  %v1867_v52 = vsel %vm1855_vm13, %v1845_v12, %v1848_v62  ;;  %v1861_v25 = vsel %vm1857_vm15, %v1845_v12, %v1860_v14 }
 0x3bb   :  { %4239 = vsinq.f32 %v2015_v27  ;;  %v3901_v26 = vadd.s32 4294967294, %v3659_v21  ;;  %v1865_v29 = vsel %vm1857_vm15, %v1848_v62, %v1864_v20  ;;  %v1868_v51 = vsel %vm1858_vm0, %v1854_v6, 1326507024 }
 0x3bc   :  { %vm3498_vm2 = vcmp.gt.s32.totalorder %v3497_v60, 0  ;;  %v3677_v37 = vsub.s32 4, %v6882_v42  ;;  %v1866_v7 = vsel %vm1856_vm3, %v1863_v32, %v1865_v29  ;;  %v1869_v57 = vsel %vm1857_vm15, %v1851_v16, %v1868_v51 }
 0x3bd   :  { %vm3902_vm5 = vcmp.lt.s32.totalorder %v3901_v26, 0  ;;  %vm2023_vm1 = vcmp.eq.s32.totalorder %v6884_v0, 0  ;;  %v1870_v59 = vsel %vm1856_vm3, %v1867_v52, %v1869_v57  ;;  %vm2022_vm9 = vcmp.lt.s32.totalorder %v6884_v0, 2 }
 0x3be   :  { %v3662_v33 = vsel %vm3902_vm5, 0, %v3901_v26  ;;  %v6918_v43 = vmul.u32.u64.low %v6888_v1, %v1866_v7  ;;  %v6919_v40 = vmul.u32.u64.high %v6888_v1, %v1866_v7, %v6918_v43  ;;  %v1862_v47 = vsel %vm1856_vm3, %v1859_v31, %v1861_v25 }
 0x3bf   :  { %v3663_v2 = vsub.s32 32, %v3662_v33  ;;  %v3667_v24 = vsub.s32 4294967266, %v3662_v33  ;;  %v3499_v23 = vsel %vm3498_vm2, %v3497_v60, 0  ;;  %vm2019_vm4 = vweird.f32 %v6179_v36 }
 0x3c0   :  { %vm2026_vm8 = vcmp.eq.s32.totalorder %v6884_v0, 2  ;;  %v6927_v35 = vmul.u32.u64.low %v6888_v1, %v1870_v59  ;;  %v6928_v49 = vmul.u32.u64.high %v6888_v1, %v1870_v59, %v6927_v35  ;;  %v3501_v3 = vand.u32 31, %v3499_v23 }
 0x3c1   :  { %v3664_v41 = vshll.u32 %v6893_v38, %v3662_v33  ;;  %v3665_v50 = vshrl.u32 %v3647_v58, %v3663_v2  ;;  %v3668_v18 = vadd.s32 127, %v3667_v24  ;;  %v3494_v39 = vand.u32 8388607, %v3487_v44 }
 0x3c2   :  { %v3678_v8 = vsel %vm3593_vm11, %v3677_v37, %v6882_v42  ;;  %v1878_v46 = vmul.u32 %v6888_v1, %v1862_v47  ;;  %v1881_v55 = vadd.s32 1, %v6919_v40  ;;  %v6938_v28 = vsub.s32 32, %v3501_v3 }
 0x3c3   :  { %v3666_v10 = vor.u32 %v3665_v50, %v3664_v41  ;;  %v3669_v17 = vshll.u32 %v3668_v18, 23  ;;  %v6940_v12 = vshrl.u32 %v3499_v23, 5  ;;  %v3504_v38 = vshll.u32 %v4277_v5, %v3501_v3 }
 0x3c4   :  { %v4238_v54 = vpop.eup %4237  ;;  %vm1880_vm6 = vc.u32 %v6928_v49, %v6918_v43  ;;  %v3507_v42 = vshll.u32 %v4278_v9, %v3501_v3  ;;  %v3513_v1 = vshll.u32 %v4280_v13, %v3501_v3  ;;  %v3505_v27 = vshrl.u32 %v4278_v9, %v6938_v28 }
 0x3c5   :  { %v4240_v58 = vpop.eup %4239  ;;  %v2027_v62 = vxor.u32 2147483648, %v4238_v54  ;;  %v3670_v45 = vor.u32 4788187, %v3669_v17  ;;  %v3673_v48 = vcvt.s32.f32 %v3666_v10  ;;  %v1882_v19 = vsel %vm1880_vm6, %v1881_v55, %v6919_v40 }
 0x3c6   :  { %v2024_v63 = vxor.u32 2147483648, %v4240_v58  ;;  %v1883_v60 = vadd.s32 %v1882_v19, %v1878_v46  ;;  %v3508_v61 = vshrl.u32 %v4279_v11, %v6938_v28  ;;  %v3511_v14 = vshrl.u32 %v4280_v13, %v6938_v28 }
 0x3c7   :  { %v2028_v16 = vsel %vm2026_vm8, %v2027_v62, %v4240_v58  ;;  %v3671_v21 = vand.u32 2147483647, %v3670_v45  ;;  %v3514_v32 = vshrl.u32 %v4281_v15, %v6938_v28  ;;  %v3506_v20 = vor.u32 %v3505_v27, %v3504_v38 }
 0x3c8   :  { %v2025_v6 = vsel %vm2023_vm1, %v4238_v54, %v2024_v63  ;;  %v1884_v31 = vadd.s32 536870912, %v1883_v60  ;;  %v3510_v9 = vshll.u32 %v4279_v11, %v3501_v3  ;;  %v3509_v29 = vor.u32 %v3508_v61, %v3507_v42 }
 0x3c9   :  { %v2029_v26 = vsel %vm2022_vm9, %v2025_v6, %v2028_v16  ;;  %v3674_v25 = vmul.f32 %v3673_v48, %v3671_v21  ;;  %v3515_v51 = vor.u32 %v3514_v32, %v3513_v1  ;;  %v3495_v13 = vor.u32 8388608, %v3494_v39 }
 0x3ca   :  { %v2030_v52 = vsel %vm2019_vm4, nan, %v2029_v26  ;;  %v6965_v37 = vshrl.u32 %v1884_v31, 30  ;;  %v3517_v7 = vshrl.u32 %v4282_v22, %v6938_v28  ;;  %vm6971_vm14 = vcmp.le.f32.partialorder %v3591_v4, 0.7853982 }
 0x3cb   :  { %3710 = vst [vmem:[#allocation2 + $0x78] sm:$0xff] %v2030_v52  ;;  %v3675_v11 = vxor.u32 2147483648, %v3674_v25  ;;  %v3512_v57 = vor.u32 %v3511_v14, %v3510_v9  ;;  %v3516_v36 = vshll.u32 %v4281_v15, %v3501_v3  ;;  %v3680_v33 = vsel %vm6971_vm14, 0, %v3678_v8 }
 0x3cc   :  { %v1886_v59 = vshll.u32 %v6965_v37, 30  ;;  %vm3519_vm12 = vcmp.lt.s32.totalorder %v6940_v12, 1  ;;  %vm3522_vm7 = vcmp.lt.s32.totalorder %v6940_v12, 4  ;;  %vm3521_vm10 = vcmp.lt.s32.totalorder %v6940_v12, 3 }
 0x3cd   :  { %v3676_v22 = vsel %vm3593_vm11, %v3675_v11, %v3674_v25  ;;  %v3518_v4 = vor.u32 %v3517_v7, %v3516_v36  ;;  %v3527_v40 = vsel %vm3519_vm12, %v3506_v20, %v3509_v29  ;;  %v3528_v2 = vsel %vm3522_vm7, %v3515_v51, 920167782 }
 0x3ce   :  { %v3679_v15 = vsel %vm6971_vm14, %v6252_v53, %v3676_v22  ;;  %v1887_v24 = vsub.s32 %v1883_v60, %v1886_v59  ;;  %v3535_v47 = vshll.u32 %v3495_v13, 8  ;;  %v3684_v23 = vadd.s32 3, %v3680_v33 }
 0x3cf   :  { %4241 = vcosq.f32 %v3679_v15  ;;  %vm3520_vm13 = vcmp.lt.s32.totalorder %v6940_v12, 2  ;;  %v3529_v35 = vsel %vm3521_vm10, %v3512_v57, %v3528_v2  ;;  %v3524_v41 = vsel %vm3522_vm7, %v3512_v57, 2102212464 }
 0x3d0   :  { %4243 = vsinq.f32 %v3679_v15  ;;  %v1889_v3 = vsub.s32 0, %v1887_v24  ;;  %v3530_v50 = vsel %vm3520_vm13, %v3527_v40, %v3529_v35  ;;  %v3531_v18 = vsel %vm3519_vm12, %v3509_v29, %v3512_v57 }
 0x3d1   :  { %v3532_v39 = vsel %vm3522_vm7, %v3518_v4, 1326507024  ;;  %v7002_v8 = vmul.u32.u64.low %v3535_v47, %v3530_v50  ;;  %v7003_v46 = vmul.u32.u64.high %v3535_v47, %v3530_v50, %v7002_v8  ;;  %v3503_v54 = vshrl.u32 %v4277_v5, %v6938_v28 }
 0x3d2   :  { %v3832_v55 = vmin.u32 %v1889_v3, %v1887_v24  ;;  %v3533_v10 = vsel %vm3521_vm10, %v3515_v51, %v3532_v39  ;;  %v3525_v62 = vsel %vm3521_vm10, %v3509_v29, %v3524_v41  ;;  %v3685_v42 = vand.u32 3, %v3684_v23 }
 0x3d3   :  { %v3534_v17 = vsel %vm3520_vm13, %v3531_v18, %v3533_v10  ;;  %v3523_v58 = vsel %vm3519_vm12, %v3503_v54, %v3506_v20  ;;  %v3545_v28 = vadd.s32 1, %v7003_v46  ;;  %v1879_v19 = vadd.s32 %v6918_v43, %v6928_v49 }
 0x3d4   :  { %v1891_v38 = vclz %v3832_v55  ;;  %v7016_v1 = vmul.u32.u64.low %v3535_v47, %v3534_v17  ;;  %v7017_v63 = vmul.u32.u64.high %v3535_v47, %v3534_v17, %v7016_v1  ;;  %v3526_v5 = vsel %vm3520_vm13, %v3523_v58, %v3525_v62 }
 0x3d5   :  { %vm3687_vm3 = vcmp.eq.s32.totalorder %v3685_v42, 0  ;;  %v3542_v21 = vmul.u32 %v3535_v47, %v3526_v5  ;;  %vm3690_vm15 = vcmp.eq.s32.totalorder %v3685_v42, 2  ;;  %vm3683_vm2 = vweird.f32 %v6252_v53 }
 0x3d6   :  { %v3833_v45 = vadd.s32 4294967294, %v1891_v38  ;;  %vm3544_vm0 = vc.u32 %v7017_v63, %v7002_v8  ;;  %vm3686_vm5 = vcmp.lt.s32.totalorder %v3685_v42, 2  ;;  %v1909_v33 = vsub.s32 4, %v6965_v37 }
 0x3d7   :  { %v3546_v32 = vsel %vm3544_vm0, %v3545_v28, %v7003_v46  ;;  %vm1825_vm1 = vcmp.lt.s32.totalorder %v6342_v34, 0  ;;  %vm1824_vm9 = vcmp.le.f32.partialorder %v1823_v56, 0.7853982  ;;  %v3543_v41 = vadd.s32 %v7002_v8, %v7017_v63 }
 0x3d8   :  { %vm3834_vm11 = vcmp.lt.s32.totalorder %v3833_v45, 0  ;;  %v3547_v9 = vadd.s32 %v3546_v32, %v3542_v21  ;;  %v1910_v40 = vsel %vm1825_vm1, %v1909_v33, %v6965_v37  ;;  %vm1915_vm12 = vweird.f32 %v6342_v34 }
 0x3d9   :  { %v4242_v48 = vpop.eup %4241  ;;  %v1894_v16 = vsel %vm3834_vm11, 0, %v3833_v45  ;;  %v1912_v47 = vsel %vm1824_vm9, 0, %v1910_v40  ;;  %vm3489_vm7 = vcmp.lt.s32.totalorder %v6425_v30, 0  ;;  %vm3488_vm10 = vcmp.le.f32.partialorder %v3487_v44, 0.7853982 }
 0x3da   :  { %v4244_v60 = vpop.eup %4243  ;;  %v3691_v27 = vxor.u32 2147483648, %v4242_v48  ;;  %v1895_v61 = vsub.s32 32, %v1894_v16  ;;  %v1899_v6 = vsub.s32 4294967266, %v1894_v16  ;;  %v1896_v12 = vshll.u32 %v1887_v24, %v1894_v16 }
 0x3db   :  { %v3688_v14 = vxor.u32 2147483648, %v4244_v60  ;;  %v3548_v29 = vadd.s32 536870912, %v3547_v9  ;;  %v1916_v35 = vadd.s32 3, %v1912_v47  ;;  %vm3579_vm0 = vweird.f32 %v6425_v30 }
 0x3dc   :  { %v3692_v26 = vsel %vm3690_vm15, %v3691_v27, %v4244_v60  ;;  %v1897_v31 = vshrl.u32 %v1879_v19, %v1895_v61  ;;  %v1900_v20 = vadd.s32 127, %v1899_v6 }
 0x3dd   :  { %v3689_v43 = vsel %vm3687_vm3, %v4242_v48, %v3688_v14  ;;  %v3549_v7 = vshrl.u32 %v3548_v29, 30  ;;  %v1917_v56 = vand.u32 3, %v1916_v35 }
 0x3de   :  { %v3693_v49 = vsel %vm3686_vm5, %v3689_v43, %v3692_v26  ;;  %v1898_v52 = vor.u32 %v1897_v31, %v1896_v12  ;;  %v1901_v25 = vshll.u32 %v1900_v20, 23 }
 0x3df   :  { %v3694_v51 = vsel %vm3683_vm2, nan, %v3693_v49  ;;  %v3550_v57 = vshll.u32 %v3549_v7, 30  ;;  %vm1922_vm8 = vcmp.eq.s32.totalorder %v1917_v56, 2  ;;  %vm1919_vm6 = vcmp.eq.s32.totalorder %v1917_v56, 0 }
 0x3e0   :  { %3726 = vst [vmem:[#allocation2 + $0xf8] sm:$0xff] %v3694_v51  ;;  %v1902_v13 = vor.u32 4788187, %v1901_v25  ;;  %v1905_v11 = vcvt.s32.f32 %v1898_v52  ;;  %vm1918_vm14 = vcmp.lt.s32.totalorder %v1917_v56, 2  ;;  %v3573_v48 = vsub.s32 4, %v3549_v7 }
 0x3e1   :  { %v3551_v59 = vsub.s32 %v3547_v9, %v3550_v57 }
 0x3e2   :  { %v1903_v0 = vand.u32 2147483647, %v1902_v13  ;;  %v3574_v60 = vsel %vm3489_vm7, %v3573_v48, %v3549_v7 }
 0x3e3   :  { %v3553_v53 = vsub.s32 0, %v3551_v59  ;;  %v3576_v61 = vsel %vm3488_vm10, 0, %v3574_v60 }
 0x3e4   :  { %v1906_v36 = vmul.f32 %v1905_v11, %v1903_v0  ;;  %v3580_v6 = vadd.s32 3, %v3576_v61 }
 0x3e5   :  { %v3896_v2 = vmin.u32 %v3553_v53, %v3551_v59 }
 0x3e6   :  { %v1907_v22 = vxor.u32 2147483648, %v1906_v36 }
 0x3e7   :  { %v3555_v24 = vclz %v3896_v2 }
 0x3e8   :  { %v1908_v4 = vsel %vm1825_vm1, %v1907_v22, %v1906_v36 }
 0x3e9   :  { %v1911_v15 = vsel %vm1824_vm9, %v6342_v34, %v1908_v4  ;;  %v3897_v23 = vadd.s32 4294967294, %v3555_v24  ;;  %v3581_v34 = vand.u32 3, %v3580_v6 }
 0x3ea   :  { %4245 = vcosq.f32 %v1911_v15 }
 0x3eb   :  { %4247 = vsinq.f32 %v1911_v15  ;;  %vm3898_vm4 = vcmp.lt.s32.totalorder %v3897_v23, 0  ;;  %vm3586_vm13 = vcmp.eq.s32.totalorder %v3581_v34, 2  ;;  %vm3583_vm11 = vcmp.eq.s32.totalorder %v3581_v34, 0 }
 0x3ec   :  { %v3558_v3 = vsel %vm3898_vm4, 0, %v3897_v23  ;;  %vm3582_vm3 = vcmp.lt.s32.totalorder %v3581_v34, 2 }
 0x3ed   :  { %v3559_v50 = vsub.s32 32, %v3558_v3  ;;  %v3563_v18 = vsub.s32 4294967266, %v3558_v3  ;;  %v3560_v39 = vshll.u32 %v3551_v59, %v3558_v3 }
 0x3ef   :  { %v3561_v46 = vshrl.u32 %v3543_v41, %v3559_v50  ;;  %v3564_v37 = vadd.s32 127, %v3563_v18 }
 0x3f1   :  { %v3562_v54 = vor.u32 %v3561_v46, %v3560_v39  ;;  %v3565_v10 = vshll.u32 %v3564_v37, 23 }
 0x3f3   :  { %v3566_v62 = vor.u32 4788187, %v3565_v10  ;;  %v3569_v8 = vcvt.s32.f32 %v3562_v54 }
 0x3f4   :  { %v4246_v55 = vpop.eup %4245 }
 0x3f5   :  { %v4248_v17 = vpop.eup %4247  ;;  %v1923_v38 = vxor.u32 2147483648, %v4246_v55  ;;  %v3567_v45 = vand.u32 2147483647, %v3566_v62 }
 0x3f6   :  { %v1920_v58 = vxor.u32 2147483648, %v4248_v17 }
 0x3f7   :  { %v1924_v42 = vsel %vm1922_vm8, %v1923_v38, %v4248_v17  ;;  %v3570_v28 = vmul.f32 %v3569_v8, %v3567_v45 }
 0x3f8   :  { %v1921_v1 = vsel %vm1919_vm6, %v4246_v55, %v1920_v58 }
 0x3f9   :  { %v1925_v63 = vsel %vm1918_vm14, %v1921_v1, %v1924_v42  ;;  %v3571_v19 = vxor.u32 2147483648, %v3570_v28 }
 0x3fa   :  { %v1926_v5 = vsel %vm1915_vm12, nan, %v1925_v63 }
 0x3fb   :  { %3709 = vst [vmem:[#allocation2 + $0x70] sm:$0xff] %v1926_v5  ;;  %v3572_v16 = vsel %vm3489_vm7, %v3571_v19, %v3570_v28 }
 0x3fc   :  { %v3575_v27 = vsel %vm3488_vm10, %v6425_v30, %v3572_v16 }
 0x3fd   :  { %4249 = vcosq.f32 %v3575_v27 }
 0x3fe   :  { %4251 = vsinq.f32 %v3575_v27 }
 0x407   :  { %v4250_v21 = vpop.eup %4249 }
 0x408   :  { %v4252_v14 = vpop.eup %4251  ;;  %v3587_v12 = vxor.u32 2147483648, %v4250_v21 }
 0x409   :  { %v3584_v32 = vxor.u32 2147483648, %v4252_v14 }
 0x40a   :  { %v3588_v26 = vsel %vm3586_vm13, %v3587_v12, %v4252_v14 }
 0x40b   :  { %v3585_v44 = vsel %vm3583_vm11, %v4250_v21, %v3584_v32 }
 0x40c   :  { %v3589_v31 = vsel %vm3582_vm3, %v3585_v44, %v3588_v26 }
 0x40d   :  { %v3590_v20 = vsel %vm3579_vm0, nan, %v3589_v31 }
 0x40e   :  { %3725 = vst [vmem:[#allocation2 + $0xf0] sm:$0xff] %v3590_v20 }
 0x40f   :  { %4264 = shalt.err (!%p4261_p4)
}
 0x410   :  { %s4265_s20 = scalar_lea.hbm %s7057_s2, 4096 }
 0x411   :  { %p4266_p5 = scmp.ne.s32.totalorder %s7057_s2, %s4265_s20  ;;  %p4269_p6 = scmp.lt.u32.totalorder %s4265_s20, %s7057_s2 }
 0x413   :  { %p4271_p7 = pnand %p4269_p6, %p4266_p5 }
 0x415   :  { %4274 = shalt.err (!%p4271_p7)
}
 0x416   :  { %s4284_s25 = smov 128   ;;  %s4285_s26 = smov 8  }
 0x417   :  { %3738 = dma.vmem_to_hbm [thread:$0]  %s3733_s17, 4096, %s7057_s2, [#allocation3], %s4284_s25, %s4284_s25, %s4285_s26  }
 0x418   :  { %4275 = dma.done.wait [#allocation3], 4096  }
 0x419   :  { %4276 = vsyncadd [#allocation3], 4294963200 }
 0x41a   :  { %3742 = vsyncpa [#allocation3], 1 }

</bundles_post_ra>
